<compile_context>
chip_gen: v7x
topology: tpu7x:2x2x1
jax: 0.10.0
libtpu: 0.0.40
codegen_flags: <defaults>
</compile_context>

<pallas_src>
import jax
import jax.numpy as jnp
from jax import lax
from jax.experimental import pallas as pl
from jax.experimental.pallas import tpu as pltpu

LANE = 128      # vreg lane width: each gate block padded to a multiple of this
SUBLANE = 8     # vreg sublane count: batch padded to a multiple of this


def _round_up(x, m):
    return (x + m - 1) // m * m


# ----------------------------------------------------------------------------
# Fused kernel: all LSTM layers + final FC in one pallas_call (no grid).
# ----------------------------------------------------------------------------
def _make_fused_lstm_kernel(T, B_pad, H_pad, num_layers, unroll):
    n_w = 3 * num_layers

    def kernel(*refs):
        x_ref = refs[0]                      # (T*B_pad, D)        f32
        layer_refs = refs[1:1 + n_w]         # per layer: wih, whh, bias
        w_fc_ref = refs[1 + n_w]             # (H_pad, O)          bf16
        b_fc_ref = refs[2 + n_w]             # (1, O)              f32
        out_ref = refs[3 + n_w]              # (B_pad, O)          f32
        seq_scr = refs[4 + n_w]              # (T*B_pad, H_pad)    f32  layer output seq
        proj_scr = refs[5 + n_w]             # (T*B_pad, 4*H_pad)  f32  hoisted projection

        def run_layer(layer, layer_in_bf16):
            wih = layer_refs[3 * layer][...]          # (Din_pad, 4*H_pad) bf16
            whh = layer_refs[3 * layer + 1][...]      # (H_pad,  4*H_pad) bf16
            bias = layer_refs[3 * layer + 2][...]     # (1, 4*H_pad)      f32

            # Hoisted input projection over ALL timesteps: one big MXU matmul,
            # bias folded in, so the recurrence does a single matmul per step.
            proj_scr[...] = (
                jnp.dot(layer_in_bf16, wih, preferred_element_type=jnp.float32)
                + bias)

            is_last = layer == num_layers - 1

            def step(t, carry):
                h, c = carry
                row = pl.multiple_of(t * B_pad, B_pad)
                gates = proj_scr[pl.ds(row, B_pad), :] + jnp.dot(
                    h.astype(jnp.bfloat16), whh,
                    preferred_element_type=jnp.float32)
                # PyTorch gate order [i, f, g, o]; slices are 128-lane aligned.
                i_g = jax.nn.sigmoid(gates[:, 0 * H_pad:1 * H_pad])
                f_g = jax.nn.sigmoid(gates[:, 1 * H_pad:2 * H_pad])
                g_g = jnp.tanh(gates[:, 2 * H_pad:3 * H_pad])
                o_g = jax.nn.sigmoid(gates[:, 3 * H_pad:4 * H_pad])
                c_new = f_g * c + i_g * g_g
                h_new = o_g * jnp.tanh(c_new)
                if not is_last:
                    # Only intermediate layers need the full sequence (it is the
                    # next layer's input); the last layer only needs h_T.
                    seq_scr[pl.ds(row, B_pad), :] = h_new
                return h_new, c_new

            h0 = jnp.zeros((B_pad, H_pad), jnp.float32)
            c0 = jnp.zeros((B_pad, H_pad), jnp.float32)
            h_last, _ = lax.fori_loop(0, T, step, (h0, c0), unroll=unroll)
            return h_last

        h_last = run_layer(0, x_ref[...].astype(jnp.bfloat16))
        for layer in range(1, num_layers):
            h_last = run_layer(layer, seq_scr[...].astype(jnp.bfloat16))

        # out[:, -1, :] -> dropout (identity in eval) -> fc, fused here so the
        # tiny (B, H) @ (H, O) matmul does not pay a separate launch.
        out_ref[...] = (
            jnp.dot(h_last.astype(jnp.bfloat16), w_fc_ref[...],
                    preferred_element_type=jnp.float32)
            + b_fc_ref[...]).astype(out_ref.dtype)

    return kernel


def _full_spec(arr):
    # Whole array resident in VMEM (no grid).
    return pl.BlockSpec(arr.shape, lambda: (0,) * arr.ndim)


# ----------------------------------------------------------------------------
# Wrapper
# ----------------------------------------------------------------------------
@jax.jit
def lstm_model_forward(x_btd, params):
    """Forward pass matching LSTMModel.forward (inference / eval mode).

    x_btd: (B, T, D) float32, batch_first like the PyTorch module.
    """
    B, T, D = x_btd.shape
    lstm_layers = params["lstm"]
    num_layers = len(lstm_layers)
    H_pad = lstm_layers[0]["whh_t"].shape[0]
    O = params["fc"]["w_t"].shape[1]
    B_pad = _round_up(B, SUBLANE)

    # Zero-pad the batch to a sublane multiple and flatten time-major once.
    # This touches only the tiny (B, T, D) input; all large activations stay
    # inside the kernel's VMEM scratch.
    x_p = jnp.pad(x_btd, ((0, B_pad - B), (0, 0), (0, 0)))
    x_flat = jnp.transpose(x_p, (1, 0, 2)).reshape(T * B_pad, D)

    flat_inputs = [x_flat]
    for lp in lstm_layers:
        flat_inputs += [lp["wih_t"], lp["whh_t"], lp["bias"]]
    flat_inputs += [params["fc"]["w_t"], params["fc"]["b"]]

    kernel = _make_fused_lstm_kernel(T, B_pad, H_pad, num_layers,
                                     unroll=(T <= 16))

    # VMEM budget (weights + seq/proj scratch) is well under the 16/32 MiB
    # scoped default at these sizes; for very large H, tile W_hh along the 4H
    # output dim and raise vmem_limit_bytes (v7x has only 64 MiB of VMEM).
    out = pl.pallas_call(
        kernel,
        out_shape=jax.ShapeDtypeStruct((B_pad, O), jnp.float32),
        in_specs=[_full_spec(a) for a in flat_inputs],
        out_specs=pl.BlockSpec((B_pad, O), lambda: (0, 0)),
        scratch_shapes=[
            pltpu.VMEM((T * B_pad, H_pad), jnp.float32),       # layer output seq
            pltpu.VMEM((T * B_pad, 4 * H_pad), jnp.float32),   # hoisted projection
        ],
    )(*flat_inputs)
    return out[:B]


# ----------------------------------------------------------------------------
# Deterministic parameter init (shapes follow nn.LSTM / nn.Linear), packed for
# the kernel: transposed, each gate block padded to H_pad lanes, bf16 weights.
# ----------------------------------------------------------------------------
def init_params(key, input_dim, hidden_dim, num_layers, output_dim):
    H = hidden_dim
    H_pad = _round_up(H, LANE)
    stdv = 1.0 / (hidden_dim ** 0.5)

    def pad_axis(a, axis, new):
        pads = [(0, 0)] * a.ndim
        pads[axis] = (0, new - a.shape[axis])
        return jnp.pad(a, pads)

    def pack_gate_cols(w_t):
        # (rows, 4H) with gate-major columns [i|f|g|o] -> (rows, 4*H_pad),
        # zero-padding each gate block so slices land on 128-lane boundaries.
        rows = w_t.shape[0]
        return pad_axis(w_t.reshape(rows, 4, H), 2, H_pad).reshape(rows, 4 * H_pad)

    params = {"lstm": [], "fc": {}}
    for layer in range(num_layers):
        d_in = input_dim if layer == 0 else hidden_dim
        d_in_pad = input_dim if layer == 0 else H_pad
        key, k1, k2, k3, k4 = jax.random.split(key, 5)
        w_ih = jax.random.uniform(k1, (4 * H, d_in), minval=-stdv, maxval=stdv,
                                  dtype=jnp.float32)
        w_hh = jax.random.uniform(k2, (4 * H, H), minval=-stdv, maxval=stdv,
                                  dtype=jnp.float32)
        b_ih = jax.random.uniform(k3, (4 * H,), minval=-stdv, maxval=stdv,
                                  dtype=jnp.float32)
        b_hh = jax.random.uniform(k4, (4 * H,), minval=-stdv, maxval=stdv,
                                  dtype=jnp.float32)
        wih_t = pad_axis(pack_gate_cols(w_ih.T), 0, d_in_pad)   # (d_in_pad, 4H_pad)
        whh_t = pad_axis(pack_gate_cols(w_hh.T), 0, H_pad)      # (H_pad,    4H_pad)
        bias = pack_gate_cols((b_ih + b_hh)[None, :])           # (1,        4H_pad)
        params["lstm"].append({
            "wih_t": wih_t.astype(jnp.bfloat16),   # bf16 MXU operand
            "whh_t": whh_t.astype(jnp.bfloat16),   # bf16 MXU operand
            "bias": bias.astype(jnp.float32),      # folded into f32 projection
        })

    key, kf1, kf2 = jax.random.split(key, 3)
    w_fc = jax.random.uniform(kf1, (output_dim, hidden_dim), minval=-stdv,
                              maxval=stdv, dtype=jnp.float32)
    b_fc = jax.random.uniform(kf2, (output_dim,), minval=-stdv, maxval=stdv,
                              dtype=jnp.float32)
    params["fc"]["w_t"] = pad_axis(w_fc.T, 0, H_pad).astype(jnp.bfloat16)  # (H_pad, O)
    params["fc"]["b"] = b_fc[None, :].astype(jnp.float32)                  # (1, O)
    return params


if __name__ == "__main__":
    # Small shapes consistent with the module: (batch, seq, input_dim)
    B, T, D = 2, 8, 4
    H, L, O = 32, 3, 1

    key = jax.random.PRNGKey(0)
    key, kx = jax.random.split(key)
    x = jax.random.normal(kx, (B, T, D), dtype=jnp.float32)

    params = init_params(key, input_dim=D, hidden_dim=H,
                         num_layers=L, output_dim=O)

    # TODO(synk): training-mode dropout (inter-layer and nn.Dropout) omitted;
    # eval-mode forward treats it as identity, matching model.eval().
    out = lstm_model_forward(x, params)
    out = jax.block_until_ready(out)
    assert out.shape == (B, O) and bool(jnp.all(jnp.isfinite(out)))
    print("KERNEL_OK")
</pallas_src>

<mosaic_0001>
module attributes {stable_mosaic.version = 11 : i64} {
  func.func @kernel(%arg0: memref<64x4xf32, #tpu.memory_space<vmem>>, %arg1: memref<4x512xbf16, #tpu.memory_space<vmem>>, %arg2: memref<128x512xbf16, #tpu.memory_space<vmem>>, %arg3: memref<1x512xf32, #tpu.memory_space<vmem>>, %arg4: memref<128x512xbf16, #tpu.memory_space<vmem>>, %arg5: memref<128x512xbf16, #tpu.memory_space<vmem>>, %arg6: memref<1x512xf32, #tpu.memory_space<vmem>>, %arg7: memref<128x512xbf16, #tpu.memory_space<vmem>>, %arg8: memref<128x512xbf16, #tpu.memory_space<vmem>>, %arg9: memref<1x512xf32, #tpu.memory_space<vmem>>, %arg10: memref<128x1xbf16, #tpu.memory_space<vmem>>, %arg11: memref<1x1xf32, #tpu.memory_space<vmem>>, %arg12: memref<8x1xf32, #tpu.memory_space<vmem>>, %arg13: memref<64x128xf32, #tpu.memory_space<vmem>>, %arg14: memref<64x512xf32, #tpu.memory_space<vmem>>) attributes {dimension_semantics = [], scalar_prefetch = 0 : i64, scratch_operands = 2 : i64, tpu.core_type = #tpu.core_type<tc>} {
    %c0 = arith.constant 0 : index
    %c0_0 = arith.constant 0 : index
    %0 = vector.load %arg0[%c0, %c0_0] : memref<64x4xf32, #tpu.memory_space<vmem>>, vector<64x4xf32>
    %1 = arith.truncf %0 : vector<64x4xf32> to vector<64x4xbf16>
    %c0_1 = arith.constant 0 : index
    %c0_2 = arith.constant 0 : index
    %2 = vector.load %arg1[%c0_1, %c0_2] : memref<4x512xbf16, #tpu.memory_space<vmem>>, vector<4x512xbf16>
    %c0_3 = arith.constant 0 : index
    %c0_4 = arith.constant 0 : index
    %3 = vector.load %arg2[%c0_3, %c0_4] : memref<128x512xbf16, #tpu.memory_space<vmem>>, vector<128x512xbf16>
    %c0_5 = arith.constant 0 : index
    %c0_6 = arith.constant 0 : index
    %4 = vector.load %arg3[%c0_5, %c0_6] : memref<1x512xf32, #tpu.memory_space<vmem>>, vector<1x512xf32>
    %cst = arith.constant dense<0.000000e+00> : vector<64x512xf32>
    %5 = tpu.matmul %1, %2, %cst {dimension_numbers = #tpu.dot_dimension_numbers<[1], [0], [0], [1], [0, 0, 1, 1], [], []>} : vector<64x4xbf16>, vector<4x512xbf16>, vector<64x512xf32> -> vector<64x512xf32>
    %6 = vector.broadcast %4 : vector<1x512xf32> to vector<64x512xf32>
    %7 = arith.addf %5, %6 : vector<64x512xf32>
    %c0_7 = arith.constant 0 : index
    %c0_8 = arith.constant 0 : index
    %8 = vector.load %arg14[%c0_7, %c0_8] : memref<64x512xf32, #tpu.memory_space<vmem>>, vector<64x512xf32>
    tpu.vector_store %arg14[%c0_7, %c0_8], %7 {strides = array<i32>} : memref<64x512xf32, #tpu.memory_space<vmem>>, vector<64x512xf32>,
    %cst_9 = arith.constant 0.000000e+00 : f32
    %9 = vector.broadcast %cst_9 : f32 to vector<8x128xf32>
    %cst_10 = arith.constant 0.000000e+00 : f32
    %10 = vector.broadcast %cst_10 : f32 to vector<8x128xf32>
    %c0_i32 = arith.constant 0 : i32
    %c8_i32 = arith.constant 8 : i32
    %11 = arith.muli %c0_i32, %c8_i32 : i32
    %12 = tpu.assume_multiple %11, 8 : i32
    %13 = arith.index_cast %12 : i32 to index
    %c0_11 = arith.constant 0 : index
    %14 = vector.load %arg14[%13, %c0_11] : memref<64x512xf32, #tpu.memory_space<vmem>>, vector<8x512xf32>
    %15 = arith.truncf %9 : vector<8x128xf32> to vector<8x128xbf16>
    %cst_12 = arith.constant dense<0.000000e+00> : vector<8x512xf32>
    %16 = tpu.matmul %15, %3, %cst_12 {dimension_numbers = #tpu.dot_dimension_numbers<[1], [0], [0], [1], [0, 0, 1, 1], [], []>} : vector<8x128xbf16>, vector<128x512xbf16>, vector<8x512xf32> -> vector<8x512xf32>
    %17 = arith.addf %14, %16 : vector<8x512xf32>
    %18 = vector.extract_strided_slice %17 {offsets = [0, 0], sizes = [8, 128], strides = [1, 1]} : vector<8x512xf32> to vector<8x128xf32>
    %19 = arith.negf %18 : vector<8x128xf32>
    %20 = math.exp %19 : vector<8x128xf32>
    %cst_13 = arith.constant 1.000000e+00 : f32
    %21 = vector.broadcast %cst_13 : f32 to vector<8x128xf32>
    %22 = arith.addf %21, %20 : vector<8x128xf32>
    %23 = arith.divf %21, %22 : vector<8x128xf32>
    %24 = vector.extract_strided_slice %17 {offsets = [0, 128], sizes = [8, 128], strides = [1, 1]} : vector<8x512xf32> to vector<8x128xf32>
    %25 = arith.negf %24 : vector<8x128xf32>
    %26 = math.exp %25 : vector<8x128xf32>
    %cst_14 = arith.constant 1.000000e+00 : f32
    %27 = vector.broadcast %cst_14 : f32 to vector<8x128xf32>
    %28 = arith.addf %27, %26 : vector<8x128xf32>
    %29 = arith.divf %27, %28 : vector<8x128xf32>
    %30 = vector.extract_strided_slice %17 {offsets = [0, 256], sizes = [8, 128], strides = [1, 1]} : vector<8x512xf32> to vector<8x128xf32>
    %31 = math.tanh %30 : vector<8x128xf32>
    %32 = vector.extract_strided_slice %17 {offsets = [0, 384], sizes = [8, 128], strides = [1, 1]} : vector<8x512xf32> to vector<8x128xf32>
    %33 = arith.negf %32 : vector<8x128xf32>
    %34 = math.exp %33 : vector<8x128xf32>
    %cst_15 = arith.constant 1.000000e+00 : f32
    %35 = vector.broadcast %cst_15 : f32 to vector<8x128xf32>
    %36 = arith.addf %35, %34 : vector<8x128xf32>
    %37 = arith.divf %35, %36 : vector<8x128xf32>
    %38 = arith.mulf %29, %10 : vector<8x128xf32>
    %39 = arith.mulf %23, %31 : vector<8x128xf32>
    %40 = arith.addf %38, %39 : vector<8x128xf32>
    %41 = math.tanh %40 : vector<8x128xf32>
    %42 = arith.mulf %37, %41 : vector<8x128xf32>
    %43 = arith.index_cast %12 : i32 to index
    %c0_16 = arith.constant 0 : index
    %44 = vector.load %arg13[%43, %c0_16] : memref<64x128xf32, #tpu.memory_space<vmem>>, vector<8x128xf32>
    tpu.vector_store %arg13[%43, %c0_16], %42 {strides = array<i32>} : memref<64x128xf32, #tpu.memory_space<vmem>>, vector<8x128xf32>,
    %c1_i32 = arith.constant 1 : i32
    %c8_i32_17 = arith.constant 8 : i32
    %45 = arith.muli %c1_i32, %c8_i32_17 : i32
    %46 = tpu.assume_multiple %45, 8 : i32
    %47 = arith.index_cast %46 : i32 to index
    %c0_18 = arith.constant 0 : index
    %48 = vector.load %arg14[%47, %c0_18] : memref<64x512xf32, #tpu.memory_space<vmem>>, vector<8x512xf32>
    %49 = arith.truncf %42 : vector<8x128xf32> to vector<8x128xbf16>
    %cst_19 = arith.constant dense<0.000000e+00> : vector<8x512xf32>
    %50 = tpu.matmul %49, %3, %cst_19 {dimension_numbers = #tpu.dot_dimension_numbers<[1], [0], [0], [1], [0, 0, 1, 1], [], []>} : vector<8x128xbf16>, vector<128x512xbf16>, vector<8x512xf32> -> vector<8x512xf32>
    %51 = arith.addf %48, %50 : vector<8x512xf32>
    %52 = vector.extract_strided_slice %51 {offsets = [0, 0], sizes = [8, 128], strides = [1, 1]} : vector<8x512xf32> to vector<8x128xf32>
    %53 = arith.negf %52 : vector<8x128xf32>
    %54 = math.exp %53 : vector<8x128xf32>
    %cst_20 = arith.constant 1.000000e+00 : f32
    %55 = vector.broadcast %cst_20 : f32 to vector<8x128xf32>
    %56 = arith.addf %55, %54 : vector<8x128xf32>
    %57 = arith.divf %55, %56 : vector<8x128xf32>
    %58 = vector.extract_strided_slice %51 {offsets = [0, 128], sizes = [8, 128], strides = [1, 1]} : vector<8x512xf32> to vector<8x128xf32>
    %59 = arith.negf %58 : vector<8x128xf32>
    %60 = math.exp %59 : vector<8x128xf32>
    %cst_21 = arith.constant 1.000000e+00 : f32
    %61 = vector.broadcast %cst_21 : f32 to vector<8x128xf32>
    %62 = arith.addf %61, %60 : vector<8x128xf32>
    %63 = arith.divf %61, %62 : vector<8x128xf32>
    %64 = vector.extract_strided_slice %51 {offsets = [0, 256], sizes = [8, 128], strides = [1, 1]} : vector<8x512xf32> to vector<8x128xf32>
    %65 = math.tanh %64 : vector<8x128xf32>
    %66 = vector.extract_strided_slice %51 {offsets = [0, 384], sizes = [8, 128], strides = [1, 1]} : vector<8x512xf32> to vector<8x128xf32>
    %67 = arith.negf %66 : vector<8x128xf32>
    %68 = math.exp %67 : vector<8x128xf32>
    %cst_22 = arith.constant 1.000000e+00 : f32
    %69 = vector.broadcast %cst_22 : f32 to vector<8x128xf32>
    %70 = arith.addf %69, %68 : vector<8x128xf32>
    %71 = arith.divf %69, %70 : vector<8x128xf32>
    %72 = arith.mulf %63, %40 : vector<8x128xf32>
    %73 = arith.mulf %57, %65 : vector<8x128xf32>
    %74 = arith.addf %72, %73 : vector<8x128xf32>
    %75 = math.tanh %74 : vector<8x128xf32>
    %76 = arith.mulf %71, %75 : vector<8x128xf32>
    %77 = arith.index_cast %46 : i32 to index
    %c0_23 = arith.constant 0 : index
    %78 = vector.load %arg13[%77, %c0_23] : memref<64x128xf32, #tpu.memory_space<vmem>>, vector<8x128xf32>
    tpu.vector_store %arg13[%77, %c0_23], %76 {strides = array<i32>} : memref<64x128xf32, #tpu.memory_space<vmem>>, vector<8x128xf32>,
    %c2_i32 = arith.constant 2 : i32
    %c8_i32_24 = arith.constant 8 : i32
    %79 = arith.muli %c2_i32, %c8_i32_24 : i32
    %80 = tpu.assume_multiple %79, 8 : i32
    %81 = arith.index_cast %80 : i32 to index
    %c0_25 = arith.constant 0 : index
    %82 = vector.load %arg14[%81, %c0_25] : memref<64x512xf32, #tpu.memory_space<vmem>>, vector<8x512xf32>
    %83 = arith.truncf %76 : vector<8x128xf32> to vector<8x128xbf16>
    %cst_26 = arith.constant dense<0.000000e+00> : vector<8x512xf32>
    %84 = tpu.matmul %83, %3, %cst_26 {dimension_numbers = #tpu.dot_dimension_numbers<[1], [0], [0], [1], [0, 0, 1, 1], [], []>} : vector<8x128xbf16>, vector<128x512xbf16>, vector<8x512xf32> -> vector<8x512xf32>
    %85 = arith.addf %82, %84 : vector<8x512xf32>
    %86 = vector.extract_strided_slice %85 {offsets = [0, 0], sizes = [8, 128], strides = [1, 1]} : vector<8x512xf32> to vector<8x128xf32>
    %87 = arith.negf %86 : vector<8x128xf32>
    %88 = math.exp %87 : vector<8x128xf32>
    %cst_27 = arith.constant 1.000000e+00 : f32
    %89 = vector.broadcast %cst_27 : f32 to vector<8x128xf32>
    %90 = arith.addf %89, %88 : vector<8x128xf32>
    %91 = arith.divf %89, %90 : vector<8x128xf32>
    %92 = vector.extract_strided_slice %85 {offsets = [0, 128], sizes = [8, 128], strides = [1, 1]} : vector<8x512xf32> to vector<8x128xf32>
    %93 = arith.negf %92 : vector<8x128xf32>
    %94 = math.exp %93 : vector<8x128xf32>
    %cst_28 = arith.constant 1.000000e+00 : f32
    %95 = vector.broadcast %cst_28 : f32 to vector<8x128xf32>
    %96 = arith.addf %95, %94 : vector<8x128xf32>
    %97 = arith.divf %95, %96 : vector<8x128xf32>
    %98 = vector.extract_strided_slice %85 {offsets = [0, 256], sizes = [8, 128], strides = [1, 1]} : vector<8x512xf32> to vector<8x128xf32>
    %99 = math.tanh %98 : vector<8x128xf32>
    %100 = vector.extract_strided_slice %85 {offsets = [0, 384], sizes = [8, 128], strides = [1, 1]} : vector<8x512xf32> to vector<8x128xf32>
    %101 = arith.negf %100 : vector<8x128xf32>
    %102 = math.exp %101 : vector<8x128xf32>
    %cst_29 = arith.constant 1.000000e+00 : f32
    %103 = vector.broadcast %cst_29 : f32 to vector<8x128xf32>
    %104 = arith.addf %103, %102 : vector<8x128xf32>
    %105 = arith.divf %103, %104 : vector<8x128xf32>
    %106 = arith.mulf %97, %74 : vector<8x128xf32>
    %107 = arith.mulf %91, %99 : vector<8x128xf32>
    %108 = arith.addf %106, %107 : vector<8x128xf32>
    %109 = math.tanh %108 : vector<8x128xf32>
    %110 = arith.mulf %105, %109 : vector<8x128xf32>
    %111 = arith.index_cast %80 : i32 to index
    %c0_30 = arith.constant 0 : index
    %112 = vector.load %arg13[%111, %c0_30] : memref<64x128xf32, #tpu.memory_space<vmem>>, vector<8x128xf32>
    tpu.vector_store %arg13[%111, %c0_30], %110 {strides = array<i32>} : memref<64x128xf32, #tpu.memory_space<vmem>>, vector<8x128xf32>,
    %c3_i32 = arith.constant 3 : i32
    %c8_i32_31 = arith.constant 8 : i32
    %113 = arith.muli %c3_i32, %c8_i32_31 : i32
    %114 = tpu.assume_multiple %113, 8 : i32
    %115 = arith.index_cast %114 : i32 to index
    %c0_32 = arith.constant 0 : index
    %116 = vector.load %arg14[%115, %c0_32] : memref<64x512xf32, #tpu.memory_space<vmem>>, vector<8x512xf32>
    %117 = arith.truncf %110 : vector<8x128xf32> to vector<8x128xbf16>
    %cst_33 = arith.constant dense<0.000000e+00> : vector<8x512xf32>
    %118 = tpu.matmul %117, %3, %cst_33 {dimension_numbers = #tpu.dot_dimension_numbers<[1], [0], [0], [1], [0, 0, 1, 1], [], []>} : vector<8x128xbf16>, vector<128x512xbf16>, vector<8x512xf32> -> vector<8x512xf32>
    %119 = arith.addf %116, %118 : vector<8x512xf32>
    %120 = vector.extract_strided_slice %119 {offsets = [0, 0], sizes = [8, 128], strides = [1, 1]} : vector<8x512xf32> to vector<8x128xf32>
    %121 = arith.negf %120 : vector<8x128xf32>
    %122 = math.exp %121 : vector<8x128xf32>
    %cst_34 = arith.constant 1.000000e+00 : f32
    %123 = vector.broadcast %cst_34 : f32 to vector<8x128xf32>
    %124 = arith.addf %123, %122 : vector<8x128xf32>
    %125 = arith.divf %123, %124 : vector<8x128xf32>
    %126 = vector.extract_strided_slice %119 {offsets = [0, 128], sizes = [8, 128], strides = [1, 1]} : vector<8x512xf32> to vector<8x128xf32>
    %127 = arith.negf %126 : vector<8x128xf32>
    %128 = math.exp %127 : vector<8x128xf32>
    %cst_35 = arith.constant 1.000000e+00 : f32
    %129 = vector.broadcast %cst_35 : f32 to vector<8x128xf32>
    %130 = arith.addf %129, %128 : vector<8x128xf32>
    %131 = arith.divf %129, %130 : vector<8x128xf32>
    %132 = vector.extract_strided_slice %119 {offsets = [0, 256], sizes = [8, 128], strides = [1, 1]} : vector<8x512xf32> to vector<8x128xf32>
    %133 = math.tanh %132 : vector<8x128xf32>
    %134 = vector.extract_strided_slice %119 {offsets = [0, 384], sizes = [8, 128], strides = [1, 1]} : vector<8x512xf32> to vector<8x128xf32>
    %135 = arith.negf %134 : vector<8x128xf32>
    %136 = math.exp %135 : vector<8x128xf32>
    %cst_36 = arith.constant 1.000000e+00 : f32
    %137 = vector.broadcast %cst_36 : f32 to vector<8x128xf32>
    %138 = arith.addf %137, %136 : vector<8x128xf32>
    %139 = arith.divf %137, %138 : vector<8x128xf32>
    %140 = arith.mulf %131, %108 : vector<8x128xf32>
    %141 = arith.mulf %125, %133 : vector<8x128xf32>
    %142 = arith.addf %140, %141 : vector<8x128xf32>
    %143 = math.tanh %142 : vector<8x128xf32>
    %144 = arith.mulf %139, %143 : vector<8x128xf32>
    %145 = arith.index_cast %114 : i32 to index
    %c0_37 = arith.constant 0 : index
    %146 = vector.load %arg13[%145, %c0_37] : memref<64x128xf32, #tpu.memory_space<vmem>>, vector<8x128xf32>
    tpu.vector_store %arg13[%145, %c0_37], %144 {strides = array<i32>} : memref<64x128xf32, #tpu.memory_space<vmem>>, vector<8x128xf32>,
    %c4_i32 = arith.constant 4 : i32
    %c8_i32_38 = arith.constant 8 : i32
    %147 = arith.muli %c4_i32, %c8_i32_38 : i32
    %148 = tpu.assume_multiple %147, 8 : i32
    %149 = arith.index_cast %148 : i32 to index
    %c0_39 = arith.constant 0 : index
    %150 = vector.load %arg14[%149, %c0_39] : memref<64x512xf32, #tpu.memory_space<vmem>>, vector<8x512xf32>
    %151 = arith.truncf %144 : vector<8x128xf32> to vector<8x128xbf16>
    %cst_40 = arith.constant dense<0.000000e+00> : vector<8x512xf32>
    %152 = tpu.matmul %151, %3, %cst_40 {dimension_numbers = #tpu.dot_dimension_numbers<[1], [0], [0], [1], [0, 0, 1, 1], [], []>} : vector<8x128xbf16>, vector<128x512xbf16>, vector<8x512xf32> -> vector<8x512xf32>
    %153 = arith.addf %150, %152 : vector<8x512xf32>
    %154 = vector.extract_strided_slice %153 {offsets = [0, 0], sizes = [8, 128], strides = [1, 1]} : vector<8x512xf32> to vector<8x128xf32>
    %155 = arith.negf %154 : vector<8x128xf32>
    %156 = math.exp %155 : vector<8x128xf32>
    %cst_41 = arith.constant 1.000000e+00 : f32
    %157 = vector.broadcast %cst_41 : f32 to vector<8x128xf32>
    %158 = arith.addf %157, %156 : vector<8x128xf32>
    %159 = arith.divf %157, %158 : vector<8x128xf32>
    %160 = vector.extract_strided_slice %153 {offsets = [0, 128], sizes = [8, 128], strides = [1, 1]} : vector<8x512xf32> to vector<8x128xf32>
    %161 = arith.negf %160 : vector<8x128xf32>
    %162 = math.exp %161 : vector<8x128xf32>
    %cst_42 = arith.constant 1.000000e+00 : f32
    %163 = vector.broadcast %cst_42 : f32 to vector<8x128xf32>
    %164 = arith.addf %163, %162 : vector<8x128xf32>
    %165 = arith.divf %163, %164 : vector<8x128xf32>
    %166 = vector.extract_strided_slice %153 {offsets = [0, 256], sizes = [8, 128], strides = [1, 1]} : vector<8x512xf32> to vector<8x128xf32>
    %167 = math.tanh %166 : vector<8x128xf32>
    %168 = vector.extract_strided_slice %153 {offsets = [0, 384], sizes = [8, 128], strides = [1, 1]} : vector<8x512xf32> to vector<8x128xf32>
    %169 = arith.negf %168 : vector<8x128xf32>
    %170 = math.exp %169 : vector<8x128xf32>
    %cst_43 = arith.constant 1.000000e+00 : f32
    %171 = vector.broadcast %cst_43 : f32 to vector<8x128xf32>
    %172 = arith.addf %171, %170 : vector<8x128xf32>
    %173 = arith.divf %171, %172 : vector<8x128xf32>
    %174 = arith.mulf %165, %142 : vector<8x128xf32>
    %175 = arith.mulf %159, %167 : vector<8x128xf32>
    %176 = arith.addf %174, %175 : vector<8x128xf32>
    %177 = math.tanh %176 : vector<8x128xf32>
    %178 = arith.mulf %173, %177 : vector<8x128xf32>
    %179 = arith.index_cast %148 : i32 to index
    %c0_44 = arith.constant 0 : index
    %180 = vector.load %arg13[%179, %c0_44] : memref<64x128xf32, #tpu.memory_space<vmem>>, vector<8x128xf32>
    tpu.vector_store %arg13[%179, %c0_44], %178 {strides = array<i32>} : memref<64x128xf32, #tpu.memory_space<vmem>>, vector<8x128xf32>,
    %c5_i32 = arith.constant 5 : i32
    %c8_i32_45 = arith.constant 8 : i32
    %181 = arith.muli %c5_i32, %c8_i32_45 : i32
    %182 = tpu.assume_multiple %181, 8 : i32
    %183 = arith.index_cast %182 : i32 to index
    %c0_46 = arith.constant 0 : index
    %184 = vector.load %arg14[%183, %c0_46] : memref<64x512xf32, #tpu.memory_space<vmem>>, vector<8x512xf32>
    %185 = arith.truncf %178 : vector<8x128xf32> to vector<8x128xbf16>
    %cst_47 = arith.constant dense<0.000000e+00> : vector<8x512xf32>
    %186 = tpu.matmul %185, %3, %cst_47 {dimension_numbers = #tpu.dot_dimension_numbers<[1], [0], [0], [1], [0, 0, 1, 1], [], []>} : vector<8x128xbf16>, vector<128x512xbf16>, vector<8x512xf32> -> vector<8x512xf32>
    %187 = arith.addf %184, %186 : vector<8x512xf32>
    %188 = vector.extract_strided_slice %187 {offsets = [0, 0], sizes = [8, 128], strides = [1, 1]} : vector<8x512xf32> to vector<8x128xf32>
    %189 = arith.negf %188 : vector<8x128xf32>
    %190 = math.exp %189 : vector<8x128xf32>
    %cst_48 = arith.constant 1.000000e+00 : f32
    %191 = vector.broadcast %cst_48 : f32 to vector<8x128xf32>
    %192 = arith.addf %191, %190 : vector<8x128xf32>
    %193 = arith.divf %191, %192 : vector<8x128xf32>
    %194 = vector.extract_strided_slice %187 {offsets = [0, 128], sizes = [8, 128], strides = [1, 1]} : vector<8x512xf32> to vector<8x128xf32>
    %195 = arith.negf %194 : vector<8x128xf32>
    %196 = math.exp %195 : vector<8x128xf32>
    %cst_49 = arith.constant 1.000000e+00 : f32
    %197 = vector.broadcast %cst_49 : f32 to vector<8x128xf32>
    %198 = arith.addf %197, %196 : vector<8x128xf32>
    %199 = arith.divf %197, %198 : vector<8x128xf32>
    %200 = vector.extract_strided_slice %187 {offsets = [0, 256], sizes = [8, 128], strides = [1, 1]} : vector<8x512xf32> to vector<8x128xf32>
    %201 = math.tanh %200 : vector<8x128xf32>
    %202 = vector.extract_strided_slice %187 {offsets = [0, 384], sizes = [8, 128], strides = [1, 1]} : vector<8x512xf32> to vector<8x128xf32>
    %203 = arith.negf %202 : vector<8x128xf32>
    %204 = math.exp %203 : vector<8x128xf32>
    %cst_50 = arith.constant 1.000000e+00 : f32
    %205 = vector.broadcast %cst_50 : f32 to vector<8x128xf32>
    %206 = arith.addf %205, %204 : vector<8x128xf32>
    %207 = arith.divf %205, %206 : vector<8x128xf32>
    %208 = arith.mulf %199, %176 : vector<8x128xf32>
    %209 = arith.mulf %193, %201 : vector<8x128xf32>
    %210 = arith.addf %208, %209 : vector<8x128xf32>
    %211 = math.tanh %210 : vector<8x128xf32>
    %212 = arith.mulf %207, %211 : vector<8x128xf32>
    %213 = arith.index_cast %182 : i32 to index
    %c0_51 = arith.constant 0 : index
    %214 = vector.load %arg13[%213, %c0_51] : memref<64x128xf32, #tpu.memory_space<vmem>>, vector<8x128xf32>
    tpu.vector_store %arg13[%213, %c0_51], %212 {strides = array<i32>} : memref<64x128xf32, #tpu.memory_space<vmem>>, vector<8x128xf32>,
    %c6_i32 = arith.constant 6 : i32
    %c8_i32_52 = arith.constant 8 : i32
    %215 = arith.muli %c6_i32, %c8_i32_52 : i32
    %216 = tpu.assume_multiple %215, 8 : i32
    %217 = arith.index_cast %216 : i32 to index
    %c0_53 = arith.constant 0 : index
    %218 = vector.load %arg14[%217, %c0_53] : memref<64x512xf32, #tpu.memory_space<vmem>>, vector<8x512xf32>
    %219 = arith.truncf %212 : vector<8x128xf32> to vector<8x128xbf16>
    %cst_54 = arith.constant dense<0.000000e+00> : vector<8x512xf32>
    %220 = tpu.matmul %219, %3, %cst_54 {dimension_numbers = #tpu.dot_dimension_numbers<[1], [0], [0], [1], [0, 0, 1, 1], [], []>} : vector<8x128xbf16>, vector<128x512xbf16>, vector<8x512xf32> -> vector<8x512xf32>
    %221 = arith.addf %218, %220 : vector<8x512xf32>
    %222 = vector.extract_strided_slice %221 {offsets = [0, 0], sizes = [8, 128], strides = [1, 1]} : vector<8x512xf32> to vector<8x128xf32>
    %223 = arith.negf %222 : vector<8x128xf32>
    %224 = math.exp %223 : vector<8x128xf32>
    %cst_55 = arith.constant 1.000000e+00 : f32
    %225 = vector.broadcast %cst_55 : f32 to vector<8x128xf32>
    %226 = arith.addf %225, %224 : vector<8x128xf32>
    %227 = arith.divf %225, %226 : vector<8x128xf32>
    %228 = vector.extract_strided_slice %221 {offsets = [0, 128], sizes = [8, 128], strides = [1, 1]} : vector<8x512xf32> to vector<8x128xf32>
    %229 = arith.negf %228 : vector<8x128xf32>
    %230 = math.exp %229 : vector<8x128xf32>
    %cst_56 = arith.constant 1.000000e+00 : f32
    %231 = vector.broadcast %cst_56 : f32 to vector<8x128xf32>
    %232 = arith.addf %231, %230 : vector<8x128xf32>
    %233 = arith.divf %231, %232 : vector<8x128xf32>
    %234 = vector.extract_strided_slice %221 {offsets = [0, 256], sizes = [8, 128], strides = [1, 1]} : vector<8x512xf32> to vector<8x128xf32>
    %235 = math.tanh %234 : vector<8x128xf32>
    %236 = vector.extract_strided_slice %221 {offsets = [0, 384], sizes = [8, 128], strides = [1, 1]} : vector<8x512xf32> to vector<8x128xf32>
    %237 = arith.negf %236 : vector<8x128xf32>
    %238 = math.exp %237 : vector<8x128xf32>
    %cst_57 = arith.constant 1.000000e+00 : f32
    %239 = vector.broadcast %cst_57 : f32 to vector<8x128xf32>
    %240 = arith.addf %239, %238 : vector<8x128xf32>
    %241 = arith.divf %239, %240 : vector<8x128xf32>
    %242 = arith.mulf %233, %210 : vector<8x128xf32>
    %243 = arith.mulf %227, %235 : vector<8x128xf32>
    %244 = arith.addf %242, %243 : vector<8x128xf32>
    %245 = math.tanh %244 : vector<8x128xf32>
    %246 = arith.mulf %241, %245 : vector<8x128xf32>
    %247 = arith.index_cast %216 : i32 to index
    %c0_58 = arith.constant 0 : index
    %248 = vector.load %arg13[%247, %c0_58] : memref<64x128xf32, #tpu.memory_space<vmem>>, vector<8x128xf32>
    tpu.vector_store %arg13[%247, %c0_58], %246 {strides = array<i32>} : memref<64x128xf32, #tpu.memory_space<vmem>>, vector<8x128xf32>,
    %c7_i32 = arith.constant 7 : i32
    %c8_i32_59 = arith.constant 8 : i32
    %249 = arith.muli %c7_i32, %c8_i32_59 : i32
    %250 = tpu.assume_multiple %249, 8 : i32
    %251 = arith.index_cast %250 : i32 to index
    %c0_60 = arith.constant 0 : index
    %252 = vector.load %arg14[%251, %c0_60] : memref<64x512xf32, #tpu.memory_space<vmem>>, vector<8x512xf32>
    %253 = arith.truncf %246 : vector<8x128xf32> to vector<8x128xbf16>
    %cst_61 = arith.constant dense<0.000000e+00> : vector<8x512xf32>
    %254 = tpu.matmul %253, %3, %cst_61 {dimension_numbers = #tpu.dot_dimension_numbers<[1], [0], [0], [1], [0, 0, 1, 1], [], []>} : vector<8x128xbf16>, vector<128x512xbf16>, vector<8x512xf32> -> vector<8x512xf32>
    %255 = arith.addf %252, %254 : vector<8x512xf32>
    %256 = vector.extract_strided_slice %255 {offsets = [0, 0], sizes = [8, 128], strides = [1, 1]} : vector<8x512xf32> to vector<8x128xf32>
    %257 = arith.negf %256 : vector<8x128xf32>
    %258 = math.exp %257 : vector<8x128xf32>
    %cst_62 = arith.constant 1.000000e+00 : f32
    %259 = vector.broadcast %cst_62 : f32 to vector<8x128xf32>
    %260 = arith.addf %259, %258 : vector<8x128xf32>
    %261 = arith.divf %259, %260 : vector<8x128xf32>
    %262 = vector.extract_strided_slice %255 {offsets = [0, 128], sizes = [8, 128], strides = [1, 1]} : vector<8x512xf32> to vector<8x128xf32>
    %263 = arith.negf %262 : vector<8x128xf32>
    %264 = math.exp %263 : vector<8x128xf32>
    %cst_63 = arith.constant 1.000000e+00 : f32
    %265 = vector.broadcast %cst_63 : f32 to vector<8x128xf32>
    %266 = arith.addf %265, %264 : vector<8x128xf32>
    %267 = arith.divf %265, %266 : vector<8x128xf32>
    %268 = vector.extract_strided_slice %255 {offsets = [0, 256], sizes = [8, 128], strides = [1, 1]} : vector<8x512xf32> to vector<8x128xf32>
    %269 = math.tanh %268 : vector<8x128xf32>
    %270 = vector.extract_strided_slice %255 {offsets = [0, 384], sizes = [8, 128], strides = [1, 1]} : vector<8x512xf32> to vector<8x128xf32>
    %271 = arith.negf %270 : vector<8x128xf32>
    %272 = math.exp %271 : vector<8x128xf32>
    %cst_64 = arith.constant 1.000000e+00 : f32
    %273 = vector.broadcast %cst_64 : f32 to vector<8x128xf32>
    %274 = arith.addf %273, %272 : vector<8x128xf32>
    %275 = arith.divf %273, %274 : vector<8x128xf32>
    %276 = arith.mulf %267, %244 : vector<8x128xf32>
    %277 = arith.mulf %261, %269 : vector<8x128xf32>
    %278 = arith.addf %276, %277 : vector<8x128xf32>
    %279 = math.tanh %278 : vector<8x128xf32>
    %280 = arith.mulf %275, %279 : vector<8x128xf32>
    %281 = arith.index_cast %250 : i32 to index
    %c0_65 = arith.constant 0 : index
    %282 = vector.load %arg13[%281, %c0_65] : memref<64x128xf32, #tpu.memory_space<vmem>>, vector<8x128xf32>
    tpu.vector_store %arg13[%281, %c0_65], %280 {strides = array<i32>} : memref<64x128xf32, #tpu.memory_space<vmem>>, vector<8x128xf32>,
    %c8_i32_66 = arith.constant 8 : i32
    %c0_67 = arith.constant 0 : index
    %c0_68 = arith.constant 0 : index
    %283 = vector.load %arg13[%c0_67, %c0_68] : memref<64x128xf32, #tpu.memory_space<vmem>>, vector<64x128xf32>
    %284 = arith.truncf %283 : vector<64x128xf32> to vector<64x128xbf16>
    %c0_69 = arith.constant 0 : index
    %c0_70 = arith.constant 0 : index
    %285 = vector.load %arg4[%c0_69, %c0_70] : memref<128x512xbf16, #tpu.memory_space<vmem>>, vector<128x512xbf16>
    %c0_71 = arith.constant 0 : index
    %c0_72 = arith.constant 0 : index
    %286 = vector.load %arg5[%c0_71, %c0_72] : memref<128x512xbf16, #tpu.memory_space<vmem>>, vector<128x512xbf16>
    %c0_73 = arith.constant 0 : index
    %c0_74 = arith.constant 0 : index
    %287 = vector.load %arg6[%c0_73, %c0_74] : memref<1x512xf32, #tpu.memory_space<vmem>>, vector<1x512xf32>
    %cst_75 = arith.constant dense<0.000000e+00> : vector<64x512xf32>
    %288 = tpu.matmul %284, %285, %cst_75 {dimension_numbers = #tpu.dot_dimension_numbers<[1], [0], [0], [1], [0, 0, 1, 1], [], []>} : vector<64x128xbf16>, vector<128x512xbf16>, vector<64x512xf32> -> vector<64x512xf32>
    %289 = vector.broadcast %287 : vector<1x512xf32> to vector<64x512xf32>
    %290 = arith.addf %288, %289 : vector<64x512xf32>
    %c0_76 = arith.constant 0 : index
    %c0_77 = arith.constant 0 : index
    %291 = vector.load %arg14[%c0_76, %c0_77] : memref<64x512xf32, #tpu.memory_space<vmem>>, vector<64x512xf32>
    tpu.vector_store %arg14[%c0_76, %c0_77], %290 {strides = array<i32>} : memref<64x512xf32, #tpu.memory_space<vmem>>, vector<64x512xf32>,
    %cst_78 = arith.constant 0.000000e+00 : f32
    %292 = vector.broadcast %cst_78 : f32 to vector<8x128xf32>
    %cst_79 = arith.constant 0.000000e+00 : f32
    %293 = vector.broadcast %cst_79 : f32 to vector<8x128xf32>
    %c0_i32_80 = arith.constant 0 : i32
    %c8_i32_81 = arith.constant 8 : i32
    %294 = arith.muli %c0_i32_80, %c8_i32_81 : i32
    %295 = tpu.assume_multiple %294, 8 : i32
    %296 = arith.index_cast %295 : i32 to index
    %c0_82 = arith.constant 0 : index
    %297 = vector.load %arg14[%296, %c0_82] : memref<64x512xf32, #tpu.memory_space<vmem>>, vector<8x512xf32>
    %298 = arith.truncf %292 : vector<8x128xf32> to vector<8x128xbf16>
    %cst_83 = arith.constant dense<0.000000e+00> : vector<8x512xf32>
    %299 = tpu.matmul %298, %286, %cst_83 {dimension_numbers = #tpu.dot_dimension_numbers<[1], [0], [0], [1], [0, 0, 1, 1], [], []>} : vector<8x128xbf16>, vector<128x512xbf16>, vector<8x512xf32> -> vector<8x512xf32>
    %300 = arith.addf %297, %299 : vector<8x512xf32>
    %301 = vector.extract_strided_slice %300 {offsets = [0, 0], sizes = [8, 128], strides = [1, 1]} : vector<8x512xf32> to vector<8x128xf32>
    %302 = arith.negf %301 : vector<8x128xf32>
    %303 = math.exp %302 : vector<8x128xf32>
    %cst_84 = arith.constant 1.000000e+00 : f32
    %304 = vector.broadcast %cst_84 : f32 to vector<8x128xf32>
    %305 = arith.addf %304, %303 : vector<8x128xf32>
    %306 = arith.divf %304, %305 : vector<8x128xf32>
    %307 = vector.extract_strided_slice %300 {offsets = [0, 128], sizes = [8, 128], strides = [1, 1]} : vector<8x512xf32> to vector<8x128xf32>
    %308 = arith.negf %307 : vector<8x128xf32>
    %309 = math.exp %308 : vector<8x128xf32>
    %cst_85 = arith.constant 1.000000e+00 : f32
    %310 = vector.broadcast %cst_85 : f32 to vector<8x128xf32>
    %311 = arith.addf %310, %309 : vector<8x128xf32>
    %312 = arith.divf %310, %311 : vector<8x128xf32>
    %313 = vector.extract_strided_slice %300 {offsets = [0, 256], sizes = [8, 128], strides = [1, 1]} : vector<8x512xf32> to vector<8x128xf32>
    %314 = math.tanh %313 : vector<8x128xf32>
    %315 = vector.extract_strided_slice %300 {offsets = [0, 384], sizes = [8, 128], strides = [1, 1]} : vector<8x512xf32> to vector<8x128xf32>
    %316 = arith.negf %315 : vector<8x128xf32>
    %317 = math.exp %316 : vector<8x128xf32>
    %cst_86 = arith.constant 1.000000e+00 : f32
    %318 = vector.broadcast %cst_86 : f32 to vector<8x128xf32>
    %319 = arith.addf %318, %317 : vector<8x128xf32>
    %320 = arith.divf %318, %319 : vector<8x128xf32>
    %321 = arith.mulf %312, %293 : vector<8x128xf32>
    %322 = arith.mulf %306, %314 : vector<8x128xf32>
    %323 = arith.addf %321, %322 : vector<8x128xf32>
    %324 = math.tanh %323 : vector<8x128xf32>
    %325 = arith.mulf %320, %324 : vector<8x128xf32>
    %326 = arith.index_cast %295 : i32 to index
    %c0_87 = arith.constant 0 : index
    %327 = vector.load %arg13[%326, %c0_87] : memref<64x128xf32, #tpu.memory_space<vmem>>, vector<8x128xf32>
    tpu.vector_store %arg13[%326, %c0_87], %325 {strides = array<i32>} : memref<64x128xf32, #tpu.memory_space<vmem>>, vector<8x128xf32>,
    %c1_i32_88 = arith.constant 1 : i32
    %c8_i32_89 = arith.constant 8 : i32
    %328 = arith.muli %c1_i32_88, %c8_i32_89 : i32
    %329 = tpu.assume_multiple %328, 8 : i32
    %330 = arith.index_cast %329 : i32 to index
    %c0_90 = arith.constant 0 : index
    %331 = vector.load %arg14[%330, %c0_90] : memref<64x512xf32, #tpu.memory_space<vmem>>, vector<8x512xf32>
    %332 = arith.truncf %325 : vector<8x128xf32> to vector<8x128xbf16>
    %cst_91 = arith.constant dense<0.000000e+00> : vector<8x512xf32>
    %333 = tpu.matmul %332, %286, %cst_91 {dimension_numbers = #tpu.dot_dimension_numbers<[1], [0], [0], [1], [0, 0, 1, 1], [], []>} : vector<8x128xbf16>, vector<128x512xbf16>, vector<8x512xf32> -> vector<8x512xf32>
    %334 = arith.addf %331, %333 : vector<8x512xf32>
    %335 = vector.extract_strided_slice %334 {offsets = [0, 0], sizes = [8, 128], strides = [1, 1]} : vector<8x512xf32> to vector<8x128xf32>
    %336 = arith.negf %335 : vector<8x128xf32>
    %337 = math.exp %336 : vector<8x128xf32>
    %cst_92 = arith.constant 1.000000e+00 : f32
    %338 = vector.broadcast %cst_92 : f32 to vector<8x128xf32>
    %339 = arith.addf %338, %337 : vector<8x128xf32>
    %340 = arith.divf %338, %339 : vector<8x128xf32>
    %341 = vector.extract_strided_slice %334 {offsets = [0, 128], sizes = [8, 128], strides = [1, 1]} : vector<8x512xf32> to vector<8x128xf32>
    %342 = arith.negf %341 : vector<8x128xf32>
    %343 = math.exp %342 : vector<8x128xf32>
    %cst_93 = arith.constant 1.000000e+00 : f32
    %344 = vector.broadcast %cst_93 : f32 to vector<8x128xf32>
    %345 = arith.addf %344, %343 : vector<8x128xf32>
    %346 = arith.divf %344, %345 : vector<8x128xf32>
    %347 = vector.extract_strided_slice %334 {offsets = [0, 256], sizes = [8, 128], strides = [1, 1]} : vector<8x512xf32> to vector<8x128xf32>
    %348 = math.tanh %347 : vector<8x128xf32>
    %349 = vector.extract_strided_slice %334 {offsets = [0, 384], sizes = [8, 128], strides = [1, 1]} : vector<8x512xf32> to vector<8x128xf32>
    %350 = arith.negf %349 : vector<8x128xf32>
    %351 = math.exp %350 : vector<8x128xf32>
    %cst_94 = arith.constant 1.000000e+00 : f32
    %352 = vector.broadcast %cst_94 : f32 to vector<8x128xf32>
    %353 = arith.addf %352, %351 : vector<8x128xf32>
    %354 = arith.divf %352, %353 : vector<8x128xf32>
    %355 = arith.mulf %346, %323 : vector<8x128xf32>
    %356 = arith.mulf %340, %348 : vector<8x128xf32>
    %357 = arith.addf %355, %356 : vector<8x128xf32>
    %358 = math.tanh %357 : vector<8x128xf32>
    %359 = arith.mulf %354, %358 : vector<8x128xf32>
    %360 = arith.index_cast %329 : i32 to index
    %c0_95 = arith.constant 0 : index
    %361 = vector.load %arg13[%360, %c0_95] : memref<64x128xf32, #tpu.memory_space<vmem>>, vector<8x128xf32>
    tpu.vector_store %arg13[%360, %c0_95], %359 {strides = array<i32>} : memref<64x128xf32, #tpu.memory_space<vmem>>, vector<8x128xf32>,
    %c2_i32_96 = arith.constant 2 : i32
    %c8_i32_97 = arith.constant 8 : i32
    %362 = arith.muli %c2_i32_96, %c8_i32_97 : i32
    %363 = tpu.assume_multiple %362, 8 : i32
    %364 = arith.index_cast %363 : i32 to index
    %c0_98 = arith.constant 0 : index
    %365 = vector.load %arg14[%364, %c0_98] : memref<64x512xf32, #tpu.memory_space<vmem>>, vector<8x512xf32>
    %366 = arith.truncf %359 : vector<8x128xf32> to vector<8x128xbf16>
    %cst_99 = arith.constant dense<0.000000e+00> : vector<8x512xf32>
    %367 = tpu.matmul %366, %286, %cst_99 {dimension_numbers = #tpu.dot_dimension_numbers<[1], [0], [0], [1], [0, 0, 1, 1], [], []>} : vector<8x128xbf16>, vector<128x512xbf16>, vector<8x512xf32> -> vector<8x512xf32>
    %368 = arith.addf %365, %367 : vector<8x512xf32>
    %369 = vector.extract_strided_slice %368 {offsets = [0, 0], sizes = [8, 128], strides = [1, 1]} : vector<8x512xf32> to vector<8x128xf32>
    %370 = arith.negf %369 : vector<8x128xf32>
    %371 = math.exp %370 : vector<8x128xf32>
    %cst_100 = arith.constant 1.000000e+00 : f32
    %372 = vector.broadcast %cst_100 : f32 to vector<8x128xf32>
    %373 = arith.addf %372, %371 : vector<8x128xf32>
    %374 = arith.divf %372, %373 : vector<8x128xf32>
    %375 = vector.extract_strided_slice %368 {offsets = [0, 128], sizes = [8, 128], strides = [1, 1]} : vector<8x512xf32> to vector<8x128xf32>
    %376 = arith.negf %375 : vector<8x128xf32>
    %377 = math.exp %376 : vector<8x128xf32>
    %cst_101 = arith.constant 1.000000e+00 : f32
    %378 = vector.broadcast %cst_101 : f32 to vector<8x128xf32>
    %379 = arith.addf %378, %377 : vector<8x128xf32>
    %380 = arith.divf %378, %379 : vector<8x128xf32>
    %381 = vector.extract_strided_slice %368 {offsets = [0, 256], sizes = [8, 128], strides = [1, 1]} : vector<8x512xf32> to vector<8x128xf32>
    %382 = math.tanh %381 : vector<8x128xf32>
    %383 = vector.extract_strided_slice %368 {offsets = [0, 384], sizes = [8, 128], strides = [1, 1]} : vector<8x512xf32> to vector<8x128xf32>
    %384 = arith.negf %383 : vector<8x128xf32>
    %385 = math.exp %384 : vector<8x128xf32>
    %cst_102 = arith.constant 1.000000e+00 : f32
    %386 = vector.broadcast %cst_102 : f32 to vector<8x128xf32>
    %387 = arith.addf %386, %385 : vector<8x128xf32>
    %388 = arith.divf %386, %387 : vector<8x128xf32>
    %389 = arith.mulf %380, %357 : vector<8x128xf32>
    %390 = arith.mulf %374, %382 : vector<8x128xf32>
    %391 = arith.addf %389, %390 : vector<8x128xf32>
    %392 = math.tanh %391 : vector<8x128xf32>
    %393 = arith.mulf %388, %392 : vector<8x128xf32>
    %394 = arith.index_cast %363 : i32 to index
    %c0_103 = arith.constant 0 : index
    %395 = vector.load %arg13[%394, %c0_103] : memref<64x128xf32, #tpu.memory_space<vmem>>, vector<8x128xf32>
    tpu.vector_store %arg13[%394, %c0_103], %393 {strides = array<i32>} : memref<64x128xf32, #tpu.memory_space<vmem>>, vector<8x128xf32>,
    %c3_i32_104 = arith.constant 3 : i32
    %c8_i32_105 = arith.constant 8 : i32
    %396 = arith.muli %c3_i32_104, %c8_i32_105 : i32
    %397 = tpu.assume_multiple %396, 8 : i32
    %398 = arith.index_cast %397 : i32 to index
    %c0_106 = arith.constant 0 : index
    %399 = vector.load %arg14[%398, %c0_106] : memref<64x512xf32, #tpu.memory_space<vmem>>, vector<8x512xf32>
    %400 = arith.truncf %393 : vector<8x128xf32> to vector<8x128xbf16>
    %cst_107 = arith.constant dense<0.000000e+00> : vector<8x512xf32>
    %401 = tpu.matmul %400, %286, %cst_107 {dimension_numbers = #tpu.dot_dimension_numbers<[1], [0], [0], [1], [0, 0, 1, 1], [], []>} : vector<8x128xbf16>, vector<128x512xbf16>, vector<8x512xf32> -> vector<8x512xf32>
    %402 = arith.addf %399, %401 : vector<8x512xf32>
    %403 = vector.extract_strided_slice %402 {offsets = [0, 0], sizes = [8, 128], strides = [1, 1]} : vector<8x512xf32> to vector<8x128xf32>
    %404 = arith.negf %403 : vector<8x128xf32>
    %405 = math.exp %404 : vector<8x128xf32>
    %cst_108 = arith.constant 1.000000e+00 : f32
    %406 = vector.broadcast %cst_108 : f32 to vector<8x128xf32>
    %407 = arith.addf %406, %405 : vector<8x128xf32>
    %408 = arith.divf %406, %407 : vector<8x128xf32>
    %409 = vector.extract_strided_slice %402 {offsets = [0, 128], sizes = [8, 128], strides = [1, 1]} : vector<8x512xf32> to vector<8x128xf32>
    %410 = arith.negf %409 : vector<8x128xf32>
    %411 = math.exp %410 : vector<8x128xf32>
    %cst_109 = arith.constant 1.000000e+00 : f32
    %412 = vector.broadcast %cst_109 : f32 to vector<8x128xf32>
    %413 = arith.addf %412, %411 : vector<8x128xf32>
    %414 = arith.divf %412, %413 : vector<8x128xf32>
    %415 = vector.extract_strided_slice %402 {offsets = [0, 256], sizes = [8, 128], strides = [1, 1]} : vector<8x512xf32> to vector<8x128xf32>
    %416 = math.tanh %415 : vector<8x128xf32>
    %417 = vector.extract_strided_slice %402 {offsets = [0, 384], sizes = [8, 128], strides = [1, 1]} : vector<8x512xf32> to vector<8x128xf32>
    %418 = arith.negf %417 : vector<8x128xf32>
    %419 = math.exp %418 : vector<8x128xf32>
    %cst_110 = arith.constant 1.000000e+00 : f32
    %420 = vector.broadcast %cst_110 : f32 to vector<8x128xf32>
    %421 = arith.addf %420, %419 : vector<8x128xf32>
    %422 = arith.divf %420, %421 : vector<8x128xf32>
    %423 = arith.mulf %414, %391 : vector<8x128xf32>
    %424 = arith.mulf %408, %416 : vector<8x128xf32>
    %425 = arith.addf %423, %424 : vector<8x128xf32>
    %426 = math.tanh %425 : vector<8x128xf32>
    %427 = arith.mulf %422, %426 : vector<8x128xf32>
    %428 = arith.index_cast %397 : i32 to index
    %c0_111 = arith.constant 0 : index
    %429 = vector.load %arg13[%428, %c0_111] : memref<64x128xf32, #tpu.memory_space<vmem>>, vector<8x128xf32>
    tpu.vector_store %arg13[%428, %c0_111], %427 {strides = array<i32>} : memref<64x128xf32, #tpu.memory_space<vmem>>, vector<8x128xf32>,
    %c4_i32_112 = arith.constant 4 : i32
    %c8_i32_113 = arith.constant 8 : i32
    %430 = arith.muli %c4_i32_112, %c8_i32_113 : i32
    %431 = tpu.assume_multiple %430, 8 : i32
    %432 = arith.index_cast %431 : i32 to index
    %c0_114 = arith.constant 0 : index
    %433 = vector.load %arg14[%432, %c0_114] : memref<64x512xf32, #tpu.memory_space<vmem>>, vector<8x512xf32>
    %434 = arith.truncf %427 : vector<8x128xf32> to vector<8x128xbf16>
    %cst_115 = arith.constant dense<0.000000e+00> : vector<8x512xf32>
    %435 = tpu.matmul %434, %286, %cst_115 {dimension_numbers = #tpu.dot_dimension_numbers<[1], [0], [0], [1], [0, 0, 1, 1], [], []>} : vector<8x128xbf16>, vector<128x512xbf16>, vector<8x512xf32> -> vector<8x512xf32>
    %436 = arith.addf %433, %435 : vector<8x512xf32>
    %437 = vector.extract_strided_slice %436 {offsets = [0, 0], sizes = [8, 128], strides = [1, 1]} : vector<8x512xf32> to vector<8x128xf32>
    %438 = arith.negf %437 : vector<8x128xf32>
    %439 = math.exp %438 : vector<8x128xf32>
    %cst_116 = arith.constant 1.000000e+00 : f32
    %440 = vector.broadcast %cst_116 : f32 to vector<8x128xf32>
    %441 = arith.addf %440, %439 : vector<8x128xf32>
    %442 = arith.divf %440, %441 : vector<8x128xf32>
    %443 = vector.extract_strided_slice %436 {offsets = [0, 128], sizes = [8, 128], strides = [1, 1]} : vector<8x512xf32> to vector<8x128xf32>
    %444 = arith.negf %443 : vector<8x128xf32>
    %445 = math.exp %444 : vector<8x128xf32>
    %cst_117 = arith.constant 1.000000e+00 : f32
    %446 = vector.broadcast %cst_117 : f32 to vector<8x128xf32>
    %447 = arith.addf %446, %445 : vector<8x128xf32>
    %448 = arith.divf %446, %447 : vector<8x128xf32>
    %449 = vector.extract_strided_slice %436 {offsets = [0, 256], sizes = [8, 128], strides = [1, 1]} : vector<8x512xf32> to vector<8x128xf32>
    %450 = math.tanh %449 : vector<8x128xf32>
    %451 = vector.extract_strided_slice %436 {offsets = [0, 384], sizes = [8, 128], strides = [1, 1]} : vector<8x512xf32> to vector<8x128xf32>
    %452 = arith.negf %451 : vector<8x128xf32>
    %453 = math.exp %452 : vector<8x128xf32>
    %cst_118 = arith.constant 1.000000e+00 : f32
    %454 = vector.broadcast %cst_118 : f32 to vector<8x128xf32>
    %455 = arith.addf %454, %453 : vector<8x128xf32>
    %456 = arith.divf %454, %455 : vector<8x128xf32>
    %457 = arith.mulf %448, %425 : vector<8x128xf32>
    %458 = arith.mulf %442, %450 : vector<8x128xf32>
    %459 = arith.addf %457, %458 : vector<8x128xf32>
    %460 = math.tanh %459 : vector<8x128xf32>
    %461 = arith.mulf %456, %460 : vector<8x128xf32>
    %462 = arith.index_cast %431 : i32 to index
    %c0_119 = arith.constant 0 : index
    %463 = vector.load %arg13[%462, %c0_119] : memref<64x128xf32, #tpu.memory_space<vmem>>, vector<8x128xf32>
    tpu.vector_store %arg13[%462, %c0_119], %461 {strides = array<i32>} : memref<64x128xf32, #tpu.memory_space<vmem>>, vector<8x128xf32>,
    %c5_i32_120 = arith.constant 5 : i32
    %c8_i32_121 = arith.constant 8 : i32
    %464 = arith.muli %c5_i32_120, %c8_i32_121 : i32
    %465 = tpu.assume_multiple %464, 8 : i32
    %466 = arith.index_cast %465 : i32 to index
    %c0_122 = arith.constant 0 : index
    %467 = vector.load %arg14[%466, %c0_122] : memref<64x512xf32, #tpu.memory_space<vmem>>, vector<8x512xf32>
    %468 = arith.truncf %461 : vector<8x128xf32> to vector<8x128xbf16>
    %cst_123 = arith.constant dense<0.000000e+00> : vector<8x512xf32>
    %469 = tpu.matmul %468, %286, %cst_123 {dimension_numbers = #tpu.dot_dimension_numbers<[1], [0], [0], [1], [0, 0, 1, 1], [], []>} : vector<8x128xbf16>, vector<128x512xbf16>, vector<8x512xf32> -> vector<8x512xf32>
    %470 = arith.addf %467, %469 : vector<8x512xf32>
    %471 = vector.extract_strided_slice %470 {offsets = [0, 0], sizes = [8, 128], strides = [1, 1]} : vector<8x512xf32> to vector<8x128xf32>
    %472 = arith.negf %471 : vector<8x128xf32>
    %473 = math.exp %472 : vector<8x128xf32>
    %cst_124 = arith.constant 1.000000e+00 : f32
    %474 = vector.broadcast %cst_124 : f32 to vector<8x128xf32>
    %475 = arith.addf %474, %473 : vector<8x128xf32>
    %476 = arith.divf %474, %475 : vector<8x128xf32>
    %477 = vector.extract_strided_slice %470 {offsets = [0, 128], sizes = [8, 128], strides = [1, 1]} : vector<8x512xf32> to vector<8x128xf32>
    %478 = arith.negf %477 : vector<8x128xf32>
    %479 = math.exp %478 : vector<8x128xf32>
    %cst_125 = arith.constant 1.000000e+00 : f32
    %480 = vector.broadcast %cst_125 : f32 to vector<8x128xf32>
    %481 = arith.addf %480, %479 : vector<8x128xf32>
    %482 = arith.divf %480, %481 : vector<8x128xf32>
    %483 = vector.extract_strided_slice %470 {offsets = [0, 256], sizes = [8, 128], strides = [1, 1]} : vector<8x512xf32> to vector<8x128xf32>
    %484 = math.tanh %483 : vector<8x128xf32>
    %485 = vector.extract_strided_slice %470 {offsets = [0, 384], sizes = [8, 128], strides = [1, 1]} : vector<8x512xf32> to vector<8x128xf32>
    %486 = arith.negf %485 : vector<8x128xf32>
    %487 = math.exp %486 : vector<8x128xf32>
    %cst_126 = arith.constant 1.000000e+00 : f32
    %488 = vector.broadcast %cst_126 : f32 to vector<8x128xf32>
    %489 = arith.addf %488, %487 : vector<8x128xf32>
    %490 = arith.divf %488, %489 : vector<8x128xf32>
    %491 = arith.mulf %482, %459 : vector<8x128xf32>
    %492 = arith.mulf %476, %484 : vector<8x128xf32>
    %493 = arith.addf %491, %492 : vector<8x128xf32>
    %494 = math.tanh %493 : vector<8x128xf32>
    %495 = arith.mulf %490, %494 : vector<8x128xf32>
    %496 = arith.index_cast %465 : i32 to index
    %c0_127 = arith.constant 0 : index
    %497 = vector.load %arg13[%496, %c0_127] : memref<64x128xf32, #tpu.memory_space<vmem>>, vector<8x128xf32>
    tpu.vector_store %arg13[%496, %c0_127], %495 {strides = array<i32>} : memref<64x128xf32, #tpu.memory_space<vmem>>, vector<8x128xf32>,
    %c6_i32_128 = arith.constant 6 : i32
    %c8_i32_129 = arith.constant 8 : i32
    %498 = arith.muli %c6_i32_128, %c8_i32_129 : i32
    %499 = tpu.assume_multiple %498, 8 : i32
    %500 = arith.index_cast %499 : i32 to index
    %c0_130 = arith.constant 0 : index
    %501 = vector.load %arg14[%500, %c0_130] : memref<64x512xf32, #tpu.memory_space<vmem>>, vector<8x512xf32>
    %502 = arith.truncf %495 : vector<8x128xf32> to vector<8x128xbf16>
    %cst_131 = arith.constant dense<0.000000e+00> : vector<8x512xf32>
    %503 = tpu.matmul %502, %286, %cst_131 {dimension_numbers = #tpu.dot_dimension_numbers<[1], [0], [0], [1], [0, 0, 1, 1], [], []>} : vector<8x128xbf16>, vector<128x512xbf16>, vector<8x512xf32> -> vector<8x512xf32>
    %504 = arith.addf %501, %503 : vector<8x512xf32>
    %505 = vector.extract_strided_slice %504 {offsets = [0, 0], sizes = [8, 128], strides = [1, 1]} : vector<8x512xf32> to vector<8x128xf32>
    %506 = arith.negf %505 : vector<8x128xf32>
    %507 = math.exp %506 : vector<8x128xf32>
    %cst_132 = arith.constant 1.000000e+00 : f32
    %508 = vector.broadcast %cst_132 : f32 to vector<8x128xf32>
    %509 = arith.addf %508, %507 : vector<8x128xf32>
    %510 = arith.divf %508, %509 : vector<8x128xf32>
    %511 = vector.extract_strided_slice %504 {offsets = [0, 128], sizes = [8, 128], strides = [1, 1]} : vector<8x512xf32> to vector<8x128xf32>
    %512 = arith.negf %511 : vector<8x128xf32>
    %513 = math.exp %512 : vector<8x128xf32>
    %cst_133 = arith.constant 1.000000e+00 : f32
    %514 = vector.broadcast %cst_133 : f32 to vector<8x128xf32>
    %515 = arith.addf %514, %513 : vector<8x128xf32>
    %516 = arith.divf %514, %515 : vector<8x128xf32>
    %517 = vector.extract_strided_slice %504 {offsets = [0, 256], sizes = [8, 128], strides = [1, 1]} : vector<8x512xf32> to vector<8x128xf32>
    %518 = math.tanh %517 : vector<8x128xf32>
    %519 = vector.extract_strided_slice %504 {offsets = [0, 384], sizes = [8, 128], strides = [1, 1]} : vector<8x512xf32> to vector<8x128xf32>
    %520 = arith.negf %519 : vector<8x128xf32>
    %521 = math.exp %520 : vector<8x128xf32>
    %cst_134 = arith.constant 1.000000e+00 : f32
    %522 = vector.broadcast %cst_134 : f32 to vector<8x128xf32>
    %523 = arith.addf %522, %521 : vector<8x128xf32>
    %524 = arith.divf %522, %523 : vector<8x128xf32>
    %525 = arith.mulf %516, %493 : vector<8x128xf32>
    %526 = arith.mulf %510, %518 : vector<8x128xf32>
    %527 = arith.addf %525, %526 : vector<8x128xf32>
    %528 = math.tanh %527 : vector<8x128xf32>
    %529 = arith.mulf %524, %528 : vector<8x128xf32>
    %530 = arith.index_cast %499 : i32 to index
    %c0_135 = arith.constant 0 : index
    %531 = vector.load %arg13[%530, %c0_135] : memref<64x128xf32, #tpu.memory_space<vmem>>, vector<8x128xf32>
    tpu.vector_store %arg13[%530, %c0_135], %529 {strides = array<i32>} : memref<64x128xf32, #tpu.memory_space<vmem>>, vector<8x128xf32>,
    %c7_i32_136 = arith.constant 7 : i32
    %c8_i32_137 = arith.constant 8 : i32
    %532 = arith.muli %c7_i32_136, %c8_i32_137 : i32
    %533 = tpu.assume_multiple %532, 8 : i32
    %534 = arith.index_cast %533 : i32 to index
    %c0_138 = arith.constant 0 : index
    %535 = vector.load %arg14[%534, %c0_138] : memref<64x512xf32, #tpu.memory_space<vmem>>, vector<8x512xf32>
    %536 = arith.truncf %529 : vector<8x128xf32> to vector<8x128xbf16>
    %cst_139 = arith.constant dense<0.000000e+00> : vector<8x512xf32>
    %537 = tpu.matmul %536, %286, %cst_139 {dimension_numbers = #tpu.dot_dimension_numbers<[1], [0], [0], [1], [0, 0, 1, 1], [], []>} : vector<8x128xbf16>, vector<128x512xbf16>, vector<8x512xf32> -> vector<8x512xf32>
    %538 = arith.addf %535, %537 : vector<8x512xf32>
    %539 = vector.extract_strided_slice %538 {offsets = [0, 0], sizes = [8, 128], strides = [1, 1]} : vector<8x512xf32> to vector<8x128xf32>
    %540 = arith.negf %539 : vector<8x128xf32>
    %541 = math.exp %540 : vector<8x128xf32>
    %cst_140 = arith.constant 1.000000e+00 : f32
    %542 = vector.broadcast %cst_140 : f32 to vector<8x128xf32>
    %543 = arith.addf %542, %541 : vector<8x128xf32>
    %544 = arith.divf %542, %543 : vector<8x128xf32>
    %545 = vector.extract_strided_slice %538 {offsets = [0, 128], sizes = [8, 128], strides = [1, 1]} : vector<8x512xf32> to vector<8x128xf32>
    %546 = arith.negf %545 : vector<8x128xf32>
    %547 = math.exp %546 : vector<8x128xf32>
    %cst_141 = arith.constant 1.000000e+00 : f32
    %548 = vector.broadcast %cst_141 : f32 to vector<8x128xf32>
    %549 = arith.addf %548, %547 : vector<8x128xf32>
    %550 = arith.divf %548, %549 : vector<8x128xf32>
    %551 = vector.extract_strided_slice %538 {offsets = [0, 256], sizes = [8, 128], strides = [1, 1]} : vector<8x512xf32> to vector<8x128xf32>
    %552 = math.tanh %551 : vector<8x128xf32>
    %553 = vector.extract_strided_slice %538 {offsets = [0, 384], sizes = [8, 128], strides = [1, 1]} : vector<8x512xf32> to vector<8x128xf32>
    %554 = arith.negf %553 : vector<8x128xf32>
    %555 = math.exp %554 : vector<8x128xf32>
    %cst_142 = arith.constant 1.000000e+00 : f32
    %556 = vector.broadcast %cst_142 : f32 to vector<8x128xf32>
    %557 = arith.addf %556, %555 : vector<8x128xf32>
    %558 = arith.divf %556, %557 : vector<8x128xf32>
    %559 = arith.mulf %550, %527 : vector<8x128xf32>
    %560 = arith.mulf %544, %552 : vector<8x128xf32>
    %561 = arith.addf %559, %560 : vector<8x128xf32>
    %562 = math.tanh %561 : vector<8x128xf32>
    %563 = arith.mulf %558, %562 : vector<8x128xf32>
    %564 = arith.index_cast %533 : i32 to index
    %c0_143 = arith.constant 0 : index
    %565 = vector.load %arg13[%564, %c0_143] : memref<64x128xf32, #tpu.memory_space<vmem>>, vector<8x128xf32>
    tpu.vector_store %arg13[%564, %c0_143], %563 {strides = array<i32>} : memref<64x128xf32, #tpu.memory_space<vmem>>, vector<8x128xf32>,
    %c8_i32_144 = arith.constant 8 : i32
    %c0_145 = arith.constant 0 : index
    %c0_146 = arith.constant 0 : index
    %566 = vector.load %arg13[%c0_145, %c0_146] : memref<64x128xf32, #tpu.memory_space<vmem>>, vector<64x128xf32>
    %567 = arith.truncf %566 : vector<64x128xf32> to vector<64x128xbf16>
    %c0_147 = arith.constant 0 : index
    %c0_148 = arith.constant 0 : index
    %568 = vector.load %arg7[%c0_147, %c0_148] : memref<128x512xbf16, #tpu.memory_space<vmem>>, vector<128x512xbf16>
    %c0_149 = arith.constant 0 : index
    %c0_150 = arith.constant 0 : index
    %569 = vector.load %arg8[%c0_149, %c0_150] : memref<128x512xbf16, #tpu.memory_space<vmem>>, vector<128x512xbf16>
    %c0_151 = arith.constant 0 : index
    %c0_152 = arith.constant 0 : index
    %570 = vector.load %arg9[%c0_151, %c0_152] : memref<1x512xf32, #tpu.memory_space<vmem>>, vector<1x512xf32>
    %cst_153 = arith.constant dense<0.000000e+00> : vector<64x512xf32>
    %571 = tpu.matmul %567, %568, %cst_153 {dimension_numbers = #tpu.dot_dimension_numbers<[1], [0], [0], [1], [0, 0, 1, 1], [], []>} : vector<64x128xbf16>, vector<128x512xbf16>, vector<64x512xf32> -> vector<64x512xf32>
    %572 = vector.broadcast %570 : vector<1x512xf32> to vector<64x512xf32>
    %573 = arith.addf %571, %572 : vector<64x512xf32>
    %c0_154 = arith.constant 0 : index
    %c0_155 = arith.constant 0 : index
    %574 = vector.load %arg14[%c0_154, %c0_155] : memref<64x512xf32, #tpu.memory_space<vmem>>, vector<64x512xf32>
    tpu.vector_store %arg14[%c0_154, %c0_155], %573 {strides = array<i32>} : memref<64x512xf32, #tpu.memory_space<vmem>>, vector<64x512xf32>,
    %cst_156 = arith.constant 0.000000e+00 : f32
    %575 = vector.broadcast %cst_156 : f32 to vector<8x128xf32>
    %cst_157 = arith.constant 0.000000e+00 : f32
    %576 = vector.broadcast %cst_157 : f32 to vector<8x128xf32>
    %c0_i32_158 = arith.constant 0 : i32
    %c8_i32_159 = arith.constant 8 : i32
    %577 = arith.muli %c0_i32_158, %c8_i32_159 : i32
    %578 = tpu.assume_multiple %577, 8 : i32
    %579 = arith.index_cast %578 : i32 to index
    %c0_160 = arith.constant 0 : index
    %580 = vector.load %arg14[%579, %c0_160] : memref<64x512xf32, #tpu.memory_space<vmem>>, vector<8x512xf32>
    %581 = arith.truncf %575 : vector<8x128xf32> to vector<8x128xbf16>
    %cst_161 = arith.constant dense<0.000000e+00> : vector<8x512xf32>
    %582 = tpu.matmul %581, %569, %cst_161 {dimension_numbers = #tpu.dot_dimension_numbers<[1], [0], [0], [1], [0, 0, 1, 1], [], []>} : vector<8x128xbf16>, vector<128x512xbf16>, vector<8x512xf32> -> vector<8x512xf32>
    %583 = arith.addf %580, %582 : vector<8x512xf32>
    %584 = vector.extract_strided_slice %583 {offsets = [0, 0], sizes = [8, 128], strides = [1, 1]} : vector<8x512xf32> to vector<8x128xf32>
    %585 = arith.negf %584 : vector<8x128xf32>
    %586 = math.exp %585 : vector<8x128xf32>
    %cst_162 = arith.constant 1.000000e+00 : f32
    %587 = vector.broadcast %cst_162 : f32 to vector<8x128xf32>
    %588 = arith.addf %587, %586 : vector<8x128xf32>
    %589 = arith.divf %587, %588 : vector<8x128xf32>
    %590 = vector.extract_strided_slice %583 {offsets = [0, 128], sizes = [8, 128], strides = [1, 1]} : vector<8x512xf32> to vector<8x128xf32>
    %591 = arith.negf %590 : vector<8x128xf32>
    %592 = math.exp %591 : vector<8x128xf32>
    %cst_163 = arith.constant 1.000000e+00 : f32
    %593 = vector.broadcast %cst_163 : f32 to vector<8x128xf32>
    %594 = arith.addf %593, %592 : vector<8x128xf32>
    %595 = arith.divf %593, %594 : vector<8x128xf32>
    %596 = vector.extract_strided_slice %583 {offsets = [0, 256], sizes = [8, 128], strides = [1, 1]} : vector<8x512xf32> to vector<8x128xf32>
    %597 = math.tanh %596 : vector<8x128xf32>
    %598 = vector.extract_strided_slice %583 {offsets = [0, 384], sizes = [8, 128], strides = [1, 1]} : vector<8x512xf32> to vector<8x128xf32>
    %599 = arith.negf %598 : vector<8x128xf32>
    %600 = math.exp %599 : vector<8x128xf32>
    %cst_164 = arith.constant 1.000000e+00 : f32
    %601 = vector.broadcast %cst_164 : f32 to vector<8x128xf32>
    %602 = arith.addf %601, %600 : vector<8x128xf32>
    %603 = arith.divf %601, %602 : vector<8x128xf32>
    %604 = arith.mulf %595, %576 : vector<8x128xf32>
    %605 = arith.mulf %589, %597 : vector<8x128xf32>
    %606 = arith.addf %604, %605 : vector<8x128xf32>
    %607 = math.tanh %606 : vector<8x128xf32>
    %608 = arith.mulf %603, %607 : vector<8x128xf32>
    %c1_i32_165 = arith.constant 1 : i32
    %c8_i32_166 = arith.constant 8 : i32
    %609 = arith.muli %c1_i32_165, %c8_i32_166 : i32
    %610 = tpu.assume_multiple %609, 8 : i32
    %611 = arith.index_cast %610 : i32 to index
    %c0_167 = arith.constant 0 : index
    %612 = vector.load %arg14[%611, %c0_167] : memref<64x512xf32, #tpu.memory_space<vmem>>, vector<8x512xf32>
    %613 = arith.truncf %608 : vector<8x128xf32> to vector<8x128xbf16>
    %cst_168 = arith.constant dense<0.000000e+00> : vector<8x512xf32>
    %614 = tpu.matmul %613, %569, %cst_168 {dimension_numbers = #tpu.dot_dimension_numbers<[1], [0], [0], [1], [0, 0, 1, 1], [], []>} : vector<8x128xbf16>, vector<128x512xbf16>, vector<8x512xf32> -> vector<8x512xf32>
    %615 = arith.addf %612, %614 : vector<8x512xf32>
    %616 = vector.extract_strided_slice %615 {offsets = [0, 0], sizes = [8, 128], strides = [1, 1]} : vector<8x512xf32> to vector<8x128xf32>
    %617 = arith.negf %616 : vector<8x128xf32>
    %618 = math.exp %617 : vector<8x128xf32>
    %cst_169 = arith.constant 1.000000e+00 : f32
    %619 = vector.broadcast %cst_169 : f32 to vector<8x128xf32>
    %620 = arith.addf %619, %618 : vector<8x128xf32>
    %621 = arith.divf %619, %620 : vector<8x128xf32>
    %622 = vector.extract_strided_slice %615 {offsets = [0, 128], sizes = [8, 128], strides = [1, 1]} : vector<8x512xf32> to vector<8x128xf32>
    %623 = arith.negf %622 : vector<8x128xf32>
    %624 = math.exp %623 : vector<8x128xf32>
    %cst_170 = arith.constant 1.000000e+00 : f32
    %625 = vector.broadcast %cst_170 : f32 to vector<8x128xf32>
    %626 = arith.addf %625, %624 : vector<8x128xf32>
    %627 = arith.divf %625, %626 : vector<8x128xf32>
    %628 = vector.extract_strided_slice %615 {offsets = [0, 256], sizes = [8, 128], strides = [1, 1]} : vector<8x512xf32> to vector<8x128xf32>
    %629 = math.tanh %628 : vector<8x128xf32>
    %630 = vector.extract_strided_slice %615 {offsets = [0, 384], sizes = [8, 128], strides = [1, 1]} : vector<8x512xf32> to vector<8x128xf32>
    %631 = arith.negf %630 : vector<8x128xf32>
    %632 = math.exp %631 : vector<8x128xf32>
    %cst_171 = arith.constant 1.000000e+00 : f32
    %633 = vector.broadcast %cst_171 : f32 to vector<8x128xf32>
    %634 = arith.addf %633, %632 : vector<8x128xf32>
    %635 = arith.divf %633, %634 : vector<8x128xf32>
    %636 = arith.mulf %627, %606 : vector<8x128xf32>
    %637 = arith.mulf %621, %629 : vector<8x128xf32>
    %638 = arith.addf %636, %637 : vector<8x128xf32>
    %639 = math.tanh %638 : vector<8x128xf32>
    %640 = arith.mulf %635, %639 : vector<8x128xf32>
    %c2_i32_172 = arith.constant 2 : i32
    %c8_i32_173 = arith.constant 8 : i32
    %641 = arith.muli %c2_i32_172, %c8_i32_173 : i32
    %642 = tpu.assume_multiple %641, 8 : i32
    %643 = arith.index_cast %642 : i32 to index
    %c0_174 = arith.constant 0 : index
    %644 = vector.load %arg14[%643, %c0_174] : memref<64x512xf32, #tpu.memory_space<vmem>>, vector<8x512xf32>
    %645 = arith.truncf %640 : vector<8x128xf32> to vector<8x128xbf16>
    %cst_175 = arith.constant dense<0.000000e+00> : vector<8x512xf32>
    %646 = tpu.matmul %645, %569, %cst_175 {dimension_numbers = #tpu.dot_dimension_numbers<[1], [0], [0], [1], [0, 0, 1, 1], [], []>} : vector<8x128xbf16>, vector<128x512xbf16>, vector<8x512xf32> -> vector<8x512xf32>
    %647 = arith.addf %644, %646 : vector<8x512xf32>
    %648 = vector.extract_strided_slice %647 {offsets = [0, 0], sizes = [8, 128], strides = [1, 1]} : vector<8x512xf32> to vector<8x128xf32>
    %649 = arith.negf %648 : vector<8x128xf32>
    %650 = math.exp %649 : vector<8x128xf32>
    %cst_176 = arith.constant 1.000000e+00 : f32
    %651 = vector.broadcast %cst_176 : f32 to vector<8x128xf32>
    %652 = arith.addf %651, %650 : vector<8x128xf32>
    %653 = arith.divf %651, %652 : vector<8x128xf32>
    %654 = vector.extract_strided_slice %647 {offsets = [0, 128], sizes = [8, 128], strides = [1, 1]} : vector<8x512xf32> to vector<8x128xf32>
    %655 = arith.negf %654 : vector<8x128xf32>
    %656 = math.exp %655 : vector<8x128xf32>
    %cst_177 = arith.constant 1.000000e+00 : f32
    %657 = vector.broadcast %cst_177 : f32 to vector<8x128xf32>
    %658 = arith.addf %657, %656 : vector<8x128xf32>
    %659 = arith.divf %657, %658 : vector<8x128xf32>
    %660 = vector.extract_strided_slice %647 {offsets = [0, 256], sizes = [8, 128], strides = [1, 1]} : vector<8x512xf32> to vector<8x128xf32>
    %661 = math.tanh %660 : vector<8x128xf32>
    %662 = vector.extract_strided_slice %647 {offsets = [0, 384], sizes = [8, 128], strides = [1, 1]} : vector<8x512xf32> to vector<8x128xf32>
    %663 = arith.negf %662 : vector<8x128xf32>
    %664 = math.exp %663 : vector<8x128xf32>
    %cst_178 = arith.constant 1.000000e+00 : f32
    %665 = vector.broadcast %cst_178 : f32 to vector<8x128xf32>
    %666 = arith.addf %665, %664 : vector<8x128xf32>
    %667 = arith.divf %665, %666 : vector<8x128xf32>
    %668 = arith.mulf %659, %638 : vector<8x128xf32>
    %669 = arith.mulf %653, %661 : vector<8x128xf32>
    %670 = arith.addf %668, %669 : vector<8x128xf32>
    %671 = math.tanh %670 : vector<8x128xf32>
    %672 = arith.mulf %667, %671 : vector<8x128xf32>
    %c3_i32_179 = arith.constant 3 : i32
    %c8_i32_180 = arith.constant 8 : i32
    %673 = arith.muli %c3_i32_179, %c8_i32_180 : i32
    %674 = tpu.assume_multiple %673, 8 : i32
    %675 = arith.index_cast %674 : i32 to index
    %c0_181 = arith.constant 0 : index
    %676 = vector.load %arg14[%675, %c0_181] : memref<64x512xf32, #tpu.memory_space<vmem>>, vector<8x512xf32>
    %677 = arith.truncf %672 : vector<8x128xf32> to vector<8x128xbf16>
    %cst_182 = arith.constant dense<0.000000e+00> : vector<8x512xf32>
    %678 = tpu.matmul %677, %569, %cst_182 {dimension_numbers = #tpu.dot_dimension_numbers<[1], [0], [0], [1], [0, 0, 1, 1], [], []>} : vector<8x128xbf16>, vector<128x512xbf16>, vector<8x512xf32> -> vector<8x512xf32>
    %679 = arith.addf %676, %678 : vector<8x512xf32>
    %680 = vector.extract_strided_slice %679 {offsets = [0, 0], sizes = [8, 128], strides = [1, 1]} : vector<8x512xf32> to vector<8x128xf32>
    %681 = arith.negf %680 : vector<8x128xf32>
    %682 = math.exp %681 : vector<8x128xf32>
    %cst_183 = arith.constant 1.000000e+00 : f32
    %683 = vector.broadcast %cst_183 : f32 to vector<8x128xf32>
    %684 = arith.addf %683, %682 : vector<8x128xf32>
    %685 = arith.divf %683, %684 : vector<8x128xf32>
    %686 = vector.extract_strided_slice %679 {offsets = [0, 128], sizes = [8, 128], strides = [1, 1]} : vector<8x512xf32> to vector<8x128xf32>
    %687 = arith.negf %686 : vector<8x128xf32>
    %688 = math.exp %687 : vector<8x128xf32>
    %cst_184 = arith.constant 1.000000e+00 : f32
    %689 = vector.broadcast %cst_184 : f32 to vector<8x128xf32>
    %690 = arith.addf %689, %688 : vector<8x128xf32>
    %691 = arith.divf %689, %690 : vector<8x128xf32>
    %692 = vector.extract_strided_slice %679 {offsets = [0, 256], sizes = [8, 128], strides = [1, 1]} : vector<8x512xf32> to vector<8x128xf32>
    %693 = math.tanh %692 : vector<8x128xf32>
    %694 = vector.extract_strided_slice %679 {offsets = [0, 384], sizes = [8, 128], strides = [1, 1]} : vector<8x512xf32> to vector<8x128xf32>
    %695 = arith.negf %694 : vector<8x128xf32>
    %696 = math.exp %695 : vector<8x128xf32>
    %cst_185 = arith.constant 1.000000e+00 : f32
    %697 = vector.broadcast %cst_185 : f32 to vector<8x128xf32>
    %698 = arith.addf %697, %696 : vector<8x128xf32>
    %699 = arith.divf %697, %698 : vector<8x128xf32>
    %700 = arith.mulf %691, %670 : vector<8x128xf32>
    %701 = arith.mulf %685, %693 : vector<8x128xf32>
    %702 = arith.addf %700, %701 : vector<8x128xf32>
    %703 = math.tanh %702 : vector<8x128xf32>
    %704 = arith.mulf %699, %703 : vector<8x128xf32>
    %c4_i32_186 = arith.constant 4 : i32
    %c8_i32_187 = arith.constant 8 : i32
    %705 = arith.muli %c4_i32_186, %c8_i32_187 : i32
    %706 = tpu.assume_multiple %705, 8 : i32
    %707 = arith.index_cast %706 : i32 to index
    %c0_188 = arith.constant 0 : index
    %708 = vector.load %arg14[%707, %c0_188] : memref<64x512xf32, #tpu.memory_space<vmem>>, vector<8x512xf32>
    %709 = arith.truncf %704 : vector<8x128xf32> to vector<8x128xbf16>
    %cst_189 = arith.constant dense<0.000000e+00> : vector<8x512xf32>
    %710 = tpu.matmul %709, %569, %cst_189 {dimension_numbers = #tpu.dot_dimension_numbers<[1], [0], [0], [1], [0, 0, 1, 1], [], []>} : vector<8x128xbf16>, vector<128x512xbf16>, vector<8x512xf32> -> vector<8x512xf32>
    %711 = arith.addf %708, %710 : vector<8x512xf32>
    %712 = vector.extract_strided_slice %711 {offsets = [0, 0], sizes = [8, 128], strides = [1, 1]} : vector<8x512xf32> to vector<8x128xf32>
    %713 = arith.negf %712 : vector<8x128xf32>
    %714 = math.exp %713 : vector<8x128xf32>
    %cst_190 = arith.constant 1.000000e+00 : f32
    %715 = vector.broadcast %cst_190 : f32 to vector<8x128xf32>
    %716 = arith.addf %715, %714 : vector<8x128xf32>
    %717 = arith.divf %715, %716 : vector<8x128xf32>
    %718 = vector.extract_strided_slice %711 {offsets = [0, 128], sizes = [8, 128], strides = [1, 1]} : vector<8x512xf32> to vector<8x128xf32>
    %719 = arith.negf %718 : vector<8x128xf32>
    %720 = math.exp %719 : vector<8x128xf32>
    %cst_191 = arith.constant 1.000000e+00 : f32
    %721 = vector.broadcast %cst_191 : f32 to vector<8x128xf32>
    %722 = arith.addf %721, %720 : vector<8x128xf32>
    %723 = arith.divf %721, %722 : vector<8x128xf32>
    %724 = vector.extract_strided_slice %711 {offsets = [0, 256], sizes = [8, 128], strides = [1, 1]} : vector<8x512xf32> to vector<8x128xf32>
    %725 = math.tanh %724 : vector<8x128xf32>
    %726 = vector.extract_strided_slice %711 {offsets = [0, 384], sizes = [8, 128], strides = [1, 1]} : vector<8x512xf32> to vector<8x128xf32>
    %727 = arith.negf %726 : vector<8x128xf32>
    %728 = math.exp %727 : vector<8x128xf32>
    %cst_192 = arith.constant 1.000000e+00 : f32
    %729 = vector.broadcast %cst_192 : f32 to vector<8x128xf32>
    %730 = arith.addf %729, %728 : vector<8x128xf32>
    %731 = arith.divf %729, %730 : vector<8x128xf32>
    %732 = arith.mulf %723, %702 : vector<8x128xf32>
    %733 = arith.mulf %717, %725 : vector<8x128xf32>
    %734 = arith.addf %732, %733 : vector<8x128xf32>
    %735 = math.tanh %734 : vector<8x128xf32>
    %736 = arith.mulf %731, %735 : vector<8x128xf32>
    %c5_i32_193 = arith.constant 5 : i32
    %c8_i32_194 = arith.constant 8 : i32
    %737 = arith.muli %c5_i32_193, %c8_i32_194 : i32
    %738 = tpu.assume_multiple %737, 8 : i32
    %739 = arith.index_cast %738 : i32 to index
    %c0_195 = arith.constant 0 : index
    %740 = vector.load %arg14[%739, %c0_195] : memref<64x512xf32, #tpu.memory_space<vmem>>, vector<8x512xf32>
    %741 = arith.truncf %736 : vector<8x128xf32> to vector<8x128xbf16>
    %cst_196 = arith.constant dense<0.000000e+00> : vector<8x512xf32>
    %742 = tpu.matmul %741, %569, %cst_196 {dimension_numbers = #tpu.dot_dimension_numbers<[1], [0], [0], [1], [0, 0, 1, 1], [], []>} : vector<8x128xbf16>, vector<128x512xbf16>, vector<8x512xf32> -> vector<8x512xf32>
    %743 = arith.addf %740, %742 : vector<8x512xf32>
    %744 = vector.extract_strided_slice %743 {offsets = [0, 0], sizes = [8, 128], strides = [1, 1]} : vector<8x512xf32> to vector<8x128xf32>
    %745 = arith.negf %744 : vector<8x128xf32>
    %746 = math.exp %745 : vector<8x128xf32>
    %cst_197 = arith.constant 1.000000e+00 : f32
    %747 = vector.broadcast %cst_197 : f32 to vector<8x128xf32>
    %748 = arith.addf %747, %746 : vector<8x128xf32>
    %749 = arith.divf %747, %748 : vector<8x128xf32>
    %750 = vector.extract_strided_slice %743 {offsets = [0, 128], sizes = [8, 128], strides = [1, 1]} : vector<8x512xf32> to vector<8x128xf32>
    %751 = arith.negf %750 : vector<8x128xf32>
    %752 = math.exp %751 : vector<8x128xf32>
    %cst_198 = arith.constant 1.000000e+00 : f32
    %753 = vector.broadcast %cst_198 : f32 to vector<8x128xf32>
    %754 = arith.addf %753, %752 : vector<8x128xf32>
    %755 = arith.divf %753, %754 : vector<8x128xf32>
    %756 = vector.extract_strided_slice %743 {offsets = [0, 256], sizes = [8, 128], strides = [1, 1]} : vector<8x512xf32> to vector<8x128xf32>
    %757 = math.tanh %756 : vector<8x128xf32>
    %758 = vector.extract_strided_slice %743 {offsets = [0, 384], sizes = [8, 128], strides = [1, 1]} : vector<8x512xf32> to vector<8x128xf32>
    %759 = arith.negf %758 : vector<8x128xf32>
    %760 = math.exp %759 : vector<8x128xf32>
    %cst_199 = arith.constant 1.000000e+00 : f32
    %761 = vector.broadcast %cst_199 : f32 to vector<8x128xf32>
    %762 = arith.addf %761, %760 : vector<8x128xf32>
    %763 = arith.divf %761, %762 : vector<8x128xf32>
    %764 = arith.mulf %755, %734 : vector<8x128xf32>
    %765 = arith.mulf %749, %757 : vector<8x128xf32>
    %766 = arith.addf %764, %765 : vector<8x128xf32>
    %767 = math.tanh %766 : vector<8x128xf32>
    %768 = arith.mulf %763, %767 : vector<8x128xf32>
    %c6_i32_200 = arith.constant 6 : i32
    %c8_i32_201 = arith.constant 8 : i32
    %769 = arith.muli %c6_i32_200, %c8_i32_201 : i32
    %770 = tpu.assume_multiple %769, 8 : i32
    %771 = arith.index_cast %770 : i32 to index
    %c0_202 = arith.constant 0 : index
    %772 = vector.load %arg14[%771, %c0_202] : memref<64x512xf32, #tpu.memory_space<vmem>>, vector<8x512xf32>
    %773 = arith.truncf %768 : vector<8x128xf32> to vector<8x128xbf16>
    %cst_203 = arith.constant dense<0.000000e+00> : vector<8x512xf32>
    %774 = tpu.matmul %773, %569, %cst_203 {dimension_numbers = #tpu.dot_dimension_numbers<[1], [0], [0], [1], [0, 0, 1, 1], [], []>} : vector<8x128xbf16>, vector<128x512xbf16>, vector<8x512xf32> -> vector<8x512xf32>
    %775 = arith.addf %772, %774 : vector<8x512xf32>
    %776 = vector.extract_strided_slice %775 {offsets = [0, 0], sizes = [8, 128], strides = [1, 1]} : vector<8x512xf32> to vector<8x128xf32>
    %777 = arith.negf %776 : vector<8x128xf32>
    %778 = math.exp %777 : vector<8x128xf32>
    %cst_204 = arith.constant 1.000000e+00 : f32
    %779 = vector.broadcast %cst_204 : f32 to vector<8x128xf32>
    %780 = arith.addf %779, %778 : vector<8x128xf32>
    %781 = arith.divf %779, %780 : vector<8x128xf32>
    %782 = vector.extract_strided_slice %775 {offsets = [0, 128], sizes = [8, 128], strides = [1, 1]} : vector<8x512xf32> to vector<8x128xf32>
    %783 = arith.negf %782 : vector<8x128xf32>
    %784 = math.exp %783 : vector<8x128xf32>
    %cst_205 = arith.constant 1.000000e+00 : f32
    %785 = vector.broadcast %cst_205 : f32 to vector<8x128xf32>
    %786 = arith.addf %785, %784 : vector<8x128xf32>
    %787 = arith.divf %785, %786 : vector<8x128xf32>
    %788 = vector.extract_strided_slice %775 {offsets = [0, 256], sizes = [8, 128], strides = [1, 1]} : vector<8x512xf32> to vector<8x128xf32>
    %789 = math.tanh %788 : vector<8x128xf32>
    %790 = vector.extract_strided_slice %775 {offsets = [0, 384], sizes = [8, 128], strides = [1, 1]} : vector<8x512xf32> to vector<8x128xf32>
    %791 = arith.negf %790 : vector<8x128xf32>
    %792 = math.exp %791 : vector<8x128xf32>
    %cst_206 = arith.constant 1.000000e+00 : f32
    %793 = vector.broadcast %cst_206 : f32 to vector<8x128xf32>
    %794 = arith.addf %793, %792 : vector<8x128xf32>
    %795 = arith.divf %793, %794 : vector<8x128xf32>
    %796 = arith.mulf %787, %766 : vector<8x128xf32>
    %797 = arith.mulf %781, %789 : vector<8x128xf32>
    %798 = arith.addf %796, %797 : vector<8x128xf32>
    %799 = math.tanh %798 : vector<8x128xf32>
    %800 = arith.mulf %795, %799 : vector<8x128xf32>
    %c7_i32_207 = arith.constant 7 : i32
    %c8_i32_208 = arith.constant 8 : i32
    %801 = arith.muli %c7_i32_207, %c8_i32_208 : i32
    %802 = tpu.assume_multiple %801, 8 : i32
    %803 = arith.index_cast %802 : i32 to index
    %c0_209 = arith.constant 0 : index
    %804 = vector.load %arg14[%803, %c0_209] : memref<64x512xf32, #tpu.memory_space<vmem>>, vector<8x512xf32>
    %805 = arith.truncf %800 : vector<8x128xf32> to vector<8x128xbf16>
    %cst_210 = arith.constant dense<0.000000e+00> : vector<8x512xf32>
    %806 = tpu.matmul %805, %569, %cst_210 {dimension_numbers = #tpu.dot_dimension_numbers<[1], [0], [0], [1], [0, 0, 1, 1], [], []>} : vector<8x128xbf16>, vector<128x512xbf16>, vector<8x512xf32> -> vector<8x512xf32>
    %807 = arith.addf %804, %806 : vector<8x512xf32>
    %808 = vector.extract_strided_slice %807 {offsets = [0, 0], sizes = [8, 128], strides = [1, 1]} : vector<8x512xf32> to vector<8x128xf32>
    %809 = arith.negf %808 : vector<8x128xf32>
    %810 = math.exp %809 : vector<8x128xf32>
    %cst_211 = arith.constant 1.000000e+00 : f32
    %811 = vector.broadcast %cst_211 : f32 to vector<8x128xf32>
    %812 = arith.addf %811, %810 : vector<8x128xf32>
    %813 = arith.divf %811, %812 : vector<8x128xf32>
    %814 = vector.extract_strided_slice %807 {offsets = [0, 128], sizes = [8, 128], strides = [1, 1]} : vector<8x512xf32> to vector<8x128xf32>
    %815 = arith.negf %814 : vector<8x128xf32>
    %816 = math.exp %815 : vector<8x128xf32>
    %cst_212 = arith.constant 1.000000e+00 : f32
    %817 = vector.broadcast %cst_212 : f32 to vector<8x128xf32>
    %818 = arith.addf %817, %816 : vector<8x128xf32>
    %819 = arith.divf %817, %818 : vector<8x128xf32>
    %820 = vector.extract_strided_slice %807 {offsets = [0, 256], sizes = [8, 128], strides = [1, 1]} : vector<8x512xf32> to vector<8x128xf32>
    %821 = math.tanh %820 : vector<8x128xf32>
    %822 = vector.extract_strided_slice %807 {offsets = [0, 384], sizes = [8, 128], strides = [1, 1]} : vector<8x512xf32> to vector<8x128xf32>
    %823 = arith.negf %822 : vector<8x128xf32>
    %824 = math.exp %823 : vector<8x128xf32>
    %cst_213 = arith.constant 1.000000e+00 : f32
    %825 = vector.broadcast %cst_213 : f32 to vector<8x128xf32>
    %826 = arith.addf %825, %824 : vector<8x128xf32>
    %827 = arith.divf %825, %826 : vector<8x128xf32>
    %828 = arith.mulf %819, %798 : vector<8x128xf32>
    %829 = arith.mulf %813, %821 : vector<8x128xf32>
    %830 = arith.addf %828, %829 : vector<8x128xf32>
    %831 = math.tanh %830 : vector<8x128xf32>
    %832 = arith.mulf %827, %831 : vector<8x128xf32>
    %c8_i32_214 = arith.constant 8 : i32
    %833 = arith.truncf %832 : vector<8x128xf32> to vector<8x128xbf16>
    %c0_215 = arith.constant 0 : index
    %c0_216 = arith.constant 0 : index
    %834 = vector.load %arg10[%c0_215, %c0_216] : memref<128x1xbf16, #tpu.memory_space<vmem>>, vector<128x1xbf16>
    %cst_217 = arith.constant dense<0.000000e+00> : vector<8x1xf32>
    %835 = tpu.matmul %833, %834, %cst_217 {dimension_numbers = #tpu.dot_dimension_numbers<[1], [0], [0], [1], [0, 0, 1, 1], [], []>} : vector<8x128xbf16>, vector<128x1xbf16>, vector<8x1xf32> -> vector<8x1xf32>
    %c0_218 = arith.constant 0 : index
    %c0_219 = arith.constant 0 : index
    %836 = vector.load %arg11[%c0_218, %c0_219] : memref<1x1xf32, #tpu.memory_space<vmem>>, vector<1x1xf32>
    %837 = vector.broadcast %836 : vector<1x1xf32> to vector<8x1xf32>
    %838 = arith.addf %835, %837 : vector<8x1xf32>
    %c0_220 = arith.constant 0 : index
    %c0_221 = arith.constant 0 : index
    %839 = vector.load %arg12[%c0_220, %c0_221] : memref<8x1xf32, #tpu.memory_space<vmem>>, vector<8x1xf32>
    tpu.vector_store %arg12[%c0_220, %c0_221], %838 {strides = array<i32>} : memref<8x1xf32, #tpu.memory_space<vmem>>, vector<8x1xf32>,
    return
  }
}

</mosaic_0001>

<bundles_post_ra>
// kernel: lstm_model_forward.1
= control target key start
LH: loop header
LB: loop body
LE: loop exit
PB: predicated region body
PF: predicated region fallthrough
CT: control target
= control target key end

     0   :  { %s7855_s0 = inlined_call_operand.vmem [shape: f32[64,4], index: 0, kind: input, shape index: {}]   ;;  %s7856_s1 = inlined_call_operand.vmem [shape: bf16[4,512], index: 1, kind: input, shape index: {}]   ;;  %s7857_s2 = inlined_call_operand.hbm [shape: bf16[128,512], index: 2, kind: input, shape index: {}]   ;;  %s7858_s3 = inlined_call_operand.vmem [shape: f32[1,512], index: 3, kind: input, shape index: {}]   ;;  %s7859_s4 = inlined_call_operand.hbm [shape: bf16[128,512], index: 4, kind: input, shape index: {}]   ;;  %s7860_s5 = inlined_call_operand.hbm [shape: bf16[128,512], index: 5, kind: input, shape index: {}]   ;;  %s7861_s6 = inlined_call_operand.vmem [shape: f32[1,512], index: 6, kind: input, shape index: {}]   ;;  %s7862_s7 = inlined_call_operand.hbm [shape: bf16[128,512], index: 7, kind: input, shape index: {}]   ;;  %s7863_s8 = inlined_call_operand.hbm [shape: bf16[128,512], index: 8, kind: input, shape index: {}]   ;;  %s7864_s9 = inlined_call_operand.vmem [shape: f32[1,512], index: 9, kind: input, shape index: {}]   ;;  %s7865_s10 = inlined_call_operand.vmem [shape: bf16[128,1], index: 10, kind: input, shape index: {}]   ;;  %s7866_s11 = inlined_call_operand.<no memory space> [shape: f32[1,1], index: 11, kind: input, shape index: {}]   ;;  %s7867_s12 = inlined_call_operand.vmem [shape: f32[8,1], index: 12, kind: output, shape index: {}]  }
   0x1   :  { %v17_v0 = vstv %s7866_s11 }
   0x2   :  { %18 = vst [vmem:[#allocation4] sm:$0x1] %v17_v0 }
   0x3   :  { %19 = vsyncpa [#allocation6], 0 }
   0x4   :  { %20 = vsyncpa [#allocation8], 0 }
   0x5   :  { %21 = vsyncpa [#allocation11], 0  ;;  %s5821_s23 = smov [#allocation7]   ;;  %s5822_s25 = smov [#allocation10]  }
   0x6   :  { %s45_s24 = sshll.u32 %s5821_s23, 4  ;;  %s71_s26 = sshll.u32 %s5822_s25, 4  ;;  %s46_s24 = int_to_ptr.vmem [resolvable:$true] %s45_s24  ;;  %s5900_s26 = int_to_ptr.vmem [resolvable:$true] %s71_s26 }
   0x7   :  { %s5705_s29 = scalar_lea.hbm %s7859_s4, 4096 }
   0x8   :  { %p5706_p0 = scmp.ne.s32.totalorder %s7859_s4, %s5705_s29  ;;  %p5709_p1 = scmp.lt.u32.totalorder %s5705_s29, %s7859_s4 }
   0xa   :  { %p5711_p2 = pnand %p5709_p1, %p5706_p0 }
   0xc   :  { %5714 = shalt.err (!%p5711_p2)
}
   0xd   :  { %s5715_s15 = scalar_lea.vmem %s46_s24, 4096  ;;  %p5720_p4 = scmp.lt.s32.totalorder %s46_s24, %s46_s24 }
   0xe   :  { %p5716_p3 = scmp.ne.s32.totalorder %s46_s24, %s5715_s15  ;;  %p5721_p5 = scmp.lt.s32.totalorder %s5715_s15, %s5715_s15 }
  0x10   :  { %p5722_p6 = por %p5721_p5, %p5720_p4 }
  0x12   :  { %p5723_p7 = pnand %p5722_p6, %p5716_p3 }
  0x14   :  { %5726 = shalt.err (!%p5723_p7)
}
  0x15   :  { %s5823_s16 = smov 256   ;;  %s5824_s17 = smov 16  }
  0x16   :  { %51 = dma.hbm_to_vmem [thread:$0]  %s7859_s4, 4096, %s46_s24, [#allocation8], %s5823_s16, %s5823_s16, %s5824_s17  }
  0x17   :  { %s5727_s22 = scalar_lea.hbm %s7862_s7, 4096 }
  0x18   :  { %p5728_p8 = scmp.ne.s32.totalorder %s7862_s7, %s5727_s22  ;;  %p5731_p9 = scmp.lt.u32.totalorder %s5727_s22, %s7862_s7 }
  0x1a   :  { %p5733_p10 = pnand %p5731_p9, %p5728_p8 }
  0x1c   :  { %5736 = shalt.err (!%p5733_p10)
}
  0x1d   :  { %s5737_s29 = scalar_lea.vmem %s5900_s26, 4096  ;;  %p5742_p12 = scmp.lt.s32.totalorder %s5900_s26, %s5900_s26 }
  0x1e   :  { %p5738_p11 = scmp.ne.s32.totalorder %s5900_s26, %s5737_s29  ;;  %p5743_p13 = scmp.lt.s32.totalorder %s5737_s29, %s5737_s29 }
  0x20   :  { %p5744_p0 = por %p5743_p13, %p5742_p12 }
  0x22   :  { %p5745_p1 = pnand %p5744_p0, %p5738_p11 }
  0x24   :  { %5748 = shalt.err (!%p5745_p1)
}
  0x25   :  { %77 = dma.hbm_to_vmem [thread:$0]  %s7862_s7, 4096, %s5900_s26, [#allocation11], %s5823_s16, %s5823_s16, %s5824_s17  }
  0x26   :  { %s5825_s30 = smov [#allocation5]   ;;  %s5826_s11 = smov [#allocation9]  }
  0x27   :  { %s31_s13 = sshll.u32 %s5825_s30, 4  ;;  %s57_s14 = sshll.u32 %s5826_s11, 4  ;;  %s32_s13 = int_to_ptr.vmem [resolvable:$true] %s31_s13  ;;  %s5937_s14 = int_to_ptr.vmem [resolvable:$true] %s57_s14 }
  0x28   :  { %s5749_s19 = scalar_lea.hbm %s7857_s2, 4096 }
  0x29   :  { %p5750_p2 = scmp.ne.s32.totalorder %s7857_s2, %s5749_s19  ;;  %p5753_p3 = scmp.lt.u32.totalorder %s5749_s19, %s7857_s2 }
  0x2b   :  { %p5755_p4 = pnand %p5753_p3, %p5750_p2 }
  0x2d   :  { %5758 = shalt.err (!%p5755_p4)
}
  0x2e   :  { %s5759_s7 = scalar_lea.vmem %s32_s13, 4096  ;;  %p5764_p6 = scmp.lt.s32.totalorder %s32_s13, %s32_s13 }
  0x2f   :  { %p5760_p5 = scmp.ne.s32.totalorder %s32_s13, %s5759_s7  ;;  %p5765_p7 = scmp.lt.s32.totalorder %s5759_s7, %s5759_s7 }
  0x31   :  { %p5766_p8 = por %p5765_p7, %p5764_p6 }
  0x33   :  { %p5767_p9 = pnand %p5766_p8, %p5760_p5 }
  0x35   :  { %5770 = shalt.err (!%p5767_p9)
}
  0x36   :  { %37 = dma.hbm_to_vmem [thread:$0]  %s7857_s2, 4096, %s32_s13, [#allocation6], %s5823_s16, %s5823_s16, %s5824_s17  }
  0x37   :  { %s5771_s29 = scalar_lea.hbm %s7860_s5, 4096 }
  0x38   :  { %p5772_p10 = scmp.ne.s32.totalorder %s7860_s5, %s5771_s29  ;;  %p5775_p11 = scmp.lt.u32.totalorder %s5771_s29, %s7860_s5 }
  0x3a   :  { %p5777_p12 = pnand %p5775_p11, %p5772_p10 }
  0x3c   :  { %5780 = shalt.err (!%p5777_p12)
}
  0x3d   :  { %s5781_s15 = scalar_lea.vmem %s5937_s14, 4096  ;;  %p5786_p0 = scmp.lt.s32.totalorder %s5937_s14, %s5937_s14 }
  0x3e   :  { %p5782_p13 = scmp.ne.s32.totalorder %s5937_s14, %s5781_s15  ;;  %p5787_p1 = scmp.lt.s32.totalorder %s5781_s15, %s5781_s15 }
  0x40   :  { %p5788_p2 = por %p5787_p1, %p5786_p0 }
  0x42   :  { %p5789_p3 = pnand %p5788_p2, %p5782_p13 }
  0x44   :  { %5792 = shalt.err (!%p5789_p3)
}
  0x45   :  { %63 = dma.hbm_to_vmem [thread:$0]  %s7860_s5, 4096, %s5937_s14, [#allocation8], %s5823_s16, %s5823_s16, %s5824_s17  }
  0x46   :  { %s5827_s18 = smov [#allocation12]   ;;  %s5793_s22 = scalar_lea.hbm %s7863_s8, 4096 }
  0x47   :  { %s83_s19 = sshll.u32 %s5827_s18, 4  ;;  %p5794_p4 = scmp.ne.s32.totalorder %s7863_s8, %s5793_s22  ;;  %s84_s19 = int_to_ptr.vmem [resolvable:$true] %s83_s19 }
  0x48   :  { %p5797_p5 = scmp.lt.u32.totalorder %s5793_s22, %s7863_s8 }
  0x4a   :  { %p5799_p6 = pnand %p5797_p5, %p5794_p4 }
  0x4c   :  { %5802 = shalt.err (!%p5799_p6)
}
  0x4d   :  { %s5803_s27 = scalar_lea.vmem %s84_s19, 4096  ;;  %p5808_p8 = scmp.lt.s32.totalorder %s84_s19, %s84_s19 }
  0x4e   :  { %p5804_p7 = scmp.ne.s32.totalorder %s84_s19, %s5803_s27  ;;  %p5809_p9 = scmp.lt.s32.totalorder %s5803_s27, %s5803_s27 }
  0x50   :  { %p5810_p10 = por %p5809_p9, %p5808_p8 }
  0x52   :  { %p5811_p11 = pnand %p5810_p10, %p5804_p7 }
  0x54   :  { %5814 = shalt.err (!%p5811_p11)
}
  0x55   :  { %89 = dma.hbm_to_vmem [thread:$0]  %s7863_s8, 4096, %s84_s19, [#allocation11], %s5823_s16, %s5823_s16, %s5824_s17  }
  0x56   :  { %5815 = dma.done.wait [#allocation6], 4096  }
  0x57   :  { %5816 = vsyncadd [#allocation6], 4294963200 }
  0x58   :  { %5817 = dma.done.wait [#allocation8], 8192  }
  0x59   :  { %5818 = vsyncadd [#allocation8], 4294959104 }
  0x5a   :  { %5819 = dma.done.wait [#allocation11], 8192  }
  0x5b   :  { %5820 = vsyncadd [#allocation11], 4294959104  ;;  %v159_v1 = vlaneseq  ;;  %v5828_v2 = vmov 1983009808   ;;  %v7868_v4 = vmov 0   ;;  %v124_v8 = vld [vmem:[%s7856_s1] sm:$0xff] }
  0x5c   :  { %v182_v3 = vunpack.c.l.s4 %v5828_v2  ;;  %255 = vmatprep.mubr.bf16.mxu0 %v7868_v4  ;;  %328 = vmatprep.mubr.bf16.mxu1 %v7868_v4  ;;  %vm210_vm0 = vcmask 1041408   ;;  %v180_v10 = vcombine.high %v124_v8, %v124_v8  ;;  %v112_v11 = vld [vmem:[%s7855_s0] sm:$0xff]  ;;  %v113_v12 = vld [vmem:[%s7855_s0 + $0x8] sm:$0xff]  ;;  %vm197_vm1 = vcmask 31744   ;;  %v114_v26 = vld [vmem:[%s7855_s0 + $0x10] sm:$0xff] }
  0x5d   :  { %v5991_v5 = vshrl.u32 %v159_v1, 7  ;;  %v6004_v16 = vld [vmem:[#allocation5 + $0x4] ss:$16 sps:$4 sm:$0xff]   ;;  %v120_v19 = vpack.c.bf16 %v113_v12, %v112_v11  ;;  %v6008_v20 = vld [vmem:[#allocation5 + $0xc] ss:$16 sps:$4 sm:$0xff]   ;;  %vm5831_vm2 = vmmov 0  }
  0x5e   :  { %v183_v6 = vunpack.c.0.s8 %v182_v3  ;;  %v6010_v21 = vld [vmem:[#allocation5] ss:$16 sps:$4 sm:$0xff]   ;;  %v6014_v22 = vld [vmem:[#allocation5 + $0x24] ss:$16 sps:$4 sm:$0xff]   ;;  %v6016_v23 = vld [vmem:[#allocation5 + $0x8] ss:$16 sps:$4 sm:$0xff]  }
  0x5f   :  { %v6020_v24 = vld [vmem:[#allocation5 + $0x20] ss:$16 sps:$4 sm:$0xff]   ;;  %v6022_v25 = vld [vmem:[#allocation5 + $0x2c] ss:$16 sps:$4 sm:$0xff]   ;;  %v6034_v28 = vld [vmem:[#allocation5 + $0x44] ss:$16 sps:$4 sm:$0xff]  }
  0x60   :  { %v186_v7 = vsub.s32 %v183_v6, %v5991_v5  ;;  %v115_v27 = vld [vmem:[%s7855_s0 + $0x18] sm:$0xff]  ;;  %v6044_v32 = vld [vmem:[#allocation5 + $0x40] ss:$16 sps:$4 sm:$0xff]   ;;  %v117_v38 = vld [vmem:[%s7855_s0 + $0x28] sm:$0xff]  ;;  %v6176_v60 = vsub.s32 0, %v5991_v5  ;;  %v6179_v61 = vsub.s32 2, %v5991_v5 }
  0x61   :  { %v6037_v29 = vld [vmem:[#allocation5 + $0x28] ss:$16 sps:$4 sm:$0xff]   ;;  %v121_v30 = vpack.c.bf16 %v115_v27, %v114_v26  ;;  %v6041_v31 = vld [vmem:[#allocation5 + $0x4c] ss:$16 sps:$4 sm:$0xff]   ;;  %v6047_v33 = vld [vmem:[#allocation5 + $0x64] ss:$16 sps:$4 sm:$0xff]  }
  0x62   :  { %v187_v9 = vrot.slane %v124_v8, %v186_v7  ;;  %v194_v15 = vrot.slane %v180_v10, %v186_v7  ;;  %v6050_v34 = vld [vmem:[#allocation5 + $0x48] ss:$16 sps:$4 sm:$0xff]   ;;  %v6054_v35 = vld [vmem:[#allocation5 + $0x6c] ss:$16 sps:$4 sm:$0xff]   ;;  %v6057_v36 = vld [vmem:[#allocation5 + $0x60] ss:$16 sps:$4 sm:$0xff]  }
  0x63   :  { %v116_v37 = vld [vmem:[%s7855_s0 + $0x20] sm:$0xff]  ;;  %v6071_v40 = vld [vmem:[#allocation5 + $0x68] ss:$16 sps:$4 sm:$0xff]   ;;  %v118_v48 = vld [vmem:[%s7855_s0 + $0x30] sm:$0xff]  ;;  %7878 = vst [vmem:[#allocation16_spill] sm:$0xff] %v6176_v60  ;;  %v6185_v63 = vsub.s32 1, %v5991_v5 }
  0x64   :  { %v195_v13 = vcombine.high %v187_v9, %v187_v9  ;;  %v212_v14 = vsel %vm210_vm0, %v187_v9, 0  ;;  %v196_v17 = vcombine.high %v194_v15, %v194_v15  ;;  %v218_v18 = vsel %vm210_vm0, %v194_v15, 0  ;;  %v6068_v39 = vld [vmem:[#allocation5 + $0x84] ss:$16 sps:$4 sm:$0xff]   ;;  %v6075_v42 = vld [vmem:[#allocation5 + $0x80] ss:$16 sps:$4 sm:$0xff]  }
  0x65   :  { %v122_v41 = vpack.c.bf16 %v117_v38, %v116_v37  ;;  %v6077_v43 = vld [vmem:[#allocation5 + $0x8c] ss:$16 sps:$4 sm:$0xff]   ;;  %v6080_v44 = vld [vmem:[#allocation5 + $0x88] ss:$16 sps:$4 sm:$0xff]   ;;  %v6082_v45 = vld [vmem:[#allocation5 + $0xa4] ss:$16 sps:$4 sm:$0xff]  }
  0x66   :  { %4685 = vmatprep.subr.msk.bf16.mxu0 %vm210_vm0, %v195_v13  ;;  %4690 = vmatprep.subr.msk.bf16.mxu1 %vm210_vm0, %v196_v17  ;;  %v6085_v46 = vld [vmem:[#allocation5 + $0xac] ss:$16 sps:$4 sm:$0xff]   ;;  %v6088_v47 = vld [vmem:[#allocation5 + $0xa0] ss:$16 sps:$4 sm:$0xff]   ;;  %v6098_v50 = vld [vmem:[#allocation5 + $0xc4] ss:$16 sps:$4 sm:$0xff]  }
  0x67   :  { %224 = vmatpush1.bf16.msra.mxu0 %v212_v14  ;;  %297 = vmatpush1.bf16.msra.mxu1 %v218_v18  ;;  %v119_v49 = vld [vmem:[%s7855_s0 + $0x38] sm:$0xff]  ;;  %v6110_v53 = vld [vmem:[#allocation5 + $0xc0] ss:$16 sps:$4 sm:$0xff]   ;;  %7879 = vst [vmem:[#allocation17_spill] sm:$0xff] %v6179_v61  ;;  %7880 = vst [vmem:[#allocation18_spill] sm:$0xff] %v6185_v63  ;;  %v6188_v0 = vsub.s32 3, %v5991_v5 }
  0x68   :  { %568 = vmatprep.subr.bf16.mxu0 %v6004_v16  ;;  %609 = vmatprep.subr.bf16.mxu1 %v6008_v20  ;;  %v6102_v51 = vld [vmem:[#allocation5 + $0xa8] ss:$16 sps:$4 sm:$0xff]   ;;  %v6106_v52 = vld [vmem:[#allocation5 + $0xcc] ss:$16 sps:$4 sm:$0xff]   ;;  %v123_v54 = vpack.c.bf16 %v119_v49, %v118_v48  ;;  %v6113_v55 = vld [vmem:[#allocation5 + $0xe4] ss:$16 sps:$4 sm:$0xff]  }
  0x69   :  { %v6116_v56 = vld [vmem:[#allocation5 + $0xc8] ss:$16 sps:$4 sm:$0xff]   ;;  %v6119_v57 = vld [vmem:[#allocation5 + $0xec] ss:$16 sps:$4 sm:$0xff]   ;;  %v6122_v58 = vld [vmem:[#allocation5 + $0xe0] ss:$16 sps:$4 sm:$0xff]  }
  0x6a   :  { %4686 = vmatmul.mubr.msk.bf16.vlgmr.msra.gmra.mrb[0].mxu0 %vm197_vm1, %v120_v19  ;;  %4691 = vmatmul.mubr.msk.bf16.vlgmr.msra.gmra.mrb[0].mxu1 %vm197_vm1, %v120_v19  ;;  %v6128_v59 = vld [vmem:[#allocation5 + $0xe8] ss:$16 sps:$4 sm:$0xff]   ;;  %v157_v62 = vld [vmem:[%s7858_s3] sm:$0xf]  ;;  %7881 = vst [vmem:[#allocation19_spill] sm:$0xff] %v6188_v0  ;;  %vm4669_vm3 = vcmask 7168  }
  0x6b   :  { %569 = vmatpush1.bf16.msra.mxu0 %v6010_v21  ;;  %265 = vmatprep.mubr.bf16.mxu0 %v7868_v4  ;;  %v6193_v2 = vrot.slane %v157_v62, %v6176_v60  ;;  %v6198_v6 = vrot.slane %v157_v62, %v6179_v61  ;;  %v166_v7 = vrot.slane %v157_v62, %v6185_v63 }
  0x6c   :  { %570 = vmatprep.subr.bf16.mxu0 %v6014_v22  ;;  %610 = vmatpush1.bf16.msra.mxu1 %v6016_v23  ;;  %v6202_v10 = vrot.slane %v157_v62, %v6188_v0 }
  0x6d   :  { %338 = vmatprep.mubr.bf16.mxu1 %v7868_v4  ;;  %611 = vmatprep.subr.bf16.mxu1 %v6022_v25 }
  0x6f   :  { %571 = vmatpush1.bf16.msra.mxu0 %v6020_v24 }
  0x70   :  { %572 = vmatprep.subr.bf16.mxu0 %v6034_v28  ;;  %612 = vmatpush1.bf16.msra.mxu1 %v6037_v29 }
  0x71   :  { %613 = vmatprep.subr.bf16.mxu1 %v6041_v31 }
  0x72   :  { %4687 = vmatmul.mubr.msk.bf16.gmra.mrb[4].mxu0 %vm197_vm1, %v121_v30  ;;  %4692 = vmatmul.mubr.msk.bf16.gmra.mrb[4].mxu1 %vm197_vm1, %v121_v30 }
  0x73   :  { %573 = vmatpush1.bf16.msra.mxu0 %v6044_v32  ;;  %275 = vmatprep.mubr.bf16.mxu0 %v7868_v4 }
  0x74   :  { %574 = vmatprep.subr.bf16.mxu0 %v6047_v33  ;;  %614 = vmatpush1.bf16.msra.mxu1 %v6050_v34 }
  0x75   :  { %348 = vmatprep.mubr.bf16.mxu1 %v7868_v4  ;;  %615 = vmatprep.subr.bf16.mxu1 %v6054_v35 }
  0x77   :  { %575 = vmatpush1.bf16.msra.mxu0 %v6057_v36 }
  0x78   :  { %576 = vmatprep.subr.bf16.mxu0 %v6068_v39  ;;  %616 = vmatpush1.bf16.msra.mxu1 %v6071_v40 }
  0x79   :  { %617 = vmatprep.subr.bf16.mxu1 %v6077_v43 }
  0x7a   :  { %4688 = vmatmul.mubr.msk.bf16.gmra.mrb[8].mxu0 %vm197_vm1, %v122_v41  ;;  %4693 = vmatmul.mubr.msk.bf16.gmra.mrb[8].mxu1 %vm197_vm1, %v122_v41 }
  0x7b   :  { %577 = vmatpush1.bf16.msra.mxu0 %v6075_v42  ;;  %285 = vmatprep.mubr.bf16.mxu0 %v7868_v4 }
  0x7c   :  { %578 = vmatprep.subr.bf16.mxu0 %v6082_v45  ;;  %618 = vmatpush1.bf16.msra.mxu1 %v6080_v44 }
  0x7d   :  { %358 = vmatprep.mubr.bf16.mxu1 %v7868_v4  ;;  %619 = vmatprep.subr.bf16.mxu1 %v6085_v46 }
  0x7f   :  { %579 = vmatpush1.bf16.msra.mxu0 %v6088_v47 }
  0x80   :  { %580 = vmatprep.subr.bf16.mxu0 %v6098_v50  ;;  %620 = vmatpush1.bf16.msra.mxu1 %v6102_v51 }
  0x81   :  { %621 = vmatprep.subr.bf16.mxu1 %v6106_v52 }
  0x82   :  { %4689 = vmatmul.mubr.msk.bf16.gmra.mrb[12].mxu0 %vm197_vm1, %v123_v54  ;;  %4694 = vmatmul.mubr.msk.bf16.gmra.mrb[12].mxu1 %vm197_vm1, %v123_v54 }
  0x83   :  { %581 = vmatpush1.bf16.msra.mxu0 %v6110_v53  ;;  %600 = vmatprep.mubr.bf16.mxu0 %v7868_v4 }
  0x84   :  { %582 = vmatprep.subr.bf16.mxu0 %v6113_v55  ;;  %622 = vmatpush1.bf16.msra.mxu1 %v6116_v56 }
  0x85   :  { %641 = vmatprep.mubr.bf16.mxu1 %v7868_v4  ;;  %623 = vmatprep.subr.bf16.mxu1 %v6119_v57 }
  0x87   :  { %583 = vmatpush1.bf16.msra.mxu0 %v6122_v58 }
  0x88   :  { %687 = vmatprep.subr.bf16.mxu0 %v6004_v16  ;;  %624 = vmatpush1.bf16.msra.mxu1 %v6128_v59 }
  0x89   :  { %728 = vmatprep.subr.bf16.mxu1 %v6008_v20 }
  0x8a   :  { %601 = vmatmul.mubr.bf16.vlgmr.msra.gmra.mrb[16].mxu0 %v7868_v4 }
  0x8b   :  { %688 = vmatpush1.bf16.msra.mxu0 %v6010_v21  ;;  %719 = vmatprep.mubr.bf16.mxu0 %v7868_v4 }
  0x8c   :  { %642 = vmatmul.mubr.bf16.vlgmr.msra.gmra.mrb[16].mxu1 %v7868_v4  ;;  %689 = vmatprep.subr.bf16.mxu0 %v6014_v22 }
  0x8d   :  { %729 = vmatpush1.bf16.msra.mxu1 %v6016_v23  ;;  %760 = vmatprep.mubr.bf16.mxu1 %v7868_v4 }
  0x8e   :  { %730 = vmatprep.subr.bf16.mxu1 %v6022_v25 }
  0x8f   :  { %690 = vmatpush1.bf16.msra.mxu0 %v6020_v24 }
  0x90   :  { %691 = vmatprep.subr.bf16.mxu0 %v6034_v28 }
  0x91   :  { %731 = vmatpush1.bf16.msra.mxu1 %v6037_v29 }
  0x92   :  { %732 = vmatprep.subr.bf16.mxu1 %v6041_v31 }
  0x93   :  { %692 = vmatpush1.bf16.msra.mxu0 %v6044_v32 }
  0x94   :  { %693 = vmatprep.subr.bf16.mxu0 %v6047_v33 }
  0x95   :  { %733 = vmatpush1.bf16.msra.mxu1 %v6050_v34 }
  0x96   :  { %734 = vmatprep.subr.bf16.mxu1 %v6054_v35 }
  0x97   :  { %694 = vmatpush1.bf16.msra.mxu0 %v6057_v36 }
  0x98   :  { %695 = vmatprep.subr.bf16.mxu0 %v6068_v39 }
  0x99   :  { %735 = vmatpush1.bf16.msra.mxu1 %v6071_v40 }
  0x9a   :  { %736 = vmatprep.subr.bf16.mxu1 %v6077_v43 }
  0x9b   :  { %696 = vmatpush1.bf16.msra.mxu0 %v6075_v42 }
  0x9c   :  { %697 = vmatprep.subr.bf16.mxu0 %v6082_v45 }
  0x9d   :  { %737 = vmatpush1.bf16.msra.mxu1 %v6080_v44 }
  0x9e   :  { %738 = vmatprep.subr.bf16.mxu1 %v6085_v46 }
  0x9f   :  { %698 = vmatpush1.bf16.msra.mxu0 %v6088_v47 }
  0xa0   :  { %699 = vmatprep.subr.bf16.mxu0 %v6098_v50 }
  0xa1   :  { %739 = vmatpush1.bf16.msra.mxu1 %v6102_v51 }
  0xa2   :  { %740 = vmatprep.subr.bf16.mxu1 %v6106_v52 }
  0xa3   :  { %700 = vmatpush1.bf16.msra.mxu0 %v6110_v53 }
  0xa4   :  { %701 = vmatprep.subr.bf16.mxu0 %v6113_v55 }
  0xa5   :  { %741 = vmatpush1.bf16.msra.mxu1 %v6116_v56 }
  0xa6   :  { %742 = vmatprep.subr.bf16.mxu1 %v6119_v57 }
  0xa7   :  { %702 = vmatpush1.bf16.msra.mxu0 %v6122_v58 }
  0xa8   :  { %807 = vmatprep.subr.bf16.mxu0 %v6004_v16 }
  0xa9   :  { %743 = vmatpush1.bf16.msra.mxu1 %v6128_v59 }
  0xaa   :  { %848 = vmatprep.subr.bf16.mxu1 %v6008_v20 }
 0x13d   :  { %v6190_v1 = vpop.f32.mrb[0].mxu0  ;;  %v330_v9 = vpop.f32.mrb[0].mxu1 }
 0x13e   :  { %v6195_v3 = vpop.f32.mrb[1].mxu0  ;;  %v332_v12 = vpop.f32.mrb[1].mxu1 }
 0x13f   :  { %v261_v8 = vpop.f32.mrb[2].mxu0  ;;  %v334_v14 = vpop.f32.mrb[2].mxu1 }
 0x140   :  { %v6205_v5 = vadd.f32 %v261_v8, %v6193_v2  ;;  %v263_v11 = vpop.f32.mrb[3].mxu0  ;;  %v6210_v15 = vadd.f32 %v334_v14, %v6198_v6  ;;  %v336_v17 = vpop.f32.mrb[3].mxu1 }
 0x141   :  { %v6207_v13 = vadd.f32 %v263_v11, %v166_v7  ;;  %v6213_v18 = vadd.f32 %v336_v17, %v6202_v10 }
 0x145   :  { %v267_v19 = vpop.f32.mrb[4].mxu0  ;;  %v340_v38 = vpop.f32.mrb[4].mxu1 }
 0x146   :  { %v6216_v26 = vadd.f32 %v267_v19, %v6193_v2  ;;  %v269_v27 = vpop.f32.mrb[5].mxu0  ;;  %v6224_v49 = vadd.f32 %v340_v38, %v6198_v6  ;;  %v342_v54 = vpop.f32.mrb[5].mxu1 }
 0x147   :  { %v6218_v30 = vadd.f32 %v269_v27, %v166_v7  ;;  %v271_v37 = vpop.f32.mrb[6].mxu0  ;;  %v6229_v8 = vadd.f32 %v342_v54, %v6202_v10  ;;  %v344_v11 = vpop.f32.mrb[6].mxu1 }
 0x148   :  { %v6221_v41 = vadd.f32 %v271_v37, %v6193_v2  ;;  %v273_v48 = vpop.f32.mrb[7].mxu0  ;;  %v6232_v14 = vadd.f32 %v344_v11, %v6198_v6  ;;  %v346_v17 = vpop.f32.mrb[7].mxu1 }
 0x149   :  { %v6226_v62 = vadd.f32 %v273_v48, %v166_v7  ;;  %7884 = vst [vmem:[#allocation22_spill] sm:$0xff] %v6229_v8  ;;  %v6235_v19 = vadd.f32 %v346_v17, %v6202_v10 }
 0x14a   :  { %7882 = vst [vmem:[#allocation20_spill] sm:$0xff] %v6221_v41  ;;  %7885 = vst [vmem:[#allocation23_spill] sm:$0xff] %v6232_v14 }
 0x14b   :  { %7883 = vst [vmem:[#allocation21_spill] sm:$0xff] %v6226_v62  ;;  %7886 = vst [vmem:[#allocation24_spill] sm:$0xff] %v6235_v19 }
 0x14d   :  { %v277_v27 = vpop.f32.mrb[8].mxu0  ;;  %v350_v0 = vpop.f32.mrb[8].mxu1 }
 0x14e   :  { %v6238_v37 = vadd.f32 %v277_v27, %v6193_v2  ;;  %v279_v38 = vpop.f32.mrb[9].mxu0  ;;  %v6246_v11 = vadd.f32 %v350_v0, %v6198_v6  ;;  %v352_v61 = vpop.f32.mrb[9].mxu1 }
 0x14f   :  { %v6240_v4 = vadd.f32 %v279_v38, %v166_v7  ;;  %v281_v48 = vpop.f32.mrb[10].mxu0  ;;  %v6251_v17 = vadd.f32 %v352_v61, %v6202_v10  ;;  %v354_v27 = vpop.f32.mrb[10].mxu1 }
 0x150   :  { %7887 = vst [vmem:[#allocation25_spill] sm:$0xff] %v6238_v37  ;;  %v6243_v54 = vadd.f32 %v281_v48, %v6193_v2  ;;  %v283_v63 = vpop.f32.mrb[11].mxu0  ;;  %7890 = vst [vmem:[#allocation28_spill] sm:$0xff] %v6246_v11  ;;  %v6254_v37 = vadd.f32 %v354_v27, %v6198_v6  ;;  %v356_v38 = vpop.f32.mrb[11].mxu1 }
 0x151   :  { %7888 = vst [vmem:[#allocation26_spill] sm:$0xff] %v6240_v4  ;;  %v6248_v60 = vadd.f32 %v283_v63, %v166_v7  ;;  %7892 = vst [vmem:[#allocation30_spill] sm:$0xff] %v6251_v17  ;;  %v6257_v4 = vadd.f32 %v356_v38, %v6202_v10 }
 0x152   :  { %7889 = vst [vmem:[#allocation27_spill] sm:$0xff] %v6243_v54  ;;  %7893 = vst [vmem:[#allocation31_spill] sm:$0xff] %v6254_v37 }
 0x153   :  { %7891 = vst [vmem:[#allocation29_spill] sm:$0xff] %v6248_v60  ;;  %7894 = vst [vmem:[#allocation32_spill] sm:$0xff] %v6257_v4 }
 0x155   :  { %v287_v48 = vpop.f32.mrb[12].mxu0  ;;  %v360_v60 = vpop.f32.mrb[12].mxu1 }
 0x156   :  { %v6260_v54 = vadd.f32 %v287_v48, %v6193_v2  ;;  %v289_v0 = vpop.f32.mrb[13].mxu0  ;;  %v6268_v27 = vadd.f32 %v360_v60, %v6198_v6  ;;  %v362_v37 = vpop.f32.mrb[13].mxu1  ;;  %v260_v60 = vadd.f32 %v6195_v3, %v166_v7 }
 0x157   :  { %v6262_v11 = vadd.f32 %v289_v0, %v166_v7  ;;  %v291_v63 = vpop.f32.mrb[14].mxu0  ;;  %v6273_v38 = vadd.f32 %v362_v37, %v6202_v10  ;;  %v364_v48 = vpop.f32.mrb[14].mxu1  ;;  %v333_v37 = vadd.f32 %v332_v12, %v6202_v10 }
 0x158   :  { %7895 = vst [vmem:[#allocation33_spill] sm:$0xff] %v6260_v54  ;;  %v6265_v61 = vadd.f32 %v291_v63, %v6193_v2  ;;  %v293_v17 = vpop.f32.mrb[15].mxu0  ;;  %7898 = vst [vmem:[#allocation36_spill] sm:$0xff] %v6268_v27  ;;  %v6276_v54 = vadd.f32 %v364_v48, %v6198_v6  ;;  %v366_v0 = vpop.f32.mrb[15].mxu1  ;;  %v258_v63 = vadd.f32 %v6190_v1, %v6193_v2 }
 0x159   :  { %7896 = vst [vmem:[#allocation34_spill] sm:$0xff] %v6262_v11  ;;  %v6270_v19 = vadd.f32 %v293_v17, %v166_v7  ;;  %7900 = vst [vmem:[#allocation38_spill] sm:$0xff] %v6273_v38  ;;  %v6279_v11 = vadd.f32 %v366_v0, %v6202_v10  ;;  %v331_v17 = vadd.f32 %v330_v9, %v6198_v6 }
 0x15a   :  { %7897 = vst [vmem:[#allocation35_spill] sm:$0xff] %v6265_v61  ;;  %7901 = vst [vmem:[#allocation39_spill] sm:$0xff] %v6276_v54 }
 0x15b   :  { %7899 = vst [vmem:[#allocation37_spill] sm:$0xff] %v6270_v19  ;;  %7902 = vst [vmem:[#allocation40_spill] sm:$0xff] %v6279_v11 }
 0x15d   :  { %v602_v61 = vpop.f32.mrb[16].mxu0 }
 0x15e   :  { %v650_v19 = vadd.f32 %v602_v61, %v258_v63  ;;  %v604_v27 = vpop.f32.mrb[17].mxu0 }
 0x15f   :  { %v651_v38 = vadd.f32 %v604_v27, %v260_v60  ;;  %v606_v4 = vpop.f32.mrb[18].mxu0  ;;  %v643_v48 = vpop.f32.mrb[16].mxu1 }
 0x160   :  { %v4727_v54 = vmul.f32 -1.442695, %v650_v19  ;;  %v652_v62 = vadd.f32 %v643_v48, %v331_v17  ;;  %v607_v14 = vpop.f32.mrb[19].mxu0  ;;  %v645_v0 = vpop.f32.mrb[17].mxu1 }
 0x161   :  { %v4728_v11 = vmul.f32 -1.442695, %v651_v38  ;;  %v653_v41 = vadd.f32 %v645_v0, %v333_v37  ;;  %v647_v8 = vpop.f32.mrb[18].mxu1  ;;  %v7903_v38 = vmov 0  }
 0x162   :  { %5225 = vpow2.f32 %v4727_v54  ;;  %v648_v1 = vpop.f32.mrb[19].mxu1 }
 0x163   :  { %5227 = vpow2.f32 %v4728_v11  ;;  %v4729_v2 = vmul.f32 -1.442695, %v653_v41 }
 0x165   :  { %5229 = vpow2.f32 %v4729_v2 }
 0x166   :  { %5231 = vtanh.f32 %v652_v62 }
 0x16c   :  { %v5226_v3 = vpop.eup %5225 }
 0x16d   :  { %v5228_v6 = vpop.eup %5227  ;;  %v657_v7 = vadd.f32 1.0, %v5226_v3 }
 0x16e   :  { %v663_v9 = vadd.f32 1.0, %v5228_v6 }
 0x16f   :  { %5233 = vrcp.f32 %v657_v7  ;;  %v5230_v4 = vpop.eup %5229 }
 0x170   :  { %5235 = vrcp.f32 %v663_v9  ;;  %v5232_v10 = vpop.eup %5231  ;;  %v670_v61 = vadd.f32 1.0, %v5230_v4 }
 0x172   :  { %5237 = vrcp.f32 %v670_v61 }
 0x179   :  { %v5234_v12 = vpop.eup %5233 }
 0x17a   :  { %v5236_v14 = vpop.eup %5235  ;;  %v674_v19 = vmul.f32 %v5234_v12, %v5232_v10 }
 0x17b   :  { %v673_v27 = vmul.f32 0.0, %v5236_v14 }
 0x17c   :  { %v5238_v41 = vpop.eup %5237 }
 0x17d   :  { %v6286_v8 = vadd.f32 %v674_v19, %v673_v27 }
 0x17f   :  { %5239 = vtanh.f32 %v6286_v8 }
 0x189   :  { %v5240_v54 = vpop.eup %5239 }
 0x18a   :  { %v6289_v11 = vmul.f32 %v5240_v54, %v5238_v41 }
 0x18c   :  { %v686_v62 = vpack.c.bf16 %v6289_v11, %v6289_v11 }
 0x18e   :  { %720 = vmatmul.mubr.bf16.vlgmr.msra.gmra.mrb[20].mxu0 %v686_v62  ;;  %761 = vmatmul.mubr.bf16.vlgmr.msra.gmra.mrb[20].mxu1 %v686_v62 }
 0x18f   :  { %808 = vmatpush1.bf16.msra.mxu0 %v6010_v21  ;;  %849 = vmatpush1.bf16.msra.mxu1 %v6016_v23 }
 0x190   :  { %809 = vmatprep.subr.bf16.mxu0 %v6014_v22  ;;  %850 = vmatprep.subr.bf16.mxu1 %v6022_v25 }
 0x191   :  { %839 = vmatprep.mubr.bf16.mxu0 %v7903_v38  ;;  %880 = vmatprep.mubr.bf16.mxu1 %v7903_v38 }
 0x193   :  { %810 = vmatpush1.bf16.msra.mxu0 %v6020_v24  ;;  %851 = vmatpush1.bf16.msra.mxu1 %v6037_v29 }
 0x194   :  { %811 = vmatprep.subr.bf16.mxu0 %v6034_v28  ;;  %852 = vmatprep.subr.bf16.mxu1 %v6041_v31 }
 0x197   :  { %812 = vmatpush1.bf16.msra.mxu0 %v6044_v32  ;;  %853 = vmatpush1.bf16.msra.mxu1 %v6050_v34 }
 0x198   :  { %813 = vmatprep.subr.bf16.mxu0 %v6047_v33  ;;  %854 = vmatprep.subr.bf16.mxu1 %v6054_v35 }
 0x19b   :  { %814 = vmatpush1.bf16.msra.mxu0 %v6057_v36  ;;  %855 = vmatpush1.bf16.msra.mxu1 %v6071_v40 }
 0x19c   :  { %815 = vmatprep.subr.bf16.mxu0 %v6068_v39  ;;  %856 = vmatprep.subr.bf16.mxu1 %v6077_v43 }
 0x19f   :  { %816 = vmatpush1.bf16.msra.mxu0 %v6075_v42  ;;  %857 = vmatpush1.bf16.msra.mxu1 %v6080_v44 }
 0x1a0   :  { %817 = vmatprep.subr.bf16.mxu0 %v6082_v45  ;;  %858 = vmatprep.subr.bf16.mxu1 %v6085_v46 }
 0x1a3   :  { %818 = vmatpush1.bf16.msra.mxu0 %v6088_v47  ;;  %859 = vmatpush1.bf16.msra.mxu1 %v6102_v51 }
 0x1a4   :  { %819 = vmatprep.subr.bf16.mxu0 %v6098_v50  ;;  %860 = vmatprep.subr.bf16.mxu1 %v6106_v52 }
 0x1a7   :  { %820 = vmatpush1.bf16.msra.mxu0 %v6110_v53  ;;  %861 = vmatpush1.bf16.msra.mxu1 %v6116_v56 }
 0x1a8   :  { %821 = vmatprep.subr.bf16.mxu0 %v6113_v55  ;;  %862 = vmatprep.subr.bf16.mxu1 %v6119_v57 }
 0x1ab   :  { %822 = vmatpush1.bf16.msra.mxu0 %v6122_v58  ;;  %863 = vmatpush1.bf16.msra.mxu1 %v6128_v59 }
 0x1ac   :  { %927 = vmatprep.subr.bf16.mxu0 %v6004_v16  ;;  %968 = vmatprep.subr.bf16.mxu1 %v6008_v20 }
 0x261   :  { %v721_v63 = vpop.f32.mrb[20].mxu0  ;;  %v762_v60 = vpop.f32.mrb[20].mxu1 }
 0x262   :  { %v769_v17 = vadd.f32 %v721_v63, %v6205_v5  ;;  %v771_v37 = vadd.f32 %v762_v60, %v6210_v15  ;;  %v723_v48 = vpop.f32.mrb[21].mxu0  ;;  %v764_v0 = vpop.f32.mrb[21].mxu1 }
 0x263   :  { %v770_v1 = vadd.f32 %v723_v48, %v6207_v13  ;;  %v772_v2 = vadd.f32 %v764_v0, %v6213_v18  ;;  %v725_v3 = vpop.f32.mrb[22].mxu0  ;;  %v766_v6 = vpop.f32.mrb[22].mxu1 }
 0x264   :  { %v4730_v7 = vmul.f32 -1.442695, %v769_v17  ;;  %v726_v9 = vpop.f32.mrb[23].mxu0  ;;  %v767_v4 = vpop.f32.mrb[23].mxu1 }
 0x265   :  { %v4731_v16 = vmul.f32 -1.442695, %v770_v1  ;;  %v4732_v20 = vmul.f32 -1.442695, %v772_v2 }
 0x266   :  { %5241 = vpow2.f32 %v4730_v7 }
 0x267   :  { %5243 = vpow2.f32 %v4731_v16 }
 0x268   :  { %5245 = vpow2.f32 %v4732_v20 }
 0x269   :  { %5247 = vtanh.f32 %v771_v37 }
 0x270   :  { %v5242_v10 = vpop.eup %5241 }
 0x271   :  { %v5244_v12 = vpop.eup %5243  ;;  %v776_v5 = vadd.f32 1.0, %v5242_v10 }
 0x272   :  { %v782_v15 = vadd.f32 1.0, %v5244_v12  ;;  %v5246_v13 = vpop.eup %5245 }
 0x273   :  { %5249 = vrcp.f32 %v776_v5  ;;  %v5248_v14 = vpop.eup %5247  ;;  %v789_v27 = vadd.f32 1.0, %v5246_v13  ;;  %v6389_v5 = vld [vmem:[#allocation5] ss:$16 sps:$4 sm:$0xff]   ;;  %v6395_v13 = vld [vmem:[#allocation5 + $0x24] ss:$16 sps:$4 sm:$0xff]  }
 0x274   :  { %5251 = vrcp.f32 %v782_v15  ;;  %v6392_v15 = vld [vmem:[#allocation5 + $0x8] ss:$16 sps:$4 sm:$0xff]  }
 0x275   :  { %5253 = vrcp.f32 %v789_v27  ;;  %v6412_v27 = vld [vmem:[#allocation5 + $0x4c] ss:$16 sps:$4 sm:$0xff]  }
 0x27d   :  { %v5250_v18 = vpop.eup %5249 }
 0x27e   :  { %v5252_v19 = vpop.eup %5251  ;;  %v793_v61 = vmul.f32 %v5250_v18, %v5248_v14  ;;  %v6398_v14 = vld [vmem:[#allocation5 + $0x2c] ss:$16 sps:$4 sm:$0xff]   ;;  %v6403_v18 = vld [vmem:[#allocation5 + $0x20] ss:$16 sps:$4 sm:$0xff]  }
 0x27f   :  { %v792_v41 = vmul.f32 %v5252_v19, %v6286_v8  ;;  %v5254_v62 = vpop.eup %5253  ;;  %v6406_v19 = vld [vmem:[#allocation5 + $0x28] ss:$16 sps:$4 sm:$0xff]  }
 0x281   :  { %v6332_v54 = vadd.f32 %v793_v61, %v792_v41  ;;  %v6409_v61 = vld [vmem:[#allocation5 + $0x44] ss:$16 sps:$4 sm:$0xff]   ;;  %v6415_v41 = vld [vmem:[#allocation5 + $0x40] ss:$16 sps:$4 sm:$0xff]  }
 0x283   :  { %5255 = vtanh.f32 %v6332_v54 }
 0x28d   :  { %v5256_v63 = vpop.eup %5255 }
 0x28e   :  { %v6335_v60 = vmul.f32 %v5256_v63, %v5254_v62  ;;  %v6421_v62 = vld [vmem:[#allocation5 + $0x64] ss:$16 sps:$4 sm:$0xff]   ;;  %v6424_v63 = vld [vmem:[#allocation5 + $0x6c] ss:$16 sps:$4 sm:$0xff]  }
 0x290   :  { %v806_v17 = vpack.c.bf16 %v6335_v60, %v6335_v60 }
 0x292   :  { %840 = vmatmul.mubr.bf16.vlgmr.msra.gmra.mrb[24].mxu0 %v806_v17  ;;  %881 = vmatmul.mubr.bf16.vlgmr.msra.gmra.mrb[24].mxu1 %v806_v17  ;;  %v6427_v17 = vld [vmem:[#allocation5 + $0x60] ss:$16 sps:$4 sm:$0xff]  }
 0x293   :  { %928 = vmatpush1.bf16.msra.mxu0 %v6010_v21  ;;  %969 = vmatpush1.bf16.msra.mxu1 %v6016_v23  ;;  %v6371_v21 = vld [vmem:[#allocation5 + $0x4] ss:$16 sps:$4 sm:$0xff]  }
 0x294   :  { %929 = vmatprep.subr.bf16.mxu0 %v6014_v22  ;;  %970 = vmatprep.subr.bf16.mxu1 %v6022_v25  ;;  %v6374_v22 = vld [vmem:[#allocation5 + $0xc] ss:$16 sps:$4 sm:$0xff]  }
 0x295   :  { %959 = vmatprep.mubr.bf16.mxu0 %v7903_v38  ;;  %1000 = vmatprep.mubr.bf16.mxu1 %v7903_v38 }
 0x297   :  { %930 = vmatpush1.bf16.msra.mxu0 %v6020_v24  ;;  %971 = vmatpush1.bf16.msra.mxu1 %v6037_v29 }
 0x298   :  { %931 = vmatprep.subr.bf16.mxu0 %v6034_v28  ;;  %972 = vmatprep.subr.bf16.mxu1 %v6041_v31 }
 0x29b   :  { %932 = vmatpush1.bf16.msra.mxu0 %v6044_v32  ;;  %973 = vmatpush1.bf16.msra.mxu1 %v6050_v34 }
 0x29c   :  { %933 = vmatprep.subr.bf16.mxu0 %v6047_v33  ;;  %974 = vmatprep.subr.bf16.mxu1 %v6054_v35  ;;  %v7904_v33 = vld [vmem:[#allocation22_spill] sm:$0xff] }
 0x29f   :  { %934 = vmatpush1.bf16.msra.mxu0 %v6057_v36  ;;  %975 = vmatpush1.bf16.msra.mxu1 %v6071_v40 }
 0x2a0   :  { %935 = vmatprep.subr.bf16.mxu0 %v6068_v39  ;;  %976 = vmatprep.subr.bf16.mxu1 %v6077_v43 }
 0x2a3   :  { %936 = vmatpush1.bf16.msra.mxu0 %v6075_v42  ;;  %977 = vmatpush1.bf16.msra.mxu1 %v6080_v44 }
 0x2a4   :  { %937 = vmatprep.subr.bf16.mxu0 %v6082_v45  ;;  %978 = vmatprep.subr.bf16.mxu1 %v6085_v46 }
 0x2a7   :  { %938 = vmatpush1.bf16.msra.mxu0 %v6088_v47  ;;  %979 = vmatpush1.bf16.msra.mxu1 %v6102_v51 }
 0x2a8   :  { %939 = vmatprep.subr.bf16.mxu0 %v6098_v50  ;;  %980 = vmatprep.subr.bf16.mxu1 %v6106_v52 }
 0x2ab   :  { %940 = vmatpush1.bf16.msra.mxu0 %v6110_v53  ;;  %981 = vmatpush1.bf16.msra.mxu1 %v6116_v56 }
 0x2ac   :  { %941 = vmatprep.subr.bf16.mxu0 %v6113_v55  ;;  %982 = vmatprep.subr.bf16.mxu1 %v6119_v57 }
 0x2af   :  { %942 = vmatpush1.bf16.msra.mxu0 %v6122_v58  ;;  %983 = vmatpush1.bf16.msra.mxu1 %v6128_v59 }
 0x2b0   :  { %1047 = vmatprep.subr.bf16.mxu0 %v6371_v21  ;;  %1088 = vmatprep.subr.bf16.mxu1 %v6374_v22 }
 0x365   :  { %v841_v23 = vpop.f32.mrb[24].mxu0  ;;  %v882_v24 = vpop.f32.mrb[24].mxu1 }
 0x366   :  { %v889_v25 = vadd.f32 %v841_v23, %v6216_v26  ;;  %v891_v28 = vadd.f32 %v882_v24, %v6224_v49  ;;  %v843_v29 = vpop.f32.mrb[25].mxu0  ;;  %v884_v31 = vpop.f32.mrb[25].mxu1  ;;  %v6430_v23 = vld [vmem:[#allocation5 + $0x68] ss:$16 sps:$4 sm:$0xff]   ;;  %v6433_v24 = vld [vmem:[#allocation5 + $0x84] ss:$16 sps:$4 sm:$0xff]  }
 0x367   :  { %v890_v32 = vadd.f32 %v843_v29, %v6218_v30  ;;  %v892_v34 = vadd.f32 %v884_v31, %v7904_v33  ;;  %v845_v35 = vpop.f32.mrb[26].mxu0  ;;  %v886_v36 = vpop.f32.mrb[26].mxu1 }
 0x368   :  { %v4733_v39 = vmul.f32 -1.442695, %v889_v25  ;;  %v846_v40 = vpop.f32.mrb[27].mxu0  ;;  %v887_v42 = vpop.f32.mrb[27].mxu1  ;;  %v6437_v25 = vld [vmem:[#allocation5 + $0x80] ss:$16 sps:$4 sm:$0xff]  }
 0x369   :  { %v4734_v8 = vmul.f32 -1.442695, %v890_v32  ;;  %v4735_v37 = vmul.f32 -1.442695, %v892_v34 }
 0x36a   :  { %5257 = vpow2.f32 %v4733_v39 }
 0x36b   :  { %5259 = vpow2.f32 %v4734_v8 }
 0x36c   :  { %5261 = vpow2.f32 %v4735_v37 }
 0x36d   :  { %5263 = vtanh.f32 %v891_v28 }
 0x374   :  { %v5258_v48 = vpop.eup %5257 }
 0x375   :  { %v5260_v0 = vpop.eup %5259  ;;  %v896_v26 = vadd.f32 1.0, %v5258_v48 }
 0x376   :  { %v902_v49 = vadd.f32 1.0, %v5260_v0  ;;  %v5262_v30 = vpop.eup %5261 }
 0x377   :  { %5265 = vrcp.f32 %v896_v26  ;;  %v5264_v1 = vpop.eup %5263  ;;  %v909_v7 = vadd.f32 1.0, %v5262_v30 }
 0x378   :  { %5267 = vrcp.f32 %v902_v49 }
 0x379   :  { %5269 = vrcp.f32 %v909_v7  ;;  %v6488_v7 = vld [vmem:[#allocation5 + $0x88] ss:$16 sps:$4 sm:$0xff]  }
 0x381   :  { %v5266_v2 = vpop.eup %5265 }
 0x382   :  { %v5268_v3 = vpop.eup %5267  ;;  %v913_v6 = vmul.f32 %v5266_v2, %v5264_v1 }
 0x383   :  { %v912_v9 = vmul.f32 %v5268_v3, %v6332_v54  ;;  %v5270_v16 = vpop.eup %5269  ;;  %v6418_v54 = vld [vmem:[#allocation5 + $0x48] ss:$16 sps:$4 sm:$0xff]  }
 0x385   :  { %v6382_v4 = vadd.f32 %v913_v6, %v912_v9  ;;  %v6484_v6 = vld [vmem:[#allocation5 + $0x8c] ss:$16 sps:$4 sm:$0xff]   ;;  %v6491_v9 = vld [vmem:[#allocation5 + $0xa4] ss:$16 sps:$4 sm:$0xff]  }
 0x387   :  { %5271 = vtanh.f32 %v6382_v4 }
 0x391   :  { %v5272_v20 = vpop.eup %5271 }
 0x392   :  { %v6385_v10 = vmul.f32 %v5272_v20, %v5270_v16  ;;  %v6497_v16 = vld [vmem:[#allocation5 + $0xa0] ss:$16 sps:$4 sm:$0xff]   ;;  %v6500_v20 = vld [vmem:[#allocation5 + $0xa8] ss:$16 sps:$4 sm:$0xff]  }
 0x394   :  { %v926_v12 = vpack.c.bf16 %v6385_v10, %v6385_v10 }
 0x396   :  { %960 = vmatmul.mubr.bf16.vlgmr.msra.gmra.mrb[28].mxu0 %v926_v12  ;;  %1001 = vmatmul.mubr.bf16.vlgmr.msra.gmra.mrb[28].mxu1 %v926_v12  ;;  %v6503_v12 = vld [vmem:[#allocation5 + $0xc4] ss:$16 sps:$4 sm:$0xff]  }
 0x397   :  { %1048 = vmatpush1.bf16.msra.mxu0 %v6389_v5  ;;  %1089 = vmatpush1.bf16.msra.mxu1 %v6392_v15 }
 0x398   :  { %1049 = vmatprep.subr.bf16.mxu0 %v6395_v13  ;;  %1090 = vmatprep.subr.bf16.mxu1 %v6398_v14 }
 0x399   :  { %1079 = vmatprep.mubr.bf16.mxu0 %v7903_v38  ;;  %1120 = vmatprep.mubr.bf16.mxu1 %v7903_v38 }
 0x39b   :  { %1050 = vmatpush1.bf16.msra.mxu0 %v6403_v18  ;;  %1091 = vmatpush1.bf16.msra.mxu1 %v6406_v19 }
 0x39c   :  { %1051 = vmatprep.subr.bf16.mxu0 %v6409_v61  ;;  %1092 = vmatprep.subr.bf16.mxu1 %v6412_v27 }
 0x39f   :  { %1052 = vmatpush1.bf16.msra.mxu0 %v6415_v41  ;;  %1093 = vmatpush1.bf16.msra.mxu1 %v6418_v54 }
 0x3a0   :  { %1053 = vmatprep.subr.bf16.mxu0 %v6421_v62  ;;  %1094 = vmatprep.subr.bf16.mxu1 %v6424_v63 }
 0x3a3   :  { %1054 = vmatpush1.bf16.msra.mxu0 %v6427_v17  ;;  %1095 = vmatpush1.bf16.msra.mxu1 %v6430_v23 }
 0x3a4   :  { %1055 = vmatprep.subr.bf16.mxu0 %v6433_v24  ;;  %1096 = vmatprep.subr.bf16.mxu1 %v6077_v43 }
 0x3a7   :  { %1056 = vmatpush1.bf16.msra.mxu0 %v6437_v25  ;;  %1097 = vmatpush1.bf16.msra.mxu1 %v6080_v44 }
 0x3a8   :  { %1057 = vmatprep.subr.bf16.mxu0 %v6082_v45  ;;  %1098 = vmatprep.subr.bf16.mxu1 %v6085_v46  ;;  %v7905_v45 = vld [vmem:[#allocation20_spill] sm:$0xff] }
 0x3ab   :  { %1058 = vmatpush1.bf16.msra.mxu0 %v6088_v47  ;;  %1099 = vmatpush1.bf16.msra.mxu1 %v6102_v51  ;;  %v7906_v47 = vld [vmem:[#allocation23_spill] sm:$0xff] }
 0x3ac   :  { %1059 = vmatprep.subr.bf16.mxu0 %v6098_v50  ;;  %1100 = vmatprep.subr.bf16.mxu1 %v6106_v52 }
 0x3af   :  { %1060 = vmatpush1.bf16.msra.mxu0 %v6110_v53  ;;  %1101 = vmatpush1.bf16.msra.mxu1 %v6116_v56  ;;  %v7907_v53 = vld [vmem:[#allocation21_spill] sm:$0xff]  ;;  %v7908_v56 = vld [vmem:[#allocation24_spill] sm:$0xff] }
 0x3b0   :  { %1061 = vmatprep.subr.bf16.mxu0 %v6113_v55  ;;  %1102 = vmatprep.subr.bf16.mxu1 %v6119_v57 }
 0x3b3   :  { %1062 = vmatpush1.bf16.msra.mxu0 %v6122_v58  ;;  %1103 = vmatpush1.bf16.msra.mxu1 %v6128_v59 }
 0x3b4   :  { %1167 = vmatprep.subr.bf16.mxu0 %v6371_v21  ;;  %1208 = vmatprep.subr.bf16.mxu1 %v6374_v22 }
 0x469   :  { %v961_v43 = vpop.f32.mrb[28].mxu0  ;;  %v1002_v44 = vpop.f32.mrb[28].mxu1 }
 0x46a   :  { %v1009_v46 = vadd.f32 %v961_v43, %v7905_v45  ;;  %v1011_v50 = vadd.f32 %v1002_v44, %v7906_v47  ;;  %v963_v51 = vpop.f32.mrb[29].mxu0  ;;  %v1004_v52 = vpop.f32.mrb[29].mxu1  ;;  %v6506_v43 = vld [vmem:[#allocation5 + $0xcc] ss:$16 sps:$4 sm:$0xff]   ;;  %v6509_v44 = vld [vmem:[#allocation5 + $0xc0] ss:$16 sps:$4 sm:$0xff]  }
 0x46b   :  { %v1010_v55 = vadd.f32 %v963_v51, %v7907_v53  ;;  %v1012_v57 = vadd.f32 %v1004_v52, %v7908_v56  ;;  %v965_v28 = vpop.f32.mrb[30].mxu0  ;;  %v1006_v58 = vpop.f32.mrb[30].mxu1  ;;  %v6512_v45 = vld [vmem:[#allocation5 + $0xc8] ss:$16 sps:$4 sm:$0xff]   ;;  %v6518_v47 = vld [vmem:[#allocation5 + $0xec] ss:$16 sps:$4 sm:$0xff]  }
 0x46c   :  { %v4736_v29 = vmul.f32 -1.442695, %v1009_v46  ;;  %v966_v59 = vpop.f32.mrb[31].mxu0  ;;  %v1007_v31 = vpop.f32.mrb[31].mxu1  ;;  %v6515_v46 = vld [vmem:[#allocation5 + $0xe4] ss:$16 sps:$4 sm:$0xff]  }
 0x46d   :  { %v4737_v32 = vmul.f32 -1.442695, %v1010_v55  ;;  %v4738_v33 = vmul.f32 -1.442695, %v1012_v57  ;;  %v6524_v51 = vld [vmem:[#allocation5 + $0xe8] ss:$16 sps:$4 sm:$0xff]  }
 0x46e   :  { %5273 = vpow2.f32 %v4736_v29  ;;  %v7909_v55 = vld [vmem:[#allocation25_spill] sm:$0xff]  ;;  %v7910_v57 = vld [vmem:[#allocation28_spill] sm:$0xff]  ;;  %v7911_v59 = vld [vmem:[#allocation26_spill] sm:$0xff] }
 0x46f   :  { %5275 = vpow2.f32 %v4737_v32  ;;  %v7912_v32 = vld [vmem:[#allocation30_spill] sm:$0xff] }
 0x470   :  { %5277 = vpow2.f32 %v4738_v33 }
 0x471   :  { %5279 = vtanh.f32 %v1011_v50  ;;  %v6521_v50 = vld [vmem:[#allocation5 + $0xe0] ss:$16 sps:$4 sm:$0xff]  }
 0x478   :  { %v5274_v34 = vpop.eup %5273 }
 0x479   :  { %v5276_v35 = vpop.eup %5275  ;;  %v1016_v36 = vadd.f32 1.0, %v5274_v34 }
 0x47a   :  { %v1022_v39 = vadd.f32 1.0, %v5276_v35  ;;  %v5278_v40 = vpop.eup %5277 }
 0x47b   :  { %5281 = vrcp.f32 %v1016_v36  ;;  %v5280_v42 = vpop.eup %5279  ;;  %v1029_v0 = vadd.f32 1.0, %v5278_v40 }
 0x47c   :  { %5283 = vrcp.f32 %v1022_v39 }
 0x47d   :  { %5285 = vrcp.f32 %v1029_v0 }
 0x485   :  { %v5282_v8 = vpop.eup %5281 }
 0x486   :  { %v5284_v37 = vpop.eup %5283  ;;  %v1033_v48 = vmul.f32 %v5282_v8, %v5280_v42 }
 0x487   :  { %v1032_v26 = vmul.f32 %v5284_v37, %v6382_v4  ;;  %v5286_v30 = vpop.eup %5285  ;;  %v6494_v4 = vld [vmem:[#allocation5 + $0xac] ss:$16 sps:$4 sm:$0xff]  }
 0x489   :  { %v6460_v49 = vadd.f32 %v1033_v48, %v1032_v26 }
 0x48b   :  { %5287 = vtanh.f32 %v6460_v49 }
 0x495   :  { %v5288_v1 = vpop.eup %5287 }
 0x496   :  { %v6463_v2 = vmul.f32 %v5288_v1, %v5286_v30 }
 0x498   :  { %v1046_v3 = vpack.c.bf16 %v6463_v2, %v6463_v2 }
 0x49a   :  { %1080 = vmatmul.mubr.bf16.vlgmr.msra.gmra.mrb[32].mxu0 %v1046_v3  ;;  %1121 = vmatmul.mubr.bf16.vlgmr.msra.gmra.mrb[32].mxu1 %v1046_v3 }
 0x49b   :  { %1168 = vmatpush1.bf16.msra.mxu0 %v6389_v5  ;;  %1209 = vmatpush1.bf16.msra.mxu1 %v6392_v15 }
 0x49c   :  { %1169 = vmatprep.subr.bf16.mxu0 %v6395_v13  ;;  %1210 = vmatprep.subr.bf16.mxu1 %v6398_v14 }
 0x49d   :  { %1199 = vmatprep.mubr.bf16.mxu0 %v7903_v38  ;;  %1240 = vmatprep.mubr.bf16.mxu1 %v7903_v38 }
 0x49f   :  { %1170 = vmatpush1.bf16.msra.mxu0 %v6403_v18  ;;  %1211 = vmatpush1.bf16.msra.mxu1 %v6406_v19 }
 0x4a0   :  { %1171 = vmatprep.subr.bf16.mxu0 %v6409_v61  ;;  %1212 = vmatprep.subr.bf16.mxu1 %v6412_v27 }
 0x4a3   :  { %1172 = vmatpush1.bf16.msra.mxu0 %v6415_v41  ;;  %1213 = vmatpush1.bf16.msra.mxu1 %v6418_v54 }
 0x4a4   :  { %1173 = vmatprep.subr.bf16.mxu0 %v6421_v62  ;;  %1214 = vmatprep.subr.bf16.mxu1 %v6424_v63 }
 0x4a7   :  { %1174 = vmatpush1.bf16.msra.mxu0 %v6427_v17  ;;  %1215 = vmatpush1.bf16.msra.mxu1 %v6430_v23 }
 0x4a8   :  { %1175 = vmatprep.subr.bf16.mxu0 %v6433_v24  ;;  %1216 = vmatprep.subr.bf16.mxu1 %v6484_v6 }
 0x4ab   :  { %1176 = vmatpush1.bf16.msra.mxu0 %v6437_v25  ;;  %1217 = vmatpush1.bf16.msra.mxu1 %v6488_v7 }
 0x4ac   :  { %1177 = vmatprep.subr.bf16.mxu0 %v6491_v9  ;;  %1218 = vmatprep.subr.bf16.mxu1 %v6494_v4 }
 0x4af   :  { %1178 = vmatpush1.bf16.msra.mxu0 %v6497_v16  ;;  %1219 = vmatpush1.bf16.msra.mxu1 %v6500_v20 }
 0x4b0   :  { %1179 = vmatprep.subr.bf16.mxu0 %v6503_v12  ;;  %1220 = vmatprep.subr.bf16.mxu1 %v6506_v43 }
 0x4b3   :  { %1180 = vmatpush1.bf16.msra.mxu0 %v6509_v44  ;;  %1221 = vmatpush1.bf16.msra.mxu1 %v6512_v45 }
 0x4b4   :  { %1181 = vmatprep.subr.bf16.mxu0 %v6515_v46  ;;  %1222 = vmatprep.subr.bf16.mxu1 %v6518_v47 }
 0x4b7   :  { %1182 = vmatpush1.bf16.msra.mxu0 %v6521_v50  ;;  %1223 = vmatpush1.bf16.msra.mxu1 %v6524_v51 }
 0x4b8   :  { %1287 = vmatprep.subr.bf16.mxu0 %v6371_v21  ;;  %1328 = vmatprep.subr.bf16.mxu1 %v6374_v22 }
 0x56d   :  { %v1081_v52 = vpop.f32.mrb[32].mxu0  ;;  %v1122_v53 = vpop.f32.mrb[32].mxu1 }
 0x56e   :  { %v1129_v56 = vadd.f32 %v1081_v52, %v7909_v55  ;;  %v1131_v28 = vadd.f32 %v1122_v53, %v7910_v57  ;;  %v1083_v58 = vpop.f32.mrb[33].mxu0  ;;  %v1124_v29 = vpop.f32.mrb[33].mxu1 }
 0x56f   :  { %v1130_v31 = vadd.f32 %v1083_v58, %v7911_v59  ;;  %v1132_v33 = vadd.f32 %v1124_v29, %v7912_v32  ;;  %v1085_v34 = vpop.f32.mrb[34].mxu0  ;;  %v1126_v35 = vpop.f32.mrb[34].mxu1  ;;  %v7913_v32 = vld [vmem:[#allocation27_spill] sm:$0xff] }
 0x570   :  { %v4739_v36 = vmul.f32 -1.442695, %v1129_v56  ;;  %v1086_v39 = vpop.f32.mrb[35].mxu0  ;;  %v1127_v40 = vpop.f32.mrb[35].mxu1  ;;  %v7914_v34 = vld [vmem:[#allocation31_spill] sm:$0xff] }
 0x571   :  { %v4740_v42 = vmul.f32 -1.442695, %v1130_v31  ;;  %v4741_v8 = vmul.f32 -1.442695, %v1132_v33  ;;  %v7915_v40 = vld [vmem:[#allocation29_spill] sm:$0xff] }
 0x572   :  { %5289 = vpow2.f32 %v4739_v36 }
 0x573   :  { %5291 = vpow2.f32 %v4740_v42 }
 0x574   :  { %5293 = vpow2.f32 %v4741_v8  ;;  %v7916_v8 = vld [vmem:[#allocation32_spill] sm:$0xff] }
 0x575   :  { %5295 = vtanh.f32 %v1131_v28 }
 0x57c   :  { %v5290_v37 = vpop.eup %5289 }
 0x57d   :  { %v5292_v48 = vpop.eup %5291  ;;  %v1136_v0 = vadd.f32 1.0, %v5290_v37 }
 0x57e   :  { %v1142_v26 = vadd.f32 1.0, %v5292_v48  ;;  %v5294_v30 = vpop.eup %5293 }
 0x57f   :  { %5297 = vrcp.f32 %v1136_v0  ;;  %v5296_v1 = vpop.eup %5295  ;;  %v1149_v55 = vadd.f32 1.0, %v5294_v30 }
 0x580   :  { %5299 = vrcp.f32 %v1142_v26 }
 0x581   :  { %5301 = vrcp.f32 %v1149_v55 }
 0x589   :  { %v5298_v3 = vpop.eup %5297 }
 0x58a   :  { %v5300_v52 = vpop.eup %5299  ;;  %v1153_v53 = vmul.f32 %v5298_v3, %v5296_v1 }
 0x58b   :  { %v1152_v56 = vmul.f32 %v5300_v52, %v6460_v49  ;;  %v5302_v58 = vpop.eup %5301 }
 0x58d   :  { %v6534_v57 = vadd.f32 %v1153_v53, %v1152_v56 }
 0x58f   :  { %5303 = vtanh.f32 %v6534_v57 }
 0x599   :  { %v5304_v29 = vpop.eup %5303 }
 0x59a   :  { %v6537_v59 = vmul.f32 %v5304_v29, %v5302_v58 }
 0x59c   :  { %v1166_v28 = vpack.c.bf16 %v6537_v59, %v6537_v59 }
 0x59e   :  { %1200 = vmatmul.mubr.bf16.vlgmr.msra.gmra.mrb[36].mxu0 %v1166_v28  ;;  %1241 = vmatmul.mubr.bf16.vlgmr.msra.gmra.mrb[36].mxu1 %v1166_v28 }
 0x59f   :  { %1288 = vmatpush1.bf16.msra.mxu0 %v6389_v5  ;;  %1329 = vmatpush1.bf16.msra.mxu1 %v6392_v15 }
 0x5a0   :  { %1289 = vmatprep.subr.bf16.mxu0 %v6395_v13  ;;  %1330 = vmatprep.subr.bf16.mxu1 %v6398_v14 }
 0x5a1   :  { %1319 = vmatprep.mubr.bf16.mxu0 %v7903_v38  ;;  %1360 = vmatprep.mubr.bf16.mxu1 %v7903_v38 }
 0x5a3   :  { %1290 = vmatpush1.bf16.msra.mxu0 %v6403_v18  ;;  %1331 = vmatpush1.bf16.msra.mxu1 %v6406_v19 }
 0x5a4   :  { %1291 = vmatprep.subr.bf16.mxu0 %v6409_v61  ;;  %1332 = vmatprep.subr.bf16.mxu1 %v6412_v27 }
 0x5a7   :  { %1292 = vmatpush1.bf16.msra.mxu0 %v6415_v41  ;;  %1333 = vmatpush1.bf16.msra.mxu1 %v6418_v54 }
 0x5a8   :  { %1293 = vmatprep.subr.bf16.mxu0 %v6421_v62  ;;  %1334 = vmatprep.subr.bf16.mxu1 %v6424_v63 }
 0x5ab   :  { %1294 = vmatpush1.bf16.msra.mxu0 %v6427_v17  ;;  %1335 = vmatpush1.bf16.msra.mxu1 %v6430_v23 }
 0x5ac   :  { %1295 = vmatprep.subr.bf16.mxu0 %v6433_v24  ;;  %1336 = vmatprep.subr.bf16.mxu1 %v6484_v6 }
 0x5af   :  { %1296 = vmatpush1.bf16.msra.mxu0 %v6437_v25  ;;  %1337 = vmatpush1.bf16.msra.mxu1 %v6488_v7 }
 0x5b0   :  { %1297 = vmatprep.subr.bf16.mxu0 %v6491_v9  ;;  %1338 = vmatprep.subr.bf16.mxu1 %v6494_v4 }
 0x5b3   :  { %1298 = vmatpush1.bf16.msra.mxu0 %v6497_v16  ;;  %1339 = vmatpush1.bf16.msra.mxu1 %v6500_v20 }
 0x5b4   :  { %1299 = vmatprep.subr.bf16.mxu0 %v6503_v12  ;;  %1340 = vmatprep.subr.bf16.mxu1 %v6506_v43 }
 0x5b7   :  { %1300 = vmatpush1.bf16.msra.mxu0 %v6509_v44  ;;  %1341 = vmatpush1.bf16.msra.mxu1 %v6512_v45 }
 0x5b8   :  { %1301 = vmatprep.subr.bf16.mxu0 %v6515_v46  ;;  %1342 = vmatprep.subr.bf16.mxu1 %v6518_v47 }
 0x5bb   :  { %1302 = vmatpush1.bf16.msra.mxu0 %v6521_v50  ;;  %1343 = vmatpush1.bf16.msra.mxu1 %v6524_v51 }
 0x5bc   :  { %1407 = vmatprep.subr.bf16.mxu0 %v6371_v21  ;;  %1448 = vmatprep.subr.bf16.mxu1 %v6374_v22 }
 0x671   :  { %v1201_v49 = vpop.f32.mrb[36].mxu0  ;;  %v1242_v31 = vpop.f32.mrb[36].mxu1 }
 0x672   :  { %v1249_v33 = vadd.f32 %v1201_v49, %v7913_v32  ;;  %v1251_v35 = vadd.f32 %v1242_v31, %v7914_v34  ;;  %v1203_v36 = vpop.f32.mrb[37].mxu0  ;;  %v1244_v39 = vpop.f32.mrb[37].mxu1 }
 0x673   :  { %v1250_v42 = vadd.f32 %v1203_v36, %v7915_v40  ;;  %v1252_v37 = vadd.f32 %v1244_v39, %v7916_v8  ;;  %v1205_v48 = vpop.f32.mrb[38].mxu0  ;;  %v1246_v0 = vpop.f32.mrb[38].mxu1 }
 0x674   :  { %v4742_v26 = vmul.f32 -1.442695, %v1249_v33  ;;  %v1206_v30 = vpop.f32.mrb[39].mxu0  ;;  %v1247_v1 = vpop.f32.mrb[39].mxu1  ;;  %v5025_v0 = vld [vmem:[#allocation7] ss:$16 sps:$4 sm:$0xff]  }
 0x675   :  { %v4743_v21 = vmul.f32 -1.442695, %v1250_v42  ;;  %v4744_v22 = vmul.f32 -1.442695, %v1252_v37  ;;  %v5033_v1 = vld [vmem:[#allocation7 + $0x24] ss:$16 sps:$4 sm:$0xff]  }
 0x676   :  { %5305 = vpow2.f32 %v4742_v26  ;;  %v5028_v26 = vld [vmem:[#allocation7 + $0x8] ss:$16 sps:$4 sm:$0xff]  }
 0x677   :  { %5307 = vpow2.f32 %v4743_v21  ;;  %v5036_v21 = vld [vmem:[#allocation7 + $0x2c] ss:$16 sps:$4 sm:$0xff]  }
 0x678   :  { %5309 = vpow2.f32 %v4744_v22  ;;  %v5031_v22 = vld [vmem:[#allocation7 + $0x20] ss:$16 sps:$4 sm:$0xff]  }
 0x679   :  { %5311 = vtanh.f32 %v1251_v35 }
 0x680   :  { %v5306_v3 = vpop.eup %5305 }
 0x681   :  { %v5308_v52 = vpop.eup %5307  ;;  %v1256_v53 = vadd.f32 1.0, %v5306_v3  ;;  %v5034_v3 = vld [vmem:[#allocation7 + $0x28] ss:$16 sps:$4 sm:$0xff]  }
 0x682   :  { %v1262_v55 = vadd.f32 1.0, %v5308_v52  ;;  %v5310_v56 = vpop.eup %5309  ;;  %v5039_v52 = vld [vmem:[#allocation7 + $0x44] ss:$16 sps:$4 sm:$0xff]  }
 0x683   :  { %5313 = vrcp.f32 %v1256_v53  ;;  %v5312_v58 = vpop.eup %5311  ;;  %v1269_v31 = vadd.f32 1.0, %v5310_v56  ;;  %v5042_v53 = vld [vmem:[#allocation7 + $0x4c] ss:$16 sps:$4 sm:$0xff]   ;;  %v5040_v56 = vld [vmem:[#allocation7 + $0x48] ss:$16 sps:$4 sm:$0xff]  }
 0x684   :  { %5315 = vrcp.f32 %v1262_v55  ;;  %v5037_v55 = vld [vmem:[#allocation7 + $0x40] ss:$16 sps:$4 sm:$0xff]  }
 0x685   :  { %5317 = vrcp.f32 %v1269_v31  ;;  %v5051_v31 = vld [vmem:[#allocation7 + $0x84] ss:$16 sps:$4 sm:$0xff]  }
 0x68d   :  { %v5314_v29 = vpop.eup %5313 }
 0x68e   :  { %v5316_v28 = vpop.eup %5315  ;;  %v1273_v49 = vmul.f32 %v5314_v29, %v5312_v58  ;;  %v5045_v58 = vld [vmem:[#allocation7 + $0x64] ss:$16 sps:$4 sm:$0xff]   ;;  %v5048_v29 = vld [vmem:[#allocation7 + $0x6c] ss:$16 sps:$4 sm:$0xff]  }
 0x68f   :  { %v1272_v32 = vmul.f32 %v5316_v28, %v6534_v57  ;;  %v5318_v34 = vpop.eup %5317  ;;  %v5043_v28 = vld [vmem:[#allocation7 + $0x60] ss:$16 sps:$4 sm:$0xff]  }
 0x691   :  { %v6580_v33 = vadd.f32 %v1273_v49, %v1272_v32  ;;  %v5046_v49 = vld [vmem:[#allocation7 + $0x68] ss:$16 sps:$4 sm:$0xff]   ;;  %v5054_v32 = vld [vmem:[#allocation7 + $0x8c] ss:$16 sps:$4 sm:$0xff]  }
 0x693   :  { %5319 = vtanh.f32 %v6580_v33 }
 0x69d   :  { %v5320_v36 = vpop.eup %5319 }
 0x69e   :  { %v6583_v39 = vmul.f32 %v5320_v36, %v5318_v34  ;;  %v5052_v34 = vld [vmem:[#allocation7 + $0x88] ss:$16 sps:$4 sm:$0xff]   ;;  %v5057_v36 = vld [vmem:[#allocation7 + $0xa4] ss:$16 sps:$4 sm:$0xff]  }
 0x6a0   :  { %v1286_v35 = vpack.c.bf16 %v6583_v39, %v6583_v39 }
 0x6a2   :  { %1320 = vmatmul.mubr.bf16.vlgmr.msra.gmra.mrb[40].mxu0 %v1286_v35  ;;  %1361 = vmatmul.mubr.bf16.vlgmr.msra.gmra.mrb[40].mxu1 %v1286_v35  ;;  %v5060_v35 = vld [vmem:[#allocation7 + $0xac] ss:$16 sps:$4 sm:$0xff]  }
 0x6a3   :  { %1408 = vmatpush1.bf16.msra.mxu0 %v6389_v5  ;;  %1449 = vmatpush1.bf16.msra.mxu1 %v6392_v15  ;;  %v5027_v5 = vld [vmem:[#allocation7 + $0x4] ss:$16 sps:$4 sm:$0xff]   ;;  %v5030_v15 = vld [vmem:[#allocation7 + $0xc] ss:$16 sps:$4 sm:$0xff]  }
 0x6a4   :  { %1409 = vmatprep.subr.bf16.mxu0 %v6395_v13  ;;  %1450 = vmatprep.subr.bf16.mxu1 %v6398_v14 }
 0x6a5   :  { %1439 = vmatprep.mubr.bf16.mxu0 %v7903_v38  ;;  %1480 = vmatprep.mubr.bf16.mxu1 %v7903_v38 }
 0x6a7   :  { %1410 = vmatpush1.bf16.msra.mxu0 %v6403_v18  ;;  %1451 = vmatpush1.bf16.msra.mxu1 %v6406_v19  ;;  %v7917_v18 = vld [vmem:[#allocation33_spill] sm:$0xff] }
 0x6a8   :  { %1411 = vmatprep.subr.bf16.mxu0 %v6409_v61  ;;  %1452 = vmatprep.subr.bf16.mxu1 %v6412_v27  ;;  %v7918_v61 = vld [vmem:[#allocation36_spill] sm:$0xff] }
 0x6ab   :  { %1412 = vmatpush1.bf16.msra.mxu0 %v6415_v41  ;;  %1453 = vmatpush1.bf16.msra.mxu1 %v6418_v54 }
 0x6ac   :  { %1413 = vmatprep.subr.bf16.mxu0 %v6421_v62  ;;  %1454 = vmatprep.subr.bf16.mxu1 %v6424_v63  ;;  %v7919_v62 = vld [vmem:[#allocation34_spill] sm:$0xff] }
 0x6af   :  { %1414 = vmatpush1.bf16.msra.mxu0 %v6427_v17  ;;  %1455 = vmatpush1.bf16.msra.mxu1 %v6430_v23  ;;  %v7920_v17 = vld [vmem:[#allocation38_spill] sm:$0xff] }
 0x6b0   :  { %1415 = vmatprep.subr.bf16.mxu0 %v6433_v24  ;;  %1456 = vmatprep.subr.bf16.mxu1 %v6484_v6 }
 0x6b3   :  { %1416 = vmatpush1.bf16.msra.mxu0 %v6437_v25  ;;  %1457 = vmatpush1.bf16.msra.mxu1 %v6488_v7 }
 0x6b4   :  { %1417 = vmatprep.subr.bf16.mxu0 %v6491_v9  ;;  %1458 = vmatprep.subr.bf16.mxu1 %v6494_v4 }
 0x6b7   :  { %1418 = vmatpush1.bf16.msra.mxu0 %v6497_v16  ;;  %1459 = vmatpush1.bf16.msra.mxu1 %v6500_v20 }
 0x6b8   :  { %1419 = vmatprep.subr.bf16.mxu0 %v6503_v12  ;;  %1460 = vmatprep.subr.bf16.mxu1 %v6506_v43 }
 0x6bb   :  { %1420 = vmatpush1.bf16.msra.mxu0 %v6509_v44  ;;  %1461 = vmatpush1.bf16.msra.mxu1 %v6512_v45 }
 0x6bc   :  { %1421 = vmatprep.subr.bf16.mxu0 %v6515_v46  ;;  %1462 = vmatprep.subr.bf16.mxu1 %v6518_v47 }
 0x6bf   :  { %1422 = vmatpush1.bf16.msra.mxu0 %v6521_v50  ;;  %1463 = vmatpush1.bf16.msra.mxu1 %v6524_v51 }
 0x6c0   :  { %1777 = vmatprep.subr.bf16.mxu0 %v5027_v5  ;;  %1850 = vmatprep.subr.bf16.mxu1 %v5030_v15  ;;  %v5055_v5 = vld [vmem:[#allocation7 + $0xa0] ss:$16 sps:$4 sm:$0xff]   ;;  %v5058_v15 = vld [vmem:[#allocation7 + $0xa8] ss:$16 sps:$4 sm:$0xff]  }
 0x775   :  { %v1321_v13 = vpop.f32.mrb[40].mxu0  ;;  %v1362_v14 = vpop.f32.mrb[40].mxu1 }
 0x776   :  { %v1369_v19 = vadd.f32 %v1321_v13, %v7917_v18  ;;  %v1371_v27 = vadd.f32 %v1362_v14, %v7918_v61  ;;  %v1323_v41 = vpop.f32.mrb[41].mxu0  ;;  %v1364_v54 = vpop.f32.mrb[41].mxu1  ;;  %v5063_v13 = vld [vmem:[#allocation7 + $0xc4] ss:$16 sps:$4 sm:$0xff]   ;;  %v5066_v14 = vld [vmem:[#allocation7 + $0xcc] ss:$16 sps:$4 sm:$0xff]  }
 0x777   :  { %v1370_v63 = vadd.f32 %v1323_v41, %v7919_v62  ;;  %v1372_v23 = vadd.f32 %v1364_v54, %v7920_v17  ;;  %v1325_v24 = vpop.f32.mrb[42].mxu0  ;;  %v1366_v25 = vpop.f32.mrb[42].mxu1  ;;  %v5061_v18 = vld [vmem:[#allocation7 + $0xc0] ss:$16 sps:$4 sm:$0xff]   ;;  %v5069_v61 = vld [vmem:[#allocation7 + $0xe4] ss:$16 sps:$4 sm:$0xff]   ;;  %v1527_v62 = vpack.c.bf16 %v6335_v60, %v6289_v11  ;;  %v1529_v17 = vpack.c.bf16 %v6583_v39, %v6537_v59 }
 0x778   :  { %v4745_v6 = vmul.f32 -1.442695, %v1369_v19  ;;  %v1326_v7 = vpop.f32.mrb[43].mxu0  ;;  %v1367_v9 = vpop.f32.mrb[43].mxu1  ;;  %v5064_v19 = vld [vmem:[#allocation7 + $0xc8] ss:$16 sps:$4 sm:$0xff]  }
 0x779   :  { %v4746_v4 = vmul.f32 -1.442695, %v1370_v63  ;;  %v4747_v16 = vmul.f32 -1.442695, %v1372_v23  ;;  %v5067_v41 = vld [vmem:[#allocation7 + $0xe0] ss:$16 sps:$4 sm:$0xff]   ;;  %v1528_v63 = vpack.c.bf16 %v6463_v2, %v6385_v10 }
 0x77a   :  { %5321 = vpow2.f32 %v4745_v6  ;;  %v5070_v54 = vld [vmem:[#allocation7 + $0xe8] ss:$16 sps:$4 sm:$0xff]   ;;  %v6645_v11 = vld [vmem:[#allocation9 + $0x4] ss:$16 sps:$4 sm:$0xff]   ;;  %v6647_v60 = vld [vmem:[#allocation9 + $0xc] ss:$16 sps:$4 sm:$0xff]  }
 0x77b   :  { %5323 = vpow2.f32 %v4746_v4  ;;  %v6649_v10 = vld [vmem:[#allocation9] ss:$16 sps:$4 sm:$0xff]   ;;  %v6651_v2 = vld [vmem:[#allocation9 + $0x8] ss:$16 sps:$4 sm:$0xff]   ;;  %v6657_v59 = vld [vmem:[#allocation9 + $0x24] ss:$16 sps:$4 sm:$0xff]  }
 0x77c   :  { %5325 = vpow2.f32 %v4747_v16  ;;  %v6659_v39 = vld [vmem:[#allocation9 + $0x2c] ss:$16 sps:$4 sm:$0xff]   ;;  %v6661_v23 = vld [vmem:[#allocation9 + $0x20] ss:$16 sps:$4 sm:$0xff]   ;;  %v6663_v24 = vld [vmem:[#allocation9 + $0x28] ss:$16 sps:$4 sm:$0xff]  }
 0x77d   :  { %5327 = vtanh.f32 %v1371_v27  ;;  %v5072_v27 = vld [vmem:[#allocation7 + $0xec] ss:$16 sps:$4 sm:$0xff]   ;;  %v6669_v25 = vld [vmem:[#allocation9 + $0x44] ss:$16 sps:$4 sm:$0xff]   ;;  %v6673_v7 = vld [vmem:[#allocation9 + $0x40] ss:$16 sps:$4 sm:$0xff]  }
 0x77e   :  { %v6671_v6 = vld [vmem:[#allocation9 + $0x4c] ss:$16 sps:$4 sm:$0xff]   ;;  %v6675_v9 = vld [vmem:[#allocation9 + $0x48] ss:$16 sps:$4 sm:$0xff]   ;;  %v6681_v4 = vld [vmem:[#allocation9 + $0x64] ss:$16 sps:$4 sm:$0xff]  }
 0x77f   :  { %v6683_v16 = vld [vmem:[#allocation9 + $0x6c] ss:$16 sps:$4 sm:$0xff]  }
 0x784   :  { %v5322_v20 = vpop.eup %5321 }
 0x785   :  { %v5324_v12 = vpop.eup %5323  ;;  %v1376_v43 = vadd.f32 1.0, %v5322_v20  ;;  %v6685_v20 = vld [vmem:[#allocation9 + $0x60] ss:$16 sps:$4 sm:$0xff]  }
 0x786   :  { %v1382_v44 = vadd.f32 1.0, %v5324_v12  ;;  %v5326_v45 = vpop.eup %5325  ;;  %v6687_v12 = vld [vmem:[#allocation9 + $0x68] ss:$16 sps:$4 sm:$0xff]  }
 0x787   :  { %5329 = vrcp.f32 %v1376_v43  ;;  %v5328_v46 = vpop.eup %5327  ;;  %v1389_v57 = vadd.f32 1.0, %v5326_v45  ;;  %v6693_v43 = vld [vmem:[#allocation9 + $0x84] ss:$16 sps:$4 sm:$0xff]   ;;  %v6697_v45 = vld [vmem:[#allocation9 + $0x80] ss:$16 sps:$4 sm:$0xff]  }
 0x788   :  { %5331 = vrcp.f32 %v1382_v44  ;;  %v6695_v44 = vld [vmem:[#allocation9 + $0x8c] ss:$16 sps:$4 sm:$0xff]  }
 0x789   :  { %5333 = vrcp.f32 %v1389_v57  ;;  %v6711_v57 = vld [vmem:[#allocation9 + $0xa8] ss:$16 sps:$4 sm:$0xff]  }
 0x791   :  { %v5330_v47 = vpop.eup %5329 }
 0x792   :  { %v5332_v50 = vpop.eup %5331  ;;  %v1393_v51 = vmul.f32 %v5330_v47, %v5328_v46  ;;  %v6699_v46 = vld [vmem:[#allocation9 + $0x88] ss:$16 sps:$4 sm:$0xff]   ;;  %v6705_v47 = vld [vmem:[#allocation9 + $0xa4] ss:$16 sps:$4 sm:$0xff]  }
 0x793   :  { %v1392_v40 = vmul.f32 %v5332_v50, %v6580_v33  ;;  %v5334_v8 = vpop.eup %5333  ;;  %v5049_v33 = vld [vmem:[#allocation7 + $0x80] ss:$16 sps:$4 sm:$0xff]   ;;  %v6707_v50 = vld [vmem:[#allocation9 + $0xac] ss:$16 sps:$4 sm:$0xff]  }
 0x795   :  { %v6624_v42 = vadd.f32 %v1393_v51, %v1392_v40  ;;  %v6709_v51 = vld [vmem:[#allocation9 + $0xa0] ss:$16 sps:$4 sm:$0xff]   ;;  %v6717_v40 = vld [vmem:[#allocation9 + $0xc4] ss:$16 sps:$4 sm:$0xff]  }
 0x797   :  { %5335 = vtanh.f32 %v6624_v42 }
 0x7a1   :  { %v5336_v37 = vpop.eup %5335 }
 0x7a2   :  { %v6627_v48 = vmul.f32 %v5336_v37, %v5334_v8  ;;  %v6719_v8 = vld [vmem:[#allocation9 + $0xcc] ss:$16 sps:$4 sm:$0xff]   ;;  %v6721_v37 = vld [vmem:[#allocation9 + $0xc0] ss:$16 sps:$4 sm:$0xff]  }
 0x7a4   :  { %v1406_v30 = vpack.c.bf16 %v6627_v48, %v6627_v48 }
 0x7a6   :  { %1440 = vmatmul.mubr.bf16.vlgmr.msra.gmra.mrb[44].mxu0 %v1406_v30  ;;  %1481 = vmatmul.mubr.bf16.vlgmr.msra.gmra.mrb[44].mxu1 %v1406_v30  ;;  %v6731_v30 = vld [vmem:[#allocation9 + $0xec] ss:$16 sps:$4 sm:$0xff]  }
 0x7a7   :  { %1778 = vmatpush1.bf16.msra.mxu0 %v5025_v0  ;;  %1851 = vmatpush1.bf16.msra.mxu1 %v5028_v26  ;;  %v6723_v0 = vld [vmem:[#allocation9 + $0xc8] ss:$16 sps:$4 sm:$0xff]   ;;  %v6729_v26 = vld [vmem:[#allocation9 + $0xe4] ss:$16 sps:$4 sm:$0xff]  }
 0x7a8   :  { %1779 = vmatprep.subr.bf16.mxu0 %v5033_v1  ;;  %1852 = vmatprep.subr.bf16.mxu1 %v5036_v21  ;;  %v6733_v1 = vld [vmem:[#allocation9 + $0xe0] ss:$16 sps:$4 sm:$0xff]   ;;  %v6735_v21 = vld [vmem:[#allocation9 + $0xe8] ss:$16 sps:$4 sm:$0xff]  }
 0x7a9   :  { %1809 = vmatprep.mubr.bf16.mxu0 %v7903_v38  ;;  %1882 = vmatprep.mubr.bf16.mxu1 %v7903_v38 }
 0x7ab   :  { %1780 = vmatpush1.bf16.msra.mxu0 %v5031_v22  ;;  %1853 = vmatpush1.bf16.msra.mxu1 %v5034_v3 }
 0x7ac   :  { %1781 = vmatprep.subr.bf16.mxu0 %v5039_v52  ;;  %1854 = vmatprep.subr.bf16.mxu1 %v5042_v53  ;;  %v7921_v52 = vld [vmem:[#allocation35_spill] sm:$0xff] }
 0x7af   :  { %1782 = vmatpush1.bf16.msra.mxu0 %v5037_v55  ;;  %1855 = vmatpush1.bf16.msra.mxu1 %v5040_v56  ;;  %v7922_v55 = vld [vmem:[#allocation39_spill] sm:$0xff] }
 0x7b0   :  { %1783 = vmatprep.subr.bf16.mxu0 %v5045_v58  ;;  %1856 = vmatprep.subr.bf16.mxu1 %v5048_v29 }
 0x7b3   :  { %1784 = vmatpush1.bf16.msra.mxu0 %v5043_v28  ;;  %1857 = vmatpush1.bf16.msra.mxu1 %v5046_v49  ;;  %v7923_v28 = vld [vmem:[#allocation37_spill] sm:$0xff] }
 0x7b4   :  { %1785 = vmatprep.subr.bf16.mxu0 %v5051_v31  ;;  %1858 = vmatprep.subr.bf16.mxu1 %v5054_v32  ;;  %v7924_v31 = vld [vmem:[#allocation40_spill] sm:$0xff] }
 0x7b7   :  { %1786 = vmatpush1.bf16.msra.mxu0 %v5049_v33  ;;  %1859 = vmatpush1.bf16.msra.mxu1 %v5052_v34 }
 0x7b8   :  { %1787 = vmatprep.subr.bf16.mxu0 %v5057_v36  ;;  %1860 = vmatprep.subr.bf16.mxu1 %v5060_v35 }
 0x7bb   :  { %1788 = vmatpush1.bf16.msra.mxu0 %v5055_v5  ;;  %1861 = vmatpush1.bf16.msra.mxu1 %v5058_v15 }
 0x7bc   :  { %1789 = vmatprep.subr.bf16.mxu0 %v5063_v13  ;;  %1862 = vmatprep.subr.bf16.mxu1 %v5066_v14 }
 0x7bf   :  { %1790 = vmatpush1.bf16.msra.mxu0 %v5061_v18  ;;  %1863 = vmatpush1.bf16.msra.mxu1 %v5064_v19 }
 0x7c0   :  { %1791 = vmatprep.subr.bf16.mxu0 %v5069_v61  ;;  %1864 = vmatprep.subr.bf16.mxu1 %v5072_v27 }
 0x7c3   :  { %1792 = vmatpush1.bf16.msra.mxu0 %v5067_v41  ;;  %1865 = vmatpush1.bf16.msra.mxu1 %v5070_v54 }
 0x7c4   :  { %2119 = vmatprep.subr.bf16.mxu0 %v6645_v11  ;;  %2160 = vmatprep.subr.bf16.mxu1 %v6647_v60 }
 0x7c6   :  { %1810 = vmatmul.mubr.bf16.vlgmr.msra.gmra.mrb[48].mxu0 %v1527_v62  ;;  %1883 = vmatmul.mubr.bf16.vlgmr.msra.gmra.mrb[48].mxu1 %v1527_v62 }
 0x7c7   :  { %1819 = vmatprep.mubr.bf16.mxu0 %v7903_v38  ;;  %1892 = vmatprep.mubr.bf16.mxu1 %v7903_v38 }
 0x7c8   :  { %2120 = vmatpush1.bf16.msra.mxu0 %v6649_v10  ;;  %2161 = vmatpush1.bf16.msra.mxu1 %v6651_v2 }
 0x7c9   :  { %2121 = vmatprep.subr.bf16.mxu0 %v6657_v59  ;;  %2162 = vmatprep.subr.bf16.mxu1 %v6659_v39 }
 0x7cc   :  { %2122 = vmatpush1.bf16.msra.mxu0 %v6661_v23  ;;  %2163 = vmatpush1.bf16.msra.mxu1 %v6663_v24 }
 0x7cd   :  { %2123 = vmatprep.subr.bf16.mxu0 %v6669_v25  ;;  %2164 = vmatprep.subr.bf16.mxu1 %v6671_v6 }
 0x7ce   :  { %1820 = vmatmul.mubr.bf16.gmra.mrb[52].mxu0 %v1528_v63  ;;  %1893 = vmatmul.mubr.bf16.gmra.mrb[52].mxu1 %v1528_v63 }
 0x7cf   :  { %1829 = vmatprep.mubr.bf16.mxu0 %v7903_v38  ;;  %1902 = vmatprep.mubr.bf16.mxu1 %v7903_v38 }
 0x7d0   :  { %2124 = vmatpush1.bf16.msra.mxu0 %v6673_v7  ;;  %2165 = vmatpush1.bf16.msra.mxu1 %v6675_v9 }
 0x7d1   :  { %2125 = vmatprep.subr.bf16.mxu0 %v6681_v4  ;;  %2166 = vmatprep.subr.bf16.mxu1 %v6683_v16 }
 0x7d4   :  { %2126 = vmatpush1.bf16.msra.mxu0 %v6685_v20  ;;  %2167 = vmatpush1.bf16.msra.mxu1 %v6687_v12 }
 0x7d5   :  { %2127 = vmatprep.subr.bf16.mxu0 %v6693_v43  ;;  %2168 = vmatprep.subr.bf16.mxu1 %v6695_v44 }
 0x7d6   :  { %1830 = vmatmul.mubr.bf16.gmra.mrb[56].mxu0 %v1529_v17  ;;  %1903 = vmatmul.mubr.bf16.gmra.mrb[56].mxu1 %v1529_v17 }
 0x7d7   :  { %1839 = vmatprep.mubr.bf16.mxu0 %v7903_v38  ;;  %1912 = vmatprep.mubr.bf16.mxu1 %v7903_v38 }
 0x7d8   :  { %2128 = vmatpush1.bf16.msra.mxu0 %v6697_v45  ;;  %2169 = vmatpush1.bf16.msra.mxu1 %v6699_v46 }
 0x7d9   :  { %2129 = vmatprep.subr.bf16.mxu0 %v6705_v47  ;;  %2170 = vmatprep.subr.bf16.mxu1 %v6707_v50 }
 0x7dc   :  { %2130 = vmatpush1.bf16.msra.mxu0 %v6709_v51  ;;  %2171 = vmatpush1.bf16.msra.mxu1 %v6711_v57 }
 0x7dd   :  { %2131 = vmatprep.subr.bf16.mxu0 %v6717_v40  ;;  %2172 = vmatprep.subr.bf16.mxu1 %v6719_v8 }
 0x7e0   :  { %2132 = vmatpush1.bf16.msra.mxu0 %v6721_v37  ;;  %2173 = vmatpush1.bf16.msra.mxu1 %v6723_v0 }
 0x7e1   :  { %2133 = vmatprep.subr.bf16.mxu0 %v6729_v26  ;;  %2174 = vmatprep.subr.bf16.mxu1 %v6731_v30 }
 0x7e4   :  { %2134 = vmatpush1.bf16.msra.mxu0 %v6733_v1  ;;  %2175 = vmatpush1.bf16.msra.mxu1 %v6735_v21 }
 0x7e5   :  { %2235 = vmatprep.subr.bf16.mxu0 %v6645_v11  ;;  %2276 = vmatprep.subr.bf16.mxu1 %v6647_v60 }
 0x879   :  { %v1441_v22 = vpop.f32.mrb[44].mxu0  ;;  %v1482_v3 = vpop.f32.mrb[44].mxu1 }
 0x87a   :  { %v1489_v53 = vadd.f32 %v1441_v22, %v7921_v52  ;;  %v1491_v56 = vadd.f32 %v1482_v3, %v7922_v55  ;;  %v1443_v58 = vpop.f32.mrb[45].mxu0  ;;  %v1484_v29 = vpop.f32.mrb[45].mxu1 }
 0x87b   :  { %v1490_v49 = vadd.f32 %v1443_v58, %v7923_v28  ;;  %v1492_v32 = vadd.f32 %v1484_v29, %v7924_v31  ;;  %v1445_v33 = vpop.f32.mrb[46].mxu0  ;;  %v1486_v34 = vpop.f32.mrb[46].mxu1 }
 0x87c   :  { %v4748_v36 = vmul.f32 -1.442695, %v1489_v53  ;;  %v1446_v35 = vpop.f32.mrb[47].mxu0  ;;  %v1487_v5 = vpop.f32.mrb[47].mxu1 }
 0x87d   :  { %v4749_v15 = vmul.f32 -1.442695, %v1490_v49  ;;  %v4750_v13 = vmul.f32 -1.442695, %v1492_v32 }
 0x87e   :  { %5337 = vpow2.f32 %v4748_v36 }
 0x87f   :  { %5339 = vpow2.f32 %v4749_v15 }
 0x880   :  { %5341 = vpow2.f32 %v4750_v13 }
 0x881   :  { %5343 = vtanh.f32 %v1491_v56 }
 0x888   :  { %v5338_v14 = vpop.eup %5337 }
 0x889   :  { %v5340_v18 = vpop.eup %5339  ;;  %v1496_v19 = vadd.f32 1.0, %v5338_v14 }
 0x88a   :  { %v1502_v61 = vadd.f32 1.0, %v5340_v18  ;;  %v5342_v27 = vpop.eup %5341 }
 0x88b   :  { %5345 = vrcp.f32 %v1496_v19  ;;  %v5344_v41 = vpop.eup %5343  ;;  %v1509_v17 = vadd.f32 1.0, %v5342_v27 }
 0x88c   :  { %5347 = vrcp.f32 %v1502_v61 }
 0x88d   :  { %5349 = vrcp.f32 %v1509_v17  ;;  %v1595_v17 = vld [vmem:[%s7861_s6] sm:$0xf] }
 0x895   :  { %v5346_v54 = vpop.eup %5345 }
 0x896   :  { %v5348_v62 = vpop.eup %5347  ;;  %v1513_v63 = vmul.f32 %v5346_v54, %v5344_v41 }
 0x897   :  { %v1512_v22 = vmul.f32 %v5348_v62, %v6624_v42  ;;  %v5350_v35 = vpop.eup %5349 }
 0x899   :  { %v6748_v3 = vpop.f32.mrb[48].mxu0  ;;  %v6750_v52 = vpop.f32.mrb[48].mxu1  ;;  %v1514_v53 = vadd.f32 %v1513_v63, %v1512_v22 }
 0x89a   :  { %v6752_v55 = vpop.f32.mrb[49].mxu0  ;;  %v6754_v56 = vpop.f32.mrb[49].mxu1 }
 0x89b   :  { %v6756_v58 = vpop.f32.mrb[50].mxu0  ;;  %v6758_v29 = vpop.f32.mrb[50].mxu1  ;;  %5351 = vtanh.f32 %v1514_v53 }
 0x89c   :  { %v6760_v28 = vpop.f32.mrb[51].mxu0  ;;  %v6762_v49 = vpop.f32.mrb[51].mxu1 }
 0x8a1   :  { %v6764_v42 = vpop.f32.mrb[52].mxu0  ;;  %v6766_v31 = vpop.f32.mrb[52].mxu1 }
 0x8a2   :  { %7925 = vst [vmem:[#allocation22_spill] sm:$0xff] %v6766_v31  ;;  %v6768_v32 = vpop.f32.mrb[53].mxu0  ;;  %v6770_v33 = vpop.f32.mrb[53].mxu1 }
 0x8a3   :  { %7926 = vst [vmem:[#allocation20_spill] sm:$0xff] %v6768_v32  ;;  %7927 = vst [vmem:[#allocation23_spill] sm:$0xff] %v6770_v33  ;;  %v6772_v34 = vpop.f32.mrb[54].mxu0  ;;  %v6774_v36 = vpop.f32.mrb[54].mxu1 }
 0x8a4   :  { %7928 = vst [vmem:[#allocation21_spill] sm:$0xff] %v6772_v34  ;;  %7929 = vst [vmem:[#allocation24_spill] sm:$0xff] %v6774_v36  ;;  %v6776_v5 = vpop.f32.mrb[55].mxu0  ;;  %v6778_v15 = vpop.f32.mrb[55].mxu1 }
 0x8a5   :  { %7930 = vst [vmem:[#allocation25_spill] sm:$0xff] %v6776_v5  ;;  %7931 = vst [vmem:[#allocation28_spill] sm:$0xff] %v6778_v15  ;;  %v5352_v13 = vpop.eup %5351 }
 0x8a6   :  { %v1516_v14 = vmul.f32 %v5352_v13, %v5350_v35 }
 0x8a8   :  { %v1530_v18 = vpack.c.bf16 %v1516_v14, %v6627_v48 }
 0x8a9   :  { %v6781_v19 = vpop.f32.mrb[56].mxu0  ;;  %v6783_v61 = vpop.f32.mrb[56].mxu1 }
 0x8aa   :  { %7932 = vst [vmem:[#allocation26_spill] sm:$0xff] %v6781_v19  ;;  %7933 = vst [vmem:[#allocation30_spill] sm:$0xff] %v6783_v61  ;;  %v6785_v27 = vpop.f32.mrb[57].mxu0  ;;  %v6787_v41 = vpop.f32.mrb[57].mxu1  ;;  %1840 = vmatmul.mubr.bf16.gmra.mrb[60].mxu0 %v1530_v18  ;;  %1913 = vmatmul.mubr.bf16.gmra.mrb[60].mxu1 %v1530_v18 }
 0x8ab   :  { %7934 = vst [vmem:[#allocation27_spill] sm:$0xff] %v6785_v27  ;;  %7935 = vst [vmem:[#allocation31_spill] sm:$0xff] %v6787_v41  ;;  %v6789_v54 = vpop.f32.mrb[58].mxu0  ;;  %v6791_v62 = vpop.f32.mrb[58].mxu1  ;;  %2151 = vmatprep.mubr.bf16.mxu0 %v7903_v38  ;;  %2192 = vmatprep.mubr.bf16.mxu1 %v7903_v38 }
 0x8ac   :  { %7936 = vst [vmem:[#allocation29_spill] sm:$0xff] %v6789_v54  ;;  %7937 = vst [vmem:[#allocation32_spill] sm:$0xff] %v6791_v62  ;;  %v6795_v63 = vpop.f32.mrb[59].mxu0  ;;  %v6797_v48 = vpop.f32.mrb[59].mxu1  ;;  %v7947_v62 = vld [vmem:[#allocation17_spill] sm:$0xff] }
 0x8ad   :  { %7938 = vst [vmem:[#allocation33_spill] sm:$0xff] %v6795_v63  ;;  %7939 = vst [vmem:[#allocation36_spill] sm:$0xff] %v6797_v48  ;;  %v7946_v48 = vld [vmem:[#allocation16_spill] sm:$0xff]  ;;  %v6854_v54 = vrot.slane %v1595_v17, %v7947_v62 }
 0x8ae   :  { %v6851_v63 = vrot.slane %v1595_v17, %v7946_v48 }
 0x8af   :  { %v1885_v48 = vadd.f32 %v6750_v52, %v6854_v54 }
 0x8b2   :  { %2152 = vmatmul.mubr.bf16.vlgmr.msra.gmra.mrb[64].mxu0 %v7903_v38  ;;  %2193 = vmatmul.mubr.bf16.vlgmr.msra.gmra.mrb[64].mxu1 %v7903_v38 }
 0x8b3   :  { %2236 = vmatpush1.bf16.msra.mxu0 %v6649_v10  ;;  %2277 = vmatpush1.bf16.msra.mxu1 %v6651_v2 }
 0x8b4   :  { %2237 = vmatprep.subr.bf16.mxu0 %v6657_v59  ;;  %2278 = vmatprep.subr.bf16.mxu1 %v6659_v39 }
 0x8b5   :  { %2267 = vmatprep.mubr.bf16.mxu0 %v7903_v38  ;;  %2308 = vmatprep.mubr.bf16.mxu1 %v7903_v38 }
 0x8b7   :  { %2238 = vmatpush1.bf16.msra.mxu0 %v6661_v23  ;;  %2279 = vmatpush1.bf16.msra.mxu1 %v6663_v24 }
 0x8b8   :  { %2239 = vmatprep.subr.bf16.mxu0 %v6669_v25  ;;  %2280 = vmatprep.subr.bf16.mxu1 %v6671_v6 }
 0x8bb   :  { %2240 = vmatpush1.bf16.msra.mxu0 %v6673_v7  ;;  %2281 = vmatpush1.bf16.msra.mxu1 %v6675_v9 }
 0x8bc   :  { %2241 = vmatprep.subr.bf16.mxu0 %v6681_v4  ;;  %2282 = vmatprep.subr.bf16.mxu1 %v6683_v16 }
 0x8bf   :  { %2242 = vmatpush1.bf16.msra.mxu0 %v6685_v20  ;;  %2283 = vmatpush1.bf16.msra.mxu1 %v6687_v12 }
 0x8c0   :  { %2243 = vmatprep.subr.bf16.mxu0 %v6693_v43  ;;  %2284 = vmatprep.subr.bf16.mxu1 %v6695_v44 }
 0x8c3   :  { %2244 = vmatpush1.bf16.msra.mxu0 %v6697_v45  ;;  %2285 = vmatpush1.bf16.msra.mxu1 %v6699_v46 }
 0x8c4   :  { %2245 = vmatprep.subr.bf16.mxu0 %v6705_v47  ;;  %2286 = vmatprep.subr.bf16.mxu1 %v6707_v50 }
 0x8c7   :  { %2246 = vmatpush1.bf16.msra.mxu0 %v6709_v51  ;;  %2287 = vmatpush1.bf16.msra.mxu1 %v6711_v57 }
 0x8c8   :  { %2247 = vmatprep.subr.bf16.mxu0 %v6717_v40  ;;  %2288 = vmatprep.subr.bf16.mxu1 %v6719_v8 }
 0x8cb   :  { %2248 = vmatpush1.bf16.msra.mxu0 %v6721_v37  ;;  %2289 = vmatpush1.bf16.msra.mxu1 %v6723_v0 }
 0x8cc   :  { %2249 = vmatprep.subr.bf16.mxu0 %v6729_v26  ;;  %2290 = vmatprep.subr.bf16.mxu1 %v6731_v30 }
 0x8cf   :  { %2250 = vmatpush1.bf16.msra.mxu0 %v6733_v1  ;;  %2291 = vmatpush1.bf16.msra.mxu1 %v6735_v21 }
 0x8d0   :  { %2351 = vmatprep.subr.bf16.mxu0 %v6645_v11  ;;  %2392 = vmatprep.subr.bf16.mxu1 %v6647_v60 }
 0x97d   :  { %v6838_v22 = vpop.f32.mrb[60].mxu0  ;;  %v6840_v53 = vpop.f32.mrb[60].mxu1 }
 0x97e   :  { %7940 = vst [vmem:[#allocation34_spill] sm:$0xff] %v6838_v22  ;;  %7941 = vst [vmem:[#allocation38_spill] sm:$0xff] %v6840_v53  ;;  %v6842_v35 = vpop.f32.mrb[61].mxu0  ;;  %v6844_v13 = vpop.f32.mrb[61].mxu1  ;;  %v7950_v22 = vld [vmem:[#allocation18_spill] sm:$0xff] }
 0x97f   :  { %7942 = vst [vmem:[#allocation35_spill] sm:$0xff] %v6842_v35  ;;  %7943 = vst [vmem:[#allocation39_spill] sm:$0xff] %v6844_v13  ;;  %v6846_v14 = vpop.f32.mrb[62].mxu0  ;;  %v6848_v18 = vpop.f32.mrb[62].mxu1  ;;  %v6861_v53 = vrot.slane %v1595_v17, %v7950_v22  ;;  %v7951_v35 = vld [vmem:[#allocation19_spill] sm:$0xff] }
 0x980   :  { %7944 = vst [vmem:[#allocation37_spill] sm:$0xff] %v6846_v14  ;;  %7945 = vst [vmem:[#allocation40_spill] sm:$0xff] %v6848_v18  ;;  %v6856_v41 = vpop.f32.mrb[63].mxu0  ;;  %v6858_v27 = vpop.f32.mrb[63].mxu1  ;;  %v6864_v61 = vrot.slane %v1595_v17, %v7951_v35  ;;  %v1812_v14 = vadd.f32 %v6748_v3, %v6851_v63 }
 0x981   :  { %7948 = vst [vmem:[#allocation41_spill] sm:$0xff] %v6856_v41  ;;  %7949 = vst [vmem:[#allocation42_spill] sm:$0xff] %v6858_v27  ;;  %v1814_v62 = vadd.f32 %v6752_v55, %v6861_v53 }
 0x982   :  { %v1887_v41 = vadd.f32 %v6754_v56, %v6864_v61 }
 0x985   :  { %v2153_v18 = vpop.f32.mrb[64].mxu0  ;;  %v2194_v27 = vpop.f32.mrb[64].mxu1 }
 0x986   :  { %v2201_v13 = vadd.f32 %v2153_v18, %v1812_v14  ;;  %v2203_v22 = vadd.f32 %v2194_v27, %v1885_v48  ;;  %v2155_v19 = vpop.f32.mrb[65].mxu0  ;;  %v2196_v15 = vpop.f32.mrb[65].mxu1  ;;  %v1891_v18 = vadd.f32 %v6762_v49, %v6864_v61 }
 0x987   :  { %v2202_v17 = vadd.f32 %v2155_v19, %v1814_v62  ;;  %v2204_v35 = vadd.f32 %v2196_v15, %v1887_v41  ;;  %v2157_v5 = vpop.f32.mrb[66].mxu0  ;;  %v2198_v36 = vpop.f32.mrb[66].mxu1 }
 0x988   :  { %v4815_v3 = vmul.f32 -1.442695, %v2201_v13  ;;  %v2158_v34 = vpop.f32.mrb[67].mxu0  ;;  %v2199_v33 = vpop.f32.mrb[67].mxu1  ;;  %v1818_v13 = vadd.f32 %v6760_v28, %v6861_v53 }
 0x989   :  { %v4816_v52 = vmul.f32 -1.442695, %v2202_v17  ;;  %v4817_v55 = vmul.f32 -1.442695, %v2204_v35  ;;  %v1889_v35 = vadd.f32 %v6758_v29, %v6854_v54 }
 0x98a   :  { %5353 = vpow2.f32 %v4815_v3 }
 0x98b   :  { %5355 = vpow2.f32 %v4816_v52 }
 0x98c   :  { %5357 = vpow2.f32 %v4817_v55 }
 0x98d   :  { %5359 = vtanh.f32 %v2203_v22  ;;  %v1816_v22 = vadd.f32 %v6756_v58, %v6851_v63 }
 0x994   :  { %v5354_v32 = vpop.eup %5353 }
 0x995   :  { %v5356_v31 = vpop.eup %5355  ;;  %v2208_v56 = vadd.f32 1.0, %v5354_v32 }
 0x996   :  { %v2214_v14 = vadd.f32 1.0, %v5356_v31  ;;  %v5358_v27 = vpop.eup %5357 }
 0x997   :  { %5361 = vrcp.f32 %v2208_v56  ;;  %v5360_v19 = vpop.eup %5359  ;;  %v2221_v41 = vadd.f32 1.0, %v5358_v27 }
 0x998   :  { %5363 = vrcp.f32 %v2214_v14 }
 0x999   :  { %5365 = vrcp.f32 %v2221_v41 }
 0x9a1   :  { %v5362_v15 = vpop.eup %5361 }
 0x9a2   :  { %v5364_v5 = vpop.eup %5363  ;;  %v2225_v36 = vmul.f32 %v5362_v15, %v5360_v19 }
 0x9a3   :  { %v2224_v34 = vmul.f32 0.0, %v5364_v5  ;;  %v5366_v62 = vpop.eup %5365 }
 0x9a5   :  { %v6874_v33 = vadd.f32 %v2225_v36, %v2224_v34 }
 0x9a7   :  { %5367 = vtanh.f32 %v6874_v33 }
 0x9b1   :  { %v5368_v48 = vpop.eup %5367 }
 0x9b2   :  { %v6877_v32 = vmul.f32 %v5368_v48, %v5366_v62 }
 0x9b4   :  { %v2234_v31 = vpack.c.bf16 %v6877_v32, %v6877_v32 }
 0x9b6   :  { %2268 = vmatmul.mubr.bf16.vlgmr.msra.gmra.mrb[68].mxu0 %v2234_v31  ;;  %2309 = vmatmul.mubr.bf16.vlgmr.msra.gmra.mrb[68].mxu1 %v2234_v31 }
 0x9b7   :  { %2352 = vmatpush1.bf16.msra.mxu0 %v6649_v10  ;;  %2393 = vmatpush1.bf16.msra.mxu1 %v6651_v2 }
 0x9b8   :  { %2353 = vmatprep.subr.bf16.mxu0 %v6657_v59  ;;  %2394 = vmatprep.subr.bf16.mxu1 %v6659_v39 }
 0x9b9   :  { %2383 = vmatprep.mubr.bf16.mxu0 %v7903_v38  ;;  %2424 = vmatprep.mubr.bf16.mxu1 %v7903_v38 }
 0x9bb   :  { %2354 = vmatpush1.bf16.msra.mxu0 %v6661_v23  ;;  %2395 = vmatpush1.bf16.msra.mxu1 %v6663_v24 }
 0x9bc   :  { %2355 = vmatprep.subr.bf16.mxu0 %v6669_v25  ;;  %2396 = vmatprep.subr.bf16.mxu1 %v6671_v6 }
 0x9bf   :  { %2356 = vmatpush1.bf16.msra.mxu0 %v6673_v7  ;;  %2397 = vmatpush1.bf16.msra.mxu1 %v6675_v9 }
 0x9c0   :  { %2357 = vmatprep.subr.bf16.mxu0 %v6681_v4  ;;  %2398 = vmatprep.subr.bf16.mxu1 %v6683_v16 }
 0x9c3   :  { %2358 = vmatpush1.bf16.msra.mxu0 %v6685_v20  ;;  %2399 = vmatpush1.bf16.msra.mxu1 %v6687_v12 }
 0x9c4   :  { %2359 = vmatprep.subr.bf16.mxu0 %v6693_v43  ;;  %2400 = vmatprep.subr.bf16.mxu1 %v6695_v44 }
 0x9c7   :  { %2360 = vmatpush1.bf16.msra.mxu0 %v6697_v45  ;;  %2401 = vmatpush1.bf16.msra.mxu1 %v6699_v46 }
 0x9c8   :  { %2361 = vmatprep.subr.bf16.mxu0 %v6705_v47  ;;  %2402 = vmatprep.subr.bf16.mxu1 %v6707_v50 }
 0x9cb   :  { %2362 = vmatpush1.bf16.msra.mxu0 %v6709_v51  ;;  %2403 = vmatpush1.bf16.msra.mxu1 %v6711_v57 }
 0x9cc   :  { %2363 = vmatprep.subr.bf16.mxu0 %v6717_v40  ;;  %2404 = vmatprep.subr.bf16.mxu1 %v6719_v8 }
 0x9cf   :  { %2364 = vmatpush1.bf16.msra.mxu0 %v6721_v37  ;;  %2405 = vmatpush1.bf16.msra.mxu1 %v6723_v0 }
 0x9d0   :  { %2365 = vmatprep.subr.bf16.mxu0 %v6729_v26  ;;  %2406 = vmatprep.subr.bf16.mxu1 %v6731_v30 }
 0x9d3   :  { %2366 = vmatpush1.bf16.msra.mxu0 %v6733_v1  ;;  %2407 = vmatpush1.bf16.msra.mxu1 %v6735_v21 }
 0x9d4   :  { %2467 = vmatprep.subr.bf16.mxu0 %v6645_v11  ;;  %2508 = vmatprep.subr.bf16.mxu1 %v6647_v60 }
 0xa89   :  { %v2269_v17 = vpop.f32.mrb[68].mxu0  ;;  %v2310_v3 = vpop.f32.mrb[68].mxu1 }
 0xa8a   :  { %v2317_v52 = vadd.f32 %v2269_v17, %v1816_v22  ;;  %v2319_v55 = vadd.f32 %v2310_v3, %v1889_v35  ;;  %v2271_v56 = vpop.f32.mrb[69].mxu0  ;;  %v2312_v14 = vpop.f32.mrb[69].mxu1 }
 0xa8b   :  { %v2318_v27 = vadd.f32 %v2271_v56, %v1818_v13  ;;  %v2320_v19 = vadd.f32 %v2312_v14, %v1891_v18  ;;  %v2273_v15 = vpop.f32.mrb[70].mxu0  ;;  %v2314_v5 = vpop.f32.mrb[70].mxu1 }
 0xa8c   :  { %v4818_v58 = vmul.f32 -1.442695, %v2317_v52  ;;  %v2274_v36 = vpop.f32.mrb[71].mxu0  ;;  %v2315_v41 = vpop.f32.mrb[71].mxu1  ;;  %v7953_v5 = vld [vmem:[#allocation20_spill] sm:$0xff] }
 0xa8d   :  { %v4819_v29 = vmul.f32 -1.442695, %v2318_v27  ;;  %v4820_v28 = vmul.f32 -1.442695, %v2320_v19  ;;  %v7952_v19 = vld [vmem:[#allocation22_spill] sm:$0xff]  ;;  %v7954_v36 = vld [vmem:[#allocation23_spill] sm:$0xff] }
 0xa8e   :  { %5369 = vpow2.f32 %v4818_v58  ;;  %v1895_v15 = vadd.f32 %v7952_v19, %v6854_v54  ;;  %v1824_v58 = vadd.f32 %v7953_v5, %v6861_v53  ;;  %v1897_v41 = vadd.f32 %v7954_v36, %v6864_v61 }
 0xa8f   :  { %5371 = vpow2.f32 %v4819_v29 }
 0xa90   :  { %5373 = vpow2.f32 %v4820_v28 }
 0xa91   :  { %5375 = vtanh.f32 %v2319_v55 }
 0xa98   :  { %v5370_v34 = vpop.eup %5369 }
 0xa99   :  { %v5372_v62 = vpop.eup %5371  ;;  %v2324_v49 = vadd.f32 1.0, %v5370_v34 }
 0xa9a   :  { %v2330_v48 = vadd.f32 1.0, %v5372_v62  ;;  %v5374_v31 = vpop.eup %5373 }
 0xa9b   :  { %5377 = vrcp.f32 %v2324_v49  ;;  %v5376_v22 = vpop.eup %5375  ;;  %v2337_v17 = vadd.f32 1.0, %v5374_v31 }
 0xa9c   :  { %5379 = vrcp.f32 %v2330_v48 }
 0xa9d   :  { %5381 = vrcp.f32 %v2337_v17 }
 0xaa5   :  { %v5378_v35 = vpop.eup %5377 }
 0xaa6   :  { %v5380_v13 = vpop.eup %5379  ;;  %v2341_v18 = vmul.f32 %v5378_v35, %v5376_v22 }
 0xaa7   :  { %v2340_v3 = vmul.f32 %v5380_v13, %v6874_v33  ;;  %v5382_v56 = vpop.eup %5381  ;;  %v1822_v33 = vadd.f32 %v6764_v42, %v6851_v63 }
 0xaa9   :  { %v6924_v52 = vadd.f32 %v2341_v18, %v2340_v3 }
 0xaab   :  { %5383 = vtanh.f32 %v6924_v52 }
 0xab5   :  { %v5384_v14 = vpop.eup %5383 }
 0xab6   :  { %v6927_v27 = vmul.f32 %v5384_v14, %v5382_v56 }
 0xab8   :  { %v2350_v55 = vpack.c.bf16 %v6927_v27, %v6927_v27 }
 0xaba   :  { %2384 = vmatmul.mubr.bf16.vlgmr.msra.gmra.mrb[72].mxu0 %v2350_v55  ;;  %2425 = vmatmul.mubr.bf16.vlgmr.msra.gmra.mrb[72].mxu1 %v2350_v55 }
 0xabb   :  { %2468 = vmatpush1.bf16.msra.mxu0 %v6649_v10  ;;  %2509 = vmatpush1.bf16.msra.mxu1 %v6651_v2 }
 0xabc   :  { %2469 = vmatprep.subr.bf16.mxu0 %v6657_v59  ;;  %2510 = vmatprep.subr.bf16.mxu1 %v6659_v39 }
 0xabd   :  { %2499 = vmatprep.mubr.bf16.mxu0 %v7903_v38  ;;  %2540 = vmatprep.mubr.bf16.mxu1 %v7903_v38 }
 0xabf   :  { %2470 = vmatpush1.bf16.msra.mxu0 %v6661_v23  ;;  %2511 = vmatpush1.bf16.msra.mxu1 %v6663_v24 }
 0xac0   :  { %2471 = vmatprep.subr.bf16.mxu0 %v6669_v25  ;;  %2512 = vmatprep.subr.bf16.mxu1 %v6671_v6 }
 0xac3   :  { %2472 = vmatpush1.bf16.msra.mxu0 %v6673_v7  ;;  %2513 = vmatpush1.bf16.msra.mxu1 %v6675_v9 }
 0xac4   :  { %2473 = vmatprep.subr.bf16.mxu0 %v6681_v4  ;;  %2514 = vmatprep.subr.bf16.mxu1 %v6683_v16 }
 0xac7   :  { %2474 = vmatpush1.bf16.msra.mxu0 %v6685_v20  ;;  %2515 = vmatpush1.bf16.msra.mxu1 %v6687_v12 }
 0xac8   :  { %2475 = vmatprep.subr.bf16.mxu0 %v6693_v43  ;;  %2516 = vmatprep.subr.bf16.mxu1 %v6695_v44 }
 0xacb   :  { %2476 = vmatpush1.bf16.msra.mxu0 %v6697_v45  ;;  %2517 = vmatpush1.bf16.msra.mxu1 %v6699_v46 }
 0xacc   :  { %2477 = vmatprep.subr.bf16.mxu0 %v6705_v47  ;;  %2518 = vmatprep.subr.bf16.mxu1 %v6707_v50 }
 0xacf   :  { %2478 = vmatpush1.bf16.msra.mxu0 %v6709_v51  ;;  %2519 = vmatpush1.bf16.msra.mxu1 %v6711_v57 }
 0xad0   :  { %2479 = vmatprep.subr.bf16.mxu0 %v6717_v40  ;;  %2520 = vmatprep.subr.bf16.mxu1 %v6719_v8 }
 0xad3   :  { %2480 = vmatpush1.bf16.msra.mxu0 %v6721_v37  ;;  %2521 = vmatpush1.bf16.msra.mxu1 %v6723_v0 }
 0xad4   :  { %2481 = vmatprep.subr.bf16.mxu0 %v6729_v26  ;;  %2522 = vmatprep.subr.bf16.mxu1 %v6731_v30 }
 0xad7   :  { %2482 = vmatpush1.bf16.msra.mxu0 %v6733_v1  ;;  %2523 = vmatpush1.bf16.msra.mxu1 %v6735_v21 }
 0xad8   :  { %2583 = vmatprep.subr.bf16.mxu0 %v6645_v11  ;;  %2624 = vmatprep.subr.bf16.mxu1 %v6647_v60 }
 0xb8d   :  { %v2385_v29 = vpop.f32.mrb[72].mxu0  ;;  %v2426_v28 = vpop.f32.mrb[72].mxu1 }
 0xb8e   :  { %v2433_v34 = vadd.f32 %v2385_v29, %v1822_v33  ;;  %v2435_v62 = vadd.f32 %v2426_v28, %v1895_v15  ;;  %v2387_v49 = vpop.f32.mrb[73].mxu0  ;;  %v2428_v48 = vpop.f32.mrb[73].mxu1 }
 0xb8f   :  { %v2434_v31 = vadd.f32 %v2387_v49, %v1824_v58  ;;  %v2436_v22 = vadd.f32 %v2428_v48, %v1897_v41  ;;  %v2389_v35 = vpop.f32.mrb[74].mxu0  ;;  %v2430_v13 = vpop.f32.mrb[74].mxu1 }
 0xb90   :  { %v4821_v42 = vmul.f32 -1.442695, %v2433_v34  ;;  %v2390_v18 = vpop.f32.mrb[75].mxu0  ;;  %v2431_v17 = vpop.f32.mrb[75].mxu1  ;;  %v7956_v35 = vld [vmem:[#allocation24_spill] sm:$0xff] }
 0xb91   :  { %v4822_v3 = vmul.f32 -1.442695, %v2434_v31  ;;  %v4823_v56 = vmul.f32 -1.442695, %v2436_v22  ;;  %v1899_v13 = vadd.f32 %v7956_v35, %v6854_v54  ;;  %v7958_v17 = vld [vmem:[#allocation28_spill] sm:$0xff] }
 0xb92   :  { %5385 = vpow2.f32 %v4821_v42  ;;  %v7957_v42 = vld [vmem:[#allocation25_spill] sm:$0xff] }
 0xb93   :  { %5387 = vpow2.f32 %v4822_v3  ;;  %v1828_v18 = vadd.f32 %v7957_v42, %v6861_v53  ;;  %v1901_v3 = vadd.f32 %v7958_v17, %v6864_v61 }
 0xb94   :  { %5389 = vpow2.f32 %v4823_v56 }
 0xb95   :  { %5391 = vtanh.f32 %v2435_v62 }
 0xb9c   :  { %v5386_v14 = vpop.eup %5385 }
 0xb9d   :  { %v5388_v55 = vpop.eup %5387  ;;  %v2440_v19 = vadd.f32 1.0, %v5386_v14 }
 0xb9e   :  { %v2446_v33 = vadd.f32 1.0, %v5388_v55  ;;  %v5390_v15 = vpop.eup %5389 }
 0xb9f   :  { %5393 = vrcp.f32 %v2440_v19  ;;  %v5392_v5 = vpop.eup %5391  ;;  %v2453_v29 = vadd.f32 1.0, %v5390_v15 }
 0xba0   :  { %5395 = vrcp.f32 %v2446_v33 }
 0xba1   :  { %5397 = vrcp.f32 %v2453_v29 }
 0xba9   :  { %v5394_v58 = vpop.eup %5393 }
 0xbaa   :  { %v5396_v36 = vpop.eup %5395  ;;  %v2457_v41 = vmul.f32 %v5394_v58, %v5392_v5 }
 0xbab   :  { %v2456_v28 = vmul.f32 %v5396_v36, %v6924_v52  ;;  %v5398_v49 = vpop.eup %5397  ;;  %v7955_v52 = vld [vmem:[#allocation21_spill] sm:$0xff] }
 0xbac   :  { %v1826_v22 = vadd.f32 %v7955_v52, %v6851_v63 }
 0xbad   :  { %v6974_v34 = vadd.f32 %v2457_v41, %v2456_v28 }
 0xbaf   :  { %5399 = vtanh.f32 %v6974_v34 }
 0xbb9   :  { %v5400_v48 = vpop.eup %5399 }
 0xbba   :  { %v6977_v31 = vmul.f32 %v5400_v48, %v5398_v49 }
 0xbbc   :  { %v2466_v62 = vpack.c.bf16 %v6977_v31, %v6977_v31 }
 0xbbe   :  { %2500 = vmatmul.mubr.bf16.vlgmr.msra.gmra.mrb[76].mxu0 %v2466_v62  ;;  %2541 = vmatmul.mubr.bf16.vlgmr.msra.gmra.mrb[76].mxu1 %v2466_v62 }
 0xbbf   :  { %2584 = vmatpush1.bf16.msra.mxu0 %v6649_v10  ;;  %2625 = vmatpush1.bf16.msra.mxu1 %v6651_v2 }
 0xbc0   :  { %2585 = vmatprep.subr.bf16.mxu0 %v6657_v59  ;;  %2626 = vmatprep.subr.bf16.mxu1 %v6659_v39 }
 0xbc1   :  { %2615 = vmatprep.mubr.bf16.mxu0 %v7903_v38  ;;  %2656 = vmatprep.mubr.bf16.mxu1 %v7903_v38 }
 0xbc3   :  { %2586 = vmatpush1.bf16.msra.mxu0 %v6661_v23  ;;  %2627 = vmatpush1.bf16.msra.mxu1 %v6663_v24 }
 0xbc4   :  { %2587 = vmatprep.subr.bf16.mxu0 %v6669_v25  ;;  %2628 = vmatprep.subr.bf16.mxu1 %v6671_v6 }
 0xbc7   :  { %2588 = vmatpush1.bf16.msra.mxu0 %v6673_v7  ;;  %2629 = vmatpush1.bf16.msra.mxu1 %v6675_v9 }
 0xbc8   :  { %2589 = vmatprep.subr.bf16.mxu0 %v6681_v4  ;;  %2630 = vmatprep.subr.bf16.mxu1 %v6683_v16 }
 0xbcb   :  { %2590 = vmatpush1.bf16.msra.mxu0 %v6685_v20  ;;  %2631 = vmatpush1.bf16.msra.mxu1 %v6687_v12 }
 0xbcc   :  { %2591 = vmatprep.subr.bf16.mxu0 %v6693_v43  ;;  %2632 = vmatprep.subr.bf16.mxu1 %v6695_v44 }
 0xbcf   :  { %2592 = vmatpush1.bf16.msra.mxu0 %v6697_v45  ;;  %2633 = vmatpush1.bf16.msra.mxu1 %v6699_v46 }
 0xbd0   :  { %2593 = vmatprep.subr.bf16.mxu0 %v6705_v47  ;;  %2634 = vmatprep.subr.bf16.mxu1 %v6707_v50 }
 0xbd3   :  { %2594 = vmatpush1.bf16.msra.mxu0 %v6709_v51  ;;  %2635 = vmatpush1.bf16.msra.mxu1 %v6711_v57 }
 0xbd4   :  { %2595 = vmatprep.subr.bf16.mxu0 %v6717_v40  ;;  %2636 = vmatprep.subr.bf16.mxu1 %v6719_v8 }
 0xbd7   :  { %2596 = vmatpush1.bf16.msra.mxu0 %v6721_v37  ;;  %2637 = vmatpush1.bf16.msra.mxu1 %v6723_v0 }
 0xbd8   :  { %2597 = vmatprep.subr.bf16.mxu0 %v6729_v26  ;;  %2638 = vmatprep.subr.bf16.mxu1 %v6731_v30 }
 0xbdb   :  { %2598 = vmatpush1.bf16.msra.mxu0 %v6733_v1  ;;  %2639 = vmatpush1.bf16.msra.mxu1 %v6735_v21 }
 0xbdc   :  { %2699 = vmatprep.subr.bf16.mxu0 %v6645_v11  ;;  %2740 = vmatprep.subr.bf16.mxu1 %v6647_v60 }
 0xc91   :  { %v2501_v56 = vpop.f32.mrb[76].mxu0  ;;  %v2542_v14 = vpop.f32.mrb[76].mxu1 }
 0xc92   :  { %v2549_v55 = vadd.f32 %v2501_v56, %v1826_v22  ;;  %v2551_v19 = vadd.f32 %v2542_v14, %v1899_v13  ;;  %v2503_v33 = vpop.f32.mrb[77].mxu0  ;;  %v2544_v15 = vpop.f32.mrb[77].mxu1 }
 0xc93   :  { %v2550_v5 = vadd.f32 %v2503_v33, %v1828_v18  ;;  %v2552_v58 = vadd.f32 %v2544_v15, %v1901_v3  ;;  %v2505_v36 = vpop.f32.mrb[78].mxu0  ;;  %v2546_v41 = vpop.f32.mrb[78].mxu1 }
 0xc94   :  { %v4824_v29 = vmul.f32 -1.442695, %v2549_v55  ;;  %v2506_v28 = vpop.f32.mrb[79].mxu0  ;;  %v2547_v49 = vpop.f32.mrb[79].mxu1 }
 0xc95   :  { %v4825_v48 = vmul.f32 -1.442695, %v2550_v5  ;;  %v4826_v62 = vmul.f32 -1.442695, %v2552_v58 }
 0xc96   :  { %5401 = vpow2.f32 %v4824_v29 }
 0xc97   :  { %5403 = vpow2.f32 %v4825_v48 }
 0xc98   :  { %5405 = vpow2.f32 %v4826_v62  ;;  %v7081_v62 = vld [vmem:[#allocation9] ss:$16 sps:$4 sm:$0xff]  }
 0xc99   :  { %5407 = vtanh.f32 %v2551_v19 }
 0xca0   :  { %v5402_v52 = vpop.eup %5401 }
 0xca1   :  { %v5404_v35 = vpop.eup %5403  ;;  %v2556_v42 = vadd.f32 1.0, %v5402_v52  ;;  %v7084_v52 = vld [vmem:[#allocation9 + $0x8] ss:$16 sps:$4 sm:$0xff]  }
 0xca2   :  { %v2562_v22 = vadd.f32 1.0, %v5404_v35  ;;  %v5406_v13 = vpop.eup %5405  ;;  %v7087_v35 = vld [vmem:[#allocation9 + $0x24] ss:$16 sps:$4 sm:$0xff]  }
 0xca3   :  { %5409 = vrcp.f32 %v2556_v42  ;;  %v5408_v18 = vpop.eup %5407  ;;  %v2569_v14 = vadd.f32 1.0, %v5406_v13  ;;  %v7090_v42 = vld [vmem:[#allocation9 + $0x2c] ss:$16 sps:$4 sm:$0xff]   ;;  %v7098_v13 = vld [vmem:[#allocation9 + $0x28] ss:$16 sps:$4 sm:$0xff]  }
 0xca4   :  { %5411 = vrcp.f32 %v2562_v22  ;;  %v7095_v22 = vld [vmem:[#allocation9 + $0x20] ss:$16 sps:$4 sm:$0xff]  }
 0xca5   :  { %5413 = vrcp.f32 %v2569_v14  ;;  %v7113_v14 = vld [vmem:[#allocation9 + $0x64] ss:$16 sps:$4 sm:$0xff]  }
 0xcad   :  { %v5410_v17 = vpop.eup %5409 }
 0xcae   :  { %v5412_v3 = vpop.eup %5411  ;;  %v2573_v56 = vmul.f32 %v5410_v17, %v5408_v18  ;;  %v7101_v18 = vld [vmem:[#allocation9 + $0x44] ss:$16 sps:$4 sm:$0xff]   ;;  %v7104_v17 = vld [vmem:[#allocation9 + $0x4c] ss:$16 sps:$4 sm:$0xff]  }
 0xcaf   :  { %v2572_v55 = vmul.f32 %v5412_v3, %v6974_v34  ;;  %v5414_v15 = vpop.eup %5413  ;;  %v7107_v3 = vld [vmem:[#allocation9 + $0x40] ss:$16 sps:$4 sm:$0xff]  }
 0xcb1   :  { %v7024_v33 = vadd.f32 %v2573_v56, %v2572_v55  ;;  %v7110_v56 = vld [vmem:[#allocation9 + $0x48] ss:$16 sps:$4 sm:$0xff]   ;;  %v7116_v55 = vld [vmem:[#allocation9 + $0x6c] ss:$16 sps:$4 sm:$0xff]  }
 0xcb3   :  { %5415 = vtanh.f32 %v7024_v33 }
 0xcbd   :  { %v5416_v5 = vpop.eup %5415 }
 0xcbe   :  { %v7027_v58 = vmul.f32 %v5416_v5, %v5414_v15  ;;  %v7122_v15 = vld [vmem:[#allocation9 + $0x68] ss:$16 sps:$4 sm:$0xff]   ;;  %v7125_v5 = vld [vmem:[#allocation9 + $0x84] ss:$16 sps:$4 sm:$0xff]  }
 0xcc0   :  { %v2582_v19 = vpack.c.bf16 %v7027_v58, %v7027_v58 }
 0xcc2   :  { %2616 = vmatmul.mubr.bf16.vlgmr.msra.gmra.mrb[80].mxu0 %v2582_v19  ;;  %2657 = vmatmul.mubr.bf16.vlgmr.msra.gmra.mrb[80].mxu1 %v2582_v19  ;;  %v7128_v19 = vld [vmem:[#allocation9 + $0x8c] ss:$16 sps:$4 sm:$0xff]  }
 0xcc3   :  { %2700 = vmatpush1.bf16.msra.mxu0 %v6649_v10  ;;  %2741 = vmatpush1.bf16.msra.mxu1 %v6651_v2  ;;  %v7959_v10 = vld [vmem:[#allocation26_spill] sm:$0xff] }
 0xcc4   :  { %2701 = vmatprep.subr.bf16.mxu0 %v6657_v59  ;;  %2742 = vmatprep.subr.bf16.mxu1 %v6659_v39  ;;  %v1832_v2 = vadd.f32 %v7959_v10, %v6851_v63  ;;  %v7960_v59 = vld [vmem:[#allocation30_spill] sm:$0xff] }
 0xcc5   :  { %2731 = vmatprep.mubr.bf16.mxu0 %v7903_v38  ;;  %2772 = vmatprep.mubr.bf16.mxu1 %v7903_v38  ;;  %v1905_v39 = vadd.f32 %v7960_v59, %v6854_v54  ;;  %v7131_v10 = vld [vmem:[#allocation9 + $0x80] ss:$16 sps:$4 sm:$0xff]   ;;  %v7137_v59 = vld [vmem:[#allocation9 + $0xa4] ss:$16 sps:$4 sm:$0xff]  }
 0xcc7   :  { %2702 = vmatpush1.bf16.msra.mxu0 %v6661_v23  ;;  %2743 = vmatpush1.bf16.msra.mxu1 %v6663_v24  ;;  %v7961_v23 = vld [vmem:[#allocation27_spill] sm:$0xff] }
 0xcc8   :  { %2703 = vmatprep.subr.bf16.mxu0 %v6669_v25  ;;  %2744 = vmatprep.subr.bf16.mxu1 %v6671_v6  ;;  %v1834_v24 = vadd.f32 %v7961_v23, %v6861_v53  ;;  %v7962_v25 = vld [vmem:[#allocation31_spill] sm:$0xff]  ;;  %v7143_v23 = vld [vmem:[#allocation9 + $0xa0] ss:$16 sps:$4 sm:$0xff]  }
 0xcc9   :  { %v1907_v6 = vadd.f32 %v7962_v25, %v6864_v61  ;;  %v7149_v25 = vld [vmem:[#allocation9 + $0xc4] ss:$16 sps:$4 sm:$0xff]  }
 0xccb   :  { %2704 = vmatpush1.bf16.msra.mxu0 %v6673_v7  ;;  %2745 = vmatpush1.bf16.msra.mxu1 %v6675_v9 }
 0xccc   :  { %2705 = vmatprep.subr.bf16.mxu0 %v6681_v4  ;;  %2746 = vmatprep.subr.bf16.mxu1 %v6683_v16 }
 0xccf   :  { %2706 = vmatpush1.bf16.msra.mxu0 %v6685_v20  ;;  %2747 = vmatpush1.bf16.msra.mxu1 %v6687_v12 }
 0xcd0   :  { %2707 = vmatprep.subr.bf16.mxu0 %v6693_v43  ;;  %2748 = vmatprep.subr.bf16.mxu1 %v6695_v44 }
 0xcd3   :  { %2708 = vmatpush1.bf16.msra.mxu0 %v6697_v45  ;;  %2749 = vmatpush1.bf16.msra.mxu1 %v6699_v46 }
 0xcd4   :  { %2709 = vmatprep.subr.bf16.mxu0 %v6705_v47  ;;  %2750 = vmatprep.subr.bf16.mxu1 %v6707_v50 }
 0xcd7   :  { %2710 = vmatpush1.bf16.msra.mxu0 %v6709_v51  ;;  %2751 = vmatpush1.bf16.msra.mxu1 %v6711_v57 }
 0xcd8   :  { %2711 = vmatprep.subr.bf16.mxu0 %v6717_v40  ;;  %2752 = vmatprep.subr.bf16.mxu1 %v6719_v8 }
 0xcdb   :  { %2712 = vmatpush1.bf16.msra.mxu0 %v6721_v37  ;;  %2753 = vmatpush1.bf16.msra.mxu1 %v6723_v0 }
 0xcdc   :  { %2713 = vmatprep.subr.bf16.mxu0 %v6729_v26  ;;  %2754 = vmatprep.subr.bf16.mxu1 %v6731_v30 }
 0xcdf   :  { %2714 = vmatpush1.bf16.msra.mxu0 %v6733_v1  ;;  %2755 = vmatpush1.bf16.msra.mxu1 %v6735_v21 }
 0xce0   :  { %2815 = vmatprep.subr.bf16.mxu0 %v6645_v11  ;;  %2856 = vmatprep.subr.bf16.mxu1 %v6647_v60 }
 0xd95   :  { %v2617_v7 = vpop.f32.mrb[80].mxu0  ;;  %v2658_v9 = vpop.f32.mrb[80].mxu1 }
 0xd96   :  { %v2665_v4 = vadd.f32 %v2617_v7, %v1832_v2  ;;  %v2667_v16 = vadd.f32 %v2658_v9, %v1905_v39  ;;  %v2619_v20 = vpop.f32.mrb[81].mxu0  ;;  %v2660_v11 = vpop.f32.mrb[81].mxu1  ;;  %v7134_v2 = vld [vmem:[#allocation9 + $0x88] ss:$16 sps:$4 sm:$0xff]   ;;  %v7140_v39 = vld [vmem:[#allocation9 + $0xac] ss:$16 sps:$4 sm:$0xff]  }
 0xd97   :  { %v2666_v12 = vadd.f32 %v2619_v20, %v1834_v24  ;;  %v2668_v60 = vadd.f32 %v2660_v11, %v1907_v6  ;;  %v2621_v43 = vpop.f32.mrb[82].mxu0  ;;  %v2662_v44 = vpop.f32.mrb[82].mxu1  ;;  %v7146_v24 = vld [vmem:[#allocation9 + $0xa8] ss:$16 sps:$4 sm:$0xff]   ;;  %v7152_v6 = vld [vmem:[#allocation9 + $0xcc] ss:$16 sps:$4 sm:$0xff]  }
 0xd98   :  { %v4827_v45 = vmul.f32 -1.442695, %v2665_v4  ;;  %v2622_v46 = vpop.f32.mrb[83].mxu0  ;;  %v2663_v47 = vpop.f32.mrb[83].mxu1  ;;  %v7155_v7 = vld [vmem:[#allocation9 + $0xc0] ss:$16 sps:$4 sm:$0xff]  }
 0xd99   :  { %v4828_v50 = vmul.f32 -1.442695, %v2666_v12  ;;  %v4829_v51 = vmul.f32 -1.442695, %v2668_v60  ;;  %v7158_v9 = vld [vmem:[#allocation9 + $0xc8] ss:$16 sps:$4 sm:$0xff]  }
 0xd9a   :  { %5417 = vpow2.f32 %v4827_v45  ;;  %v7161_v4 = vld [vmem:[#allocation9 + $0xe4] ss:$16 sps:$4 sm:$0xff]   ;;  %v7167_v20 = vld [vmem:[#allocation9 + $0xe0] ss:$16 sps:$4 sm:$0xff]   ;;  %v7170_v11 = vld [vmem:[#allocation9 + $0xe8] ss:$16 sps:$4 sm:$0xff]  }
 0xd9b   :  { %5419 = vpow2.f32 %v4828_v50  ;;  %v5671_v12 = vld [vmem:[#allocation9 + $0x4] ss:$16 sps:$4 sm:$0xff]   ;;  %v5672_v60 = vld [vmem:[#allocation9 + $0xc] ss:$16 sps:$4 sm:$0xff]  }
 0xd9c   :  { %5421 = vpow2.f32 %v4829_v51  ;;  %v7963_v43 = vld [vmem:[#allocation29_spill] sm:$0xff]  ;;  %v7964_v45 = vld [vmem:[#allocation32_spill] sm:$0xff] }
 0xd9d   :  { %5423 = vtanh.f32 %v2667_v16  ;;  %v7164_v16 = vld [vmem:[#allocation9 + $0xec] ss:$16 sps:$4 sm:$0xff]   ;;  %v1836_v44 = vadd.f32 %v7963_v43, %v6851_v63  ;;  %v1909_v46 = vadd.f32 %v7964_v45, %v6854_v54  ;;  %v7966_v51 = vld [vmem:[#allocation36_spill] sm:$0xff] }
 0xd9e   :  { %v7965_v47 = vld [vmem:[#allocation33_spill] sm:$0xff] }
 0xd9f   :  { %v1838_v50 = vadd.f32 %v7965_v47, %v6861_v53 }
 0xda4   :  { %v5418_v57 = vpop.eup %5417 }
 0xda5   :  { %v5420_v40 = vpop.eup %5419  ;;  %v2672_v8 = vadd.f32 1.0, %v5418_v57  ;;  %v1911_v57 = vadd.f32 %v7966_v51, %v6864_v61 }
 0xda6   :  { %v2678_v37 = vadd.f32 1.0, %v5420_v40  ;;  %v5422_v0 = vpop.eup %5421 }
 0xda7   :  { %5425 = vrcp.f32 %v2672_v8  ;;  %v5424_v26 = vpop.eup %5423  ;;  %v2685_v34 = vadd.f32 1.0, %v5422_v0 }
 0xda8   :  { %5427 = vrcp.f32 %v2678_v37 }
 0xda9   :  { %5429 = vrcp.f32 %v2685_v34 }
 0xdb1   :  { %v5426_v30 = vpop.eup %5425 }
 0xdb2   :  { %v5428_v1 = vpop.eup %5427  ;;  %v2689_v21 = vmul.f32 %v5426_v30, %v5424_v26 }
 0xdb3   :  { %v2688_v36 = vmul.f32 %v5428_v1, %v7024_v33  ;;  %v5430_v29 = vpop.eup %5429  ;;  %v7119_v33 = vld [vmem:[#allocation9 + $0x60] ss:$16 sps:$4 sm:$0xff]  }
 0xdb5   :  { %v7074_v41 = vadd.f32 %v2689_v21, %v2688_v36 }
 0xdb7   :  { %5431 = vtanh.f32 %v7074_v41 }
 0xdc1   :  { %v5432_v28 = vpop.eup %5431 }
 0xdc2   :  { %v7077_v49 = vmul.f32 %v5432_v28, %v5430_v29 }
 0xdc4   :  { %v2698_v48 = vpack.c.bf16 %v7077_v49, %v7077_v49 }
 0xdc6   :  { %2732 = vmatmul.mubr.bf16.vlgmr.msra.gmra.mrb[84].mxu0 %v2698_v48  ;;  %2773 = vmatmul.mubr.bf16.vlgmr.msra.gmra.mrb[84].mxu1 %v2698_v48 }
 0xdc7   :  { %2816 = vmatpush1.bf16.msra.mxu0 %v7081_v62  ;;  %2857 = vmatpush1.bf16.msra.mxu1 %v7084_v52 }
 0xdc8   :  { %2817 = vmatprep.subr.bf16.mxu0 %v7087_v35  ;;  %2858 = vmatprep.subr.bf16.mxu1 %v7090_v42 }
 0xdc9   :  { %2847 = vmatprep.mubr.bf16.mxu0 %v7903_v38  ;;  %2888 = vmatprep.mubr.bf16.mxu1 %v7903_v38 }
 0xdcb   :  { %2818 = vmatpush1.bf16.msra.mxu0 %v7095_v22  ;;  %2859 = vmatpush1.bf16.msra.mxu1 %v7098_v13 }
 0xdcc   :  { %2819 = vmatprep.subr.bf16.mxu0 %v7101_v18  ;;  %2860 = vmatprep.subr.bf16.mxu1 %v7104_v17 }
 0xdcf   :  { %2820 = vmatpush1.bf16.msra.mxu0 %v7107_v3  ;;  %2861 = vmatpush1.bf16.msra.mxu1 %v7110_v56 }
 0xdd0   :  { %2821 = vmatprep.subr.bf16.mxu0 %v7113_v14  ;;  %2862 = vmatprep.subr.bf16.mxu1 %v7116_v55 }
 0xdd3   :  { %2822 = vmatpush1.bf16.msra.mxu0 %v7119_v33  ;;  %2863 = vmatpush1.bf16.msra.mxu1 %v7122_v15 }
 0xdd4   :  { %2823 = vmatprep.subr.bf16.mxu0 %v7125_v5  ;;  %2864 = vmatprep.subr.bf16.mxu1 %v7128_v19 }
 0xdd7   :  { %2824 = vmatpush1.bf16.msra.mxu0 %v7131_v10  ;;  %2865 = vmatpush1.bf16.msra.mxu1 %v7134_v2 }
 0xdd8   :  { %2825 = vmatprep.subr.bf16.mxu0 %v7137_v59  ;;  %2866 = vmatprep.subr.bf16.mxu1 %v7140_v39 }
 0xddb   :  { %2826 = vmatpush1.bf16.msra.mxu0 %v7143_v23  ;;  %2867 = vmatpush1.bf16.msra.mxu1 %v7146_v24 }
 0xddc   :  { %2827 = vmatprep.subr.bf16.mxu0 %v7149_v25  ;;  %2868 = vmatprep.subr.bf16.mxu1 %v7152_v6 }
 0xddf   :  { %2828 = vmatpush1.bf16.msra.mxu0 %v7155_v7  ;;  %2869 = vmatpush1.bf16.msra.mxu1 %v7158_v9 }
 0xde0   :  { %2829 = vmatprep.subr.bf16.mxu0 %v7161_v4  ;;  %2870 = vmatprep.subr.bf16.mxu1 %v7164_v16 }
 0xde3   :  { %2830 = vmatpush1.bf16.msra.mxu0 %v7167_v20  ;;  %2871 = vmatpush1.bf16.msra.mxu1 %v7170_v11 }
 0xde4   :  { %2931 = vmatprep.subr.bf16.mxu0 %v5671_v12  ;;  %2972 = vmatprep.subr.bf16.mxu1 %v5672_v60 }
 0xe99   :  { %v2733_v40 = vpop.f32.mrb[84].mxu0  ;;  %v2774_v8 = vpop.f32.mrb[84].mxu1 }
 0xe9a   :  { %v2781_v37 = vadd.f32 %v2733_v40, %v1836_v44  ;;  %v2783_v0 = vadd.f32 %v2774_v8, %v1909_v46  ;;  %v2735_v26 = vpop.f32.mrb[85].mxu0  ;;  %v2776_v30 = vpop.f32.mrb[85].mxu1 }
 0xe9b   :  { %v2782_v1 = vadd.f32 %v2735_v26, %v1838_v50  ;;  %v2784_v21 = vadd.f32 %v2776_v30, %v1911_v57  ;;  %v2737_v34 = vpop.f32.mrb[86].mxu0  ;;  %v2778_v36 = vpop.f32.mrb[86].mxu1 }
 0xe9c   :  { %v4830_v29 = vmul.f32 -1.442695, %v2781_v37  ;;  %v2738_v28 = vpop.f32.mrb[87].mxu0  ;;  %v2779_v48 = vpop.f32.mrb[87].mxu1 }
 0xe9d   :  { %v4831_v12 = vmul.f32 -1.442695, %v2782_v1  ;;  %v4832_v60 = vmul.f32 -1.442695, %v2784_v21 }
 0xe9e   :  { %5433 = vpow2.f32 %v4830_v29 }
 0xe9f   :  { %5435 = vpow2.f32 %v4831_v12 }
 0xea0   :  { %5437 = vpow2.f32 %v4832_v60 }
 0xea1   :  { %5439 = vtanh.f32 %v2783_v0 }
 0xea8   :  { %v5434_v43 = vpop.eup %5433 }
 0xea9   :  { %v5436_v45 = vpop.eup %5435  ;;  %v2788_v47 = vadd.f32 1.0, %v5434_v43 }
 0xeaa   :  { %v2794_v44 = vadd.f32 1.0, %v5436_v45  ;;  %v5438_v46 = vpop.eup %5437 }
 0xeab   :  { %5441 = vrcp.f32 %v2788_v47  ;;  %v5440_v50 = vpop.eup %5439  ;;  %v2801_v8 = vadd.f32 1.0, %v5438_v46  ;;  %v5121_v47 = vld [vmem:[#allocation10] ss:$16 sps:$4 sm:$0xff]  }
 0xeac   :  { %5443 = vrcp.f32 %v2794_v44  ;;  %v5124_v44 = vld [vmem:[#allocation10 + $0x8] ss:$16 sps:$4 sm:$0xff]  }
 0xead   :  { %5445 = vrcp.f32 %v2801_v8  ;;  %v5135_v8 = vld [vmem:[#allocation10 + $0x44] ss:$16 sps:$4 sm:$0xff]  }
 0xeb5   :  { %v5442_v51 = vpop.eup %5441 }
 0xeb6   :  { %v5444_v57 = vpop.eup %5443  ;;  %v2805_v40 = vmul.f32 %v5442_v51, %v5440_v50  ;;  %v5129_v50 = vld [vmem:[#allocation10 + $0x24] ss:$16 sps:$4 sm:$0xff]   ;;  %v5132_v51 = vld [vmem:[#allocation10 + $0x2c] ss:$16 sps:$4 sm:$0xff]  }
 0xeb7   :  { %v2804_v37 = vmul.f32 %v5444_v57, %v7074_v41  ;;  %v5446_v30 = vpop.eup %5445  ;;  %v5123_v41 = vld [vmem:[#allocation10 + $0x4] ss:$16 sps:$4 sm:$0xff]   ;;  %v5127_v57 = vld [vmem:[#allocation10 + $0x20] ss:$16 sps:$4 sm:$0xff]  }
 0xeb9   :  { %v7182_v26 = vadd.f32 %v2805_v40, %v2804_v37  ;;  %v5130_v40 = vld [vmem:[#allocation10 + $0x28] ss:$16 sps:$4 sm:$0xff]   ;;  %v5138_v37 = vld [vmem:[#allocation10 + $0x4c] ss:$16 sps:$4 sm:$0xff]  }
 0xebb   :  { %5447 = vtanh.f32 %v7182_v26 }
 0xec5   :  { %v5448_v1 = vpop.eup %5447 }
 0xec6   :  { %v7185_v21 = vmul.f32 %v5448_v1, %v5446_v30  ;;  %v5136_v30 = vld [vmem:[#allocation10 + $0x48] ss:$16 sps:$4 sm:$0xff]   ;;  %v5141_v1 = vld [vmem:[#allocation10 + $0x64] ss:$16 sps:$4 sm:$0xff]  }
 0xec8   :  { %v2814_v0 = vpack.c.bf16 %v7185_v21, %v7185_v21 }
 0xeca   :  { %2848 = vmatmul.mubr.bf16.vlgmr.msra.gmra.mrb[88].mxu0 %v2814_v0  ;;  %2889 = vmatmul.mubr.bf16.vlgmr.msra.gmra.mrb[88].mxu1 %v2814_v0  ;;  %v5144_v0 = vld [vmem:[#allocation10 + $0x6c] ss:$16 sps:$4 sm:$0xff]  }
 0xecb   :  { %2932 = vmatpush1.bf16.msra.mxu0 %v7081_v62  ;;  %2973 = vmatpush1.bf16.msra.mxu1 %v7084_v52  ;;  %v5126_v62 = vld [vmem:[#allocation10 + $0xc] ss:$16 sps:$4 sm:$0xff]   ;;  %v7967_v52 = vld [vmem:[#allocation34_spill] sm:$0xff] }
 0xecc   :  { %2933 = vmatprep.subr.bf16.mxu0 %v7087_v35  ;;  %2974 = vmatprep.subr.bf16.mxu1 %v7090_v42  ;;  %v1842_v35 = vadd.f32 %v7967_v52, %v6851_v63  ;;  %v7968_v42 = vld [vmem:[#allocation38_spill] sm:$0xff] }
 0xecd   :  { %2963 = vmatprep.mubr.bf16.mxu0 %v7903_v38  ;;  %3004 = vmatprep.mubr.bf16.mxu1 %v7903_v38  ;;  %v5147_v52 = vld [vmem:[#allocation10 + $0x84] ss:$16 sps:$4 sm:$0xff]  }
 0xecf   :  { %2934 = vmatpush1.bf16.msra.mxu0 %v7095_v22  ;;  %2975 = vmatpush1.bf16.msra.mxu1 %v7098_v13  ;;  %v1915_v22 = vadd.f32 %v7968_v42, %v6854_v54  ;;  %v7969_v13 = vld [vmem:[#allocation35_spill] sm:$0xff]  ;;  %v5145_v42 = vld [vmem:[#allocation10 + $0x80] ss:$16 sps:$4 sm:$0xff]  }
 0xed0   :  { %2935 = vmatprep.subr.bf16.mxu0 %v7101_v18  ;;  %2976 = vmatprep.subr.bf16.mxu1 %v7104_v17  ;;  %v1844_v18 = vadd.f32 %v7969_v13, %v6861_v53  ;;  %v7970_v17 = vld [vmem:[#allocation39_spill] sm:$0xff]  ;;  %v5153_v13 = vld [vmem:[#allocation10 + $0xa4] ss:$16 sps:$4 sm:$0xff]  }
 0xed3   :  { %2936 = vmatpush1.bf16.msra.mxu0 %v7107_v3  ;;  %2977 = vmatpush1.bf16.msra.mxu1 %v7110_v56  ;;  %v1917_v3 = vadd.f32 %v7970_v17, %v6864_v61  ;;  %v5151_v17 = vld [vmem:[#allocation10 + $0xa0] ss:$16 sps:$4 sm:$0xff]  }
 0xed4   :  { %2937 = vmatprep.subr.bf16.mxu0 %v7113_v14  ;;  %2978 = vmatprep.subr.bf16.mxu1 %v7116_v55 }
 0xed7   :  { %2938 = vmatpush1.bf16.msra.mxu0 %v7119_v33  ;;  %2979 = vmatpush1.bf16.msra.mxu1 %v7122_v15 }
 0xed8   :  { %2939 = vmatprep.subr.bf16.mxu0 %v7125_v5  ;;  %2980 = vmatprep.subr.bf16.mxu1 %v7128_v19 }
 0xedb   :  { %2940 = vmatpush1.bf16.msra.mxu0 %v7131_v10  ;;  %2981 = vmatpush1.bf16.msra.mxu1 %v7134_v2 }
 0xedc   :  { %2941 = vmatprep.subr.bf16.mxu0 %v7137_v59  ;;  %2982 = vmatprep.subr.bf16.mxu1 %v7140_v39 }
 0xedf   :  { %2942 = vmatpush1.bf16.msra.mxu0 %v7143_v23  ;;  %2983 = vmatpush1.bf16.msra.mxu1 %v7146_v24 }
 0xee0   :  { %2943 = vmatprep.subr.bf16.mxu0 %v7149_v25  ;;  %2984 = vmatprep.subr.bf16.mxu1 %v7152_v6 }
 0xee3   :  { %2944 = vmatpush1.bf16.msra.mxu0 %v7155_v7  ;;  %2985 = vmatpush1.bf16.msra.mxu1 %v7158_v9 }
 0xee4   :  { %2945 = vmatprep.subr.bf16.mxu0 %v7161_v4  ;;  %2986 = vmatprep.subr.bf16.mxu1 %v7164_v16 }
 0xee7   :  { %2946 = vmatpush1.bf16.msra.mxu0 %v7167_v20  ;;  %2987 = vmatpush1.bf16.msra.mxu1 %v7170_v11 }
 0xee8   :  { %3300 = vmatprep.subr.bf16.mxu0 %v5123_v41  ;;  %3373 = vmatprep.subr.bf16.mxu1 %v5126_v62  ;;  %v5139_v41 = vld [vmem:[#allocation10 + $0x60] ss:$16 sps:$4 sm:$0xff]   ;;  %v5142_v62 = vld [vmem:[#allocation10 + $0x68] ss:$16 sps:$4 sm:$0xff]  }
 0xf9d   :  { %v2849_v56 = vpop.f32.mrb[88].mxu0  ;;  %v2890_v14 = vpop.f32.mrb[88].mxu1 }
 0xf9e   :  { %v2897_v55 = vadd.f32 %v2849_v56, %v1842_v35  ;;  %v2899_v33 = vadd.f32 %v2890_v14, %v1915_v22  ;;  %v2851_v15 = vpop.f32.mrb[89].mxu0  ;;  %v2892_v5 = vpop.f32.mrb[89].mxu1  ;;  %v5150_v35 = vld [vmem:[#allocation10 + $0x8c] ss:$16 sps:$4 sm:$0xff]   ;;  %v5148_v22 = vld [vmem:[#allocation10 + $0x88] ss:$16 sps:$4 sm:$0xff]  }
 0xf9f   :  { %v2898_v19 = vadd.f32 %v2851_v15, %v1844_v18  ;;  %v2900_v10 = vadd.f32 %v2892_v5, %v1917_v3  ;;  %v2853_v2 = vpop.f32.mrb[90].mxu0  ;;  %v2894_v59 = vpop.f32.mrb[90].mxu1  ;;  %v5156_v18 = vld [vmem:[#allocation10 + $0xac] ss:$16 sps:$4 sm:$0xff]   ;;  %v5154_v3 = vld [vmem:[#allocation10 + $0xa8] ss:$16 sps:$4 sm:$0xff]  }
 0xfa0   :  { %v4833_v39 = vmul.f32 -1.442695, %v2897_v55  ;;  %v2854_v23 = vpop.f32.mrb[91].mxu0  ;;  %v2895_v24 = vpop.f32.mrb[91].mxu1  ;;  %v5159_v56 = vld [vmem:[#allocation10 + $0xc4] ss:$16 sps:$4 sm:$0xff]   ;;  %v3050_v2 = vpack.c.bf16 %v6927_v27, %v6877_v32  ;;  %v3051_v59 = vpack.c.bf16 %v7027_v58, %v6977_v31 }
 0xfa1   :  { %v4834_v25 = vmul.f32 -1.442695, %v2898_v19  ;;  %v4835_v6 = vmul.f32 -1.442695, %v2900_v10  ;;  %v5162_v14 = vld [vmem:[#allocation10 + $0xcc] ss:$16 sps:$4 sm:$0xff]  }
 0xfa2   :  { %5449 = vpow2.f32 %v4833_v39  ;;  %v5157_v55 = vld [vmem:[#allocation10 + $0xc0] ss:$16 sps:$4 sm:$0xff]   ;;  %v5165_v15 = vld [vmem:[#allocation10 + $0xe4] ss:$16 sps:$4 sm:$0xff]   ;;  %v5168_v5 = vld [vmem:[#allocation10 + $0xec] ss:$16 sps:$4 sm:$0xff]   ;;  %v3052_v39 = vpack.c.bf16 %v7185_v21, %v7077_v49 }
 0xfa3   :  { %5451 = vpow2.f32 %v4834_v25  ;;  %v5163_v19 = vld [vmem:[#allocation10 + $0xe0] ss:$16 sps:$4 sm:$0xff]   ;;  %v5166_v10 = vld [vmem:[#allocation10 + $0xe8] ss:$16 sps:$4 sm:$0xff]   ;;  %v7251_v32 = vld [vmem:[#allocation12 + $0x4] ss:$16 sps:$4 sm:$0xff]  }
 0xfa4   :  { %5453 = vpow2.f32 %v4835_v6  ;;  %v7253_v27 = vld [vmem:[#allocation12 + $0xc] ss:$16 sps:$4 sm:$0xff]   ;;  %v7255_v31 = vld [vmem:[#allocation12] ss:$16 sps:$4 sm:$0xff]   ;;  %v7257_v58 = vld [vmem:[#allocation12 + $0x8] ss:$16 sps:$4 sm:$0xff]  }
 0xfa5   :  { %5455 = vtanh.f32 %v2899_v33  ;;  %v5160_v33 = vld [vmem:[#allocation10 + $0xc8] ss:$16 sps:$4 sm:$0xff]   ;;  %v7263_v49 = vld [vmem:[#allocation12 + $0x24] ss:$16 sps:$4 sm:$0xff]   ;;  %v7265_v21 = vld [vmem:[#allocation12 + $0x2c] ss:$16 sps:$4 sm:$0xff]  }
 0xfa6   :  { %v7267_v23 = vld [vmem:[#allocation12 + $0x20] ss:$16 sps:$4 sm:$0xff]   ;;  %v7269_v24 = vld [vmem:[#allocation12 + $0x28] ss:$16 sps:$4 sm:$0xff]   ;;  %v7275_v25 = vld [vmem:[#allocation12 + $0x44] ss:$16 sps:$4 sm:$0xff]  }
 0xfa7   :  { %v7277_v6 = vld [vmem:[#allocation12 + $0x4c] ss:$16 sps:$4 sm:$0xff]  }
 0xfac   :  { %v5450_v7 = vpop.eup %5449 }
 0xfad   :  { %v5452_v9 = vpop.eup %5451  ;;  %v2904_v4 = vadd.f32 1.0, %v5450_v7  ;;  %v7279_v7 = vld [vmem:[#allocation12 + $0x40] ss:$16 sps:$4 sm:$0xff]  }
 0xfae   :  { %v2910_v16 = vadd.f32 1.0, %v5452_v9  ;;  %v5454_v20 = vpop.eup %5453  ;;  %v7281_v9 = vld [vmem:[#allocation12 + $0x48] ss:$16 sps:$4 sm:$0xff]  }
 0xfaf   :  { %5457 = vrcp.f32 %v2904_v4  ;;  %v5456_v11 = vpop.eup %5455  ;;  %v2917_v28 = vadd.f32 1.0, %v5454_v20  ;;  %v7287_v4 = vld [vmem:[#allocation12 + $0x64] ss:$16 sps:$4 sm:$0xff]   ;;  %v7291_v20 = vld [vmem:[#allocation12 + $0x60] ss:$16 sps:$4 sm:$0xff]  }
 0xfb0   :  { %5459 = vrcp.f32 %v2910_v16  ;;  %v7289_v16 = vld [vmem:[#allocation12 + $0x6c] ss:$16 sps:$4 sm:$0xff]  }
 0xfb1   :  { %5461 = vrcp.f32 %v2917_v28  ;;  %v7305_v28 = vld [vmem:[#allocation12 + $0x88] ss:$16 sps:$4 sm:$0xff]  }
 0xfb9   :  { %v5458_v34 = vpop.eup %5457 }
 0xfba   :  { %v5460_v36 = vpop.eup %5459  ;;  %v2921_v29 = vmul.f32 %v5458_v34, %v5456_v11  ;;  %v7293_v11 = vld [vmem:[#allocation12 + $0x68] ss:$16 sps:$4 sm:$0xff]   ;;  %v7299_v34 = vld [vmem:[#allocation12 + $0x84] ss:$16 sps:$4 sm:$0xff]  }
 0xfbb   :  { %v2920_v48 = vmul.f32 %v5460_v36, %v7182_v26  ;;  %v5462_v60 = vpop.eup %5461  ;;  %v5133_v26 = vld [vmem:[#allocation10 + $0x40] ss:$16 sps:$4 sm:$0xff]   ;;  %v7301_v36 = vld [vmem:[#allocation12 + $0x8c] ss:$16 sps:$4 sm:$0xff]  }
 0xfbd   :  { %v7230_v12 = vadd.f32 %v2921_v29, %v2920_v48  ;;  %v7303_v29 = vld [vmem:[#allocation12 + $0x80] ss:$16 sps:$4 sm:$0xff]   ;;  %v7311_v48 = vld [vmem:[#allocation12 + $0xa4] ss:$16 sps:$4 sm:$0xff]  }
 0xfbf   :  { %5463 = vtanh.f32 %v7230_v12 }
 0xfc9   :  { %v5464_v43 = vpop.eup %5463 }
 0xfca   :  { %v7233_v45 = vmul.f32 %v5464_v43, %v5462_v60  ;;  %v7313_v60 = vld [vmem:[#allocation12 + $0xac] ss:$16 sps:$4 sm:$0xff]   ;;  %v7315_v43 = vld [vmem:[#allocation12 + $0xa0] ss:$16 sps:$4 sm:$0xff]  }
 0xfcc   :  { %v2930_v46 = vpack.c.bf16 %v7233_v45, %v7233_v45 }
 0xfce   :  { %2964 = vmatmul.mubr.bf16.vlgmr.msra.gmra.mrb[92].mxu0 %v2930_v46  ;;  %3005 = vmatmul.mubr.bf16.vlgmr.msra.gmra.mrb[92].mxu1 %v2930_v46  ;;  %v7325_v46 = vld [vmem:[#allocation12 + $0xcc] ss:$16 sps:$4 sm:$0xff]  }
 0xfcf   :  { %3301 = vmatpush1.bf16.msra.mxu0 %v5121_v47  ;;  %3374 = vmatpush1.bf16.msra.mxu1 %v5124_v44  ;;  %v7317_v47 = vld [vmem:[#allocation12 + $0xa8] ss:$16 sps:$4 sm:$0xff]   ;;  %v7323_v44 = vld [vmem:[#allocation12 + $0xc4] ss:$16 sps:$4 sm:$0xff]  }
 0xfd0   :  { %3302 = vmatprep.subr.bf16.mxu0 %v5129_v50  ;;  %3375 = vmatprep.subr.bf16.mxu1 %v5132_v51  ;;  %v7327_v50 = vld [vmem:[#allocation12 + $0xc0] ss:$16 sps:$4 sm:$0xff]   ;;  %v7329_v51 = vld [vmem:[#allocation12 + $0xc8] ss:$16 sps:$4 sm:$0xff]  }
 0xfd1   :  { %3332 = vmatprep.mubr.bf16.mxu0 %v7903_v38  ;;  %3405 = vmatprep.mubr.bf16.mxu1 %v7903_v38 }
 0xfd3   :  { %3303 = vmatpush1.bf16.msra.mxu0 %v5127_v57  ;;  %3376 = vmatpush1.bf16.msra.mxu1 %v5130_v40  ;;  %v7335_v57 = vld [vmem:[#allocation12 + $0xe4] ss:$16 sps:$4 sm:$0xff]   ;;  %v7337_v40 = vld [vmem:[#allocation12 + $0xec] ss:$16 sps:$4 sm:$0xff]  }
 0xfd4   :  { %3304 = vmatprep.subr.bf16.mxu0 %v5135_v8  ;;  %3377 = vmatprep.subr.bf16.mxu1 %v5138_v37  ;;  %v7339_v8 = vld [vmem:[#allocation12 + $0xe0] ss:$16 sps:$4 sm:$0xff]   ;;  %v7341_v37 = vld [vmem:[#allocation12 + $0xe8] ss:$16 sps:$4 sm:$0xff]  }
 0xfd7   :  { %3305 = vmatpush1.bf16.msra.mxu0 %v5133_v26  ;;  %3378 = vmatpush1.bf16.msra.mxu1 %v5136_v30  ;;  %v7971_v26 = vld [vmem:[#allocation37_spill] sm:$0xff] }
 0xfd8   :  { %3306 = vmatprep.subr.bf16.mxu0 %v5141_v1  ;;  %3379 = vmatprep.subr.bf16.mxu1 %v5144_v0  ;;  %v1846_v30 = vadd.f32 %v7971_v26, %v6851_v63  ;;  %v7972_v1 = vld [vmem:[#allocation40_spill] sm:$0xff] }
 0xfd9   :  { %v1919_v0 = vadd.f32 %v7972_v1, %v6854_v54 }
 0xfdb   :  { %3307 = vmatpush1.bf16.msra.mxu0 %v5139_v41  ;;  %3380 = vmatpush1.bf16.msra.mxu1 %v5142_v62  ;;  %v7973_v41 = vld [vmem:[#allocation41_spill] sm:$0xff] }
 0xfdc   :  { %3308 = vmatprep.subr.bf16.mxu0 %v5147_v52  ;;  %3381 = vmatprep.subr.bf16.mxu1 %v5150_v35  ;;  %v1848_v62 = vadd.f32 %v7973_v41, %v6861_v53  ;;  %v7974_v52 = vld [vmem:[#allocation42_spill] sm:$0xff] }
 0xfdd   :  { %v1921_v35 = vadd.f32 %v7974_v52, %v6864_v61 }
 0xfdf   :  { %3309 = vmatpush1.bf16.msra.mxu0 %v5145_v42  ;;  %3382 = vmatpush1.bf16.msra.mxu1 %v5148_v22 }
 0xfe0   :  { %3310 = vmatprep.subr.bf16.mxu0 %v5153_v13  ;;  %3383 = vmatprep.subr.bf16.mxu1 %v5156_v18 }
 0xfe3   :  { %3311 = vmatpush1.bf16.msra.mxu0 %v5151_v17  ;;  %3384 = vmatpush1.bf16.msra.mxu1 %v5154_v3 }
 0xfe4   :  { %3312 = vmatprep.subr.bf16.mxu0 %v5159_v56  ;;  %3385 = vmatprep.subr.bf16.mxu1 %v5162_v14 }
 0xfe7   :  { %3313 = vmatpush1.bf16.msra.mxu0 %v5157_v55  ;;  %3386 = vmatpush1.bf16.msra.mxu1 %v5160_v33 }
 0xfe8   :  { %3314 = vmatprep.subr.bf16.mxu0 %v5165_v15  ;;  %3387 = vmatprep.subr.bf16.mxu1 %v5168_v5 }
 0xfeb   :  { %3315 = vmatpush1.bf16.msra.mxu0 %v5163_v19  ;;  %3388 = vmatpush1.bf16.msra.mxu1 %v5166_v10 }
 0xfec   :  { %3642 = vmatprep.subr.bf16.mxu0 %v7251_v32  ;;  %3683 = vmatprep.subr.bf16.mxu1 %v7253_v27 }
 0xfee   :  { %3333 = vmatmul.mubr.bf16.vlgmr.msra.gmra.mrb[96].mxu0 %v3050_v2  ;;  %3406 = vmatmul.mubr.bf16.vlgmr.msra.gmra.mrb[96].mxu1 %v3050_v2 }
 0xfef   :  { %3342 = vmatprep.mubr.bf16.mxu0 %v7903_v38  ;;  %3415 = vmatprep.mubr.bf16.mxu1 %v7903_v38 }
 0xff0   :  { %3643 = vmatpush1.bf16.msra.mxu0 %v7255_v31  ;;  %3684 = vmatpush1.bf16.msra.mxu1 %v7257_v58 }
 0xff1   :  { %3644 = vmatprep.subr.bf16.mxu0 %v7263_v49  ;;  %3685 = vmatprep.subr.bf16.mxu1 %v7265_v21 }
 0xff4   :  { %3645 = vmatpush1.bf16.msra.mxu0 %v7267_v23  ;;  %3686 = vmatpush1.bf16.msra.mxu1 %v7269_v24 }
 0xff5   :  { %3646 = vmatprep.subr.bf16.mxu0 %v7275_v25  ;;  %3687 = vmatprep.subr.bf16.mxu1 %v7277_v6 }
 0xff6   :  { %3343 = vmatmul.mubr.bf16.gmra.mrb[100].mxu0 %v3051_v59  ;;  %3416 = vmatmul.mubr.bf16.gmra.mrb[100].mxu1 %v3051_v59 }
 0xff7   :  { %3352 = vmatprep.mubr.bf16.mxu0 %v7903_v38  ;;  %3425 = vmatprep.mubr.bf16.mxu1 %v7903_v38 }
 0xff8   :  { %3647 = vmatpush1.bf16.msra.mxu0 %v7279_v7  ;;  %3688 = vmatpush1.bf16.msra.mxu1 %v7281_v9 }
 0xff9   :  { %3648 = vmatprep.subr.bf16.mxu0 %v7287_v4  ;;  %3689 = vmatprep.subr.bf16.mxu1 %v7289_v16 }
 0xffc   :  { %3649 = vmatpush1.bf16.msra.mxu0 %v7291_v20  ;;  %3690 = vmatpush1.bf16.msra.mxu1 %v7293_v11 }
 0xffd   :  { %3650 = vmatprep.subr.bf16.mxu0 %v7299_v34  ;;  %3691 = vmatprep.subr.bf16.mxu1 %v7301_v36 }
 0xffe   :  { %3353 = vmatmul.mubr.bf16.gmra.mrb[104].mxu0 %v3052_v39  ;;  %3426 = vmatmul.mubr.bf16.gmra.mrb[104].mxu1 %v3052_v39 }
 0xfff   :  { %3362 = vmatprep.mubr.bf16.mxu0 %v7903_v38  ;;  %3435 = vmatprep.mubr.bf16.mxu1 %v7903_v38 }
0x1000   :  { %3651 = vmatpush1.bf16.msra.mxu0 %v7303_v29  ;;  %3692 = vmatpush1.bf16.msra.mxu1 %v7305_v28 }
0x1001   :  { %3652 = vmatprep.subr.bf16.mxu0 %v7311_v48  ;;  %3693 = vmatprep.subr.bf16.mxu1 %v7313_v60 }
0x1004   :  { %3653 = vmatpush1.bf16.msra.mxu0 %v7315_v43  ;;  %3694 = vmatpush1.bf16.msra.mxu1 %v7317_v47 }
0x1005   :  { %3654 = vmatprep.subr.bf16.mxu0 %v7323_v44  ;;  %3695 = vmatprep.subr.bf16.mxu1 %v7325_v46 }
0x1008   :  { %3655 = vmatpush1.bf16.msra.mxu0 %v7327_v50  ;;  %3696 = vmatpush1.bf16.msra.mxu1 %v7329_v51 }
0x1009   :  { %3656 = vmatprep.subr.bf16.mxu0 %v7335_v57  ;;  %3697 = vmatprep.subr.bf16.mxu1 %v7337_v40 }
0x100c   :  { %3657 = vmatpush1.bf16.msra.mxu0 %v7339_v8  ;;  %3698 = vmatpush1.bf16.msra.mxu1 %v7341_v37 }
0x100d   :  { %3757 = vmatprep.subr.bf16.mxu0 %v7251_v32  ;;  %3798 = vmatprep.subr.bf16.mxu1 %v7253_v27 }
0x10a1   :  { %v2965_v42 = vpop.f32.mrb[92].mxu0  ;;  %v3006_v22 = vpop.f32.mrb[92].mxu1 }
0x10a2   :  { %v3013_v13 = vadd.f32 %v2965_v42, %v1846_v30  ;;  %v3015_v18 = vadd.f32 %v3006_v22, %v1919_v0  ;;  %v2967_v17 = vpop.f32.mrb[93].mxu0  ;;  %v3008_v3 = vpop.f32.mrb[93].mxu1 }
0x10a3   :  { %v3014_v56 = vadd.f32 %v2967_v17, %v1848_v62  ;;  %v3016_v14 = vadd.f32 %v3008_v3, %v1921_v35  ;;  %v2969_v55 = vpop.f32.mrb[94].mxu0  ;;  %v3010_v33 = vpop.f32.mrb[94].mxu1 }
0x10a4   :  { %v4836_v63 = vmul.f32 -1.442695, %v3013_v13  ;;  %v2970_v15 = vpop.f32.mrb[95].mxu0  ;;  %v3011_v5 = vpop.f32.mrb[95].mxu1 }
0x10a5   :  { %v4837_v54 = vmul.f32 -1.442695, %v3014_v56  ;;  %v4838_v53 = vmul.f32 -1.442695, %v3016_v14 }
0x10a6   :  { %5465 = vpow2.f32 %v4836_v63 }
0x10a7   :  { %5467 = vpow2.f32 %v4837_v54 }
0x10a8   :  { %5469 = vpow2.f32 %v4838_v53 }
0x10a9   :  { %5471 = vtanh.f32 %v3015_v18 }
0x10b0   :  { %v5466_v19 = vpop.eup %5465 }
0x10b1   :  { %v5468_v10 = vpop.eup %5467  ;;  %v3020_v61 = vadd.f32 1.0, %v5466_v19 }
0x10b2   :  { %v3026_v2 = vadd.f32 1.0, %v5468_v10  ;;  %v5470_v59 = vpop.eup %5469 }
0x10b3   :  { %5473 = vrcp.f32 %v3020_v61  ;;  %v5472_v39 = vpop.eup %5471  ;;  %v3033_v0 = vadd.f32 1.0, %v5470_v59 }
0x10b4   :  { %5475 = vrcp.f32 %v3026_v2 }
0x10b5   :  { %5477 = vrcp.f32 %v3033_v0  ;;  %v3118_v0 = vld [vmem:[%s7864_s9] sm:$0xf] }
0x10bd   :  { %v5474_v26 = vpop.eup %5473 }
0x10be   :  { %v5476_v30 = vpop.eup %5475  ;;  %v3037_v1 = vmul.f32 %v5474_v26, %v5472_v39 }
0x10bf   :  { %v3036_v41 = vmul.f32 %v5476_v30, %v7230_v12  ;;  %v5478_v15 = vpop.eup %5477 }
0x10c1   :  { %v7358_v62 = vpop.f32.mrb[96].mxu0  ;;  %v7360_v52 = vpop.f32.mrb[96].mxu1  ;;  %v3038_v35 = vadd.f32 %v3037_v1, %v3036_v41 }
0x10c2   :  { %v7362_v42 = vpop.f32.mrb[97].mxu0  ;;  %v7364_v22 = vpop.f32.mrb[97].mxu1 }
0x10c3   :  { %v7366_v13 = vpop.f32.mrb[98].mxu0  ;;  %v7368_v18 = vpop.f32.mrb[98].mxu1  ;;  %5479 = vtanh.f32 %v3038_v35 }
0x10c4   :  { %v7370_v17 = vpop.f32.mrb[99].mxu0  ;;  %v7372_v3 = vpop.f32.mrb[99].mxu1 }
0x10c9   :  { %v7374_v12 = vpop.f32.mrb[100].mxu0  ;;  %v7376_v56 = vpop.f32.mrb[100].mxu1 }
0x10ca   :  { %7975 = vst [vmem:[#allocation22_spill] sm:$0xff] %v7376_v56  ;;  %v7378_v14 = vpop.f32.mrb[101].mxu0  ;;  %v7380_v55 = vpop.f32.mrb[101].mxu1 }
0x10cb   :  { %7976 = vst [vmem:[#allocation20_spill] sm:$0xff] %v7378_v14  ;;  %7977 = vst [vmem:[#allocation23_spill] sm:$0xff] %v7380_v55  ;;  %v7382_v33 = vpop.f32.mrb[102].mxu0  ;;  %v7384_v63 = vpop.f32.mrb[102].mxu1 }
0x10cc   :  { %7978 = vst [vmem:[#allocation21_spill] sm:$0xff] %v7382_v33  ;;  %7979 = vst [vmem:[#allocation24_spill] sm:$0xff] %v7384_v63  ;;  %v7386_v5 = vpop.f32.mrb[103].mxu0  ;;  %v7388_v54 = vpop.f32.mrb[103].mxu1 }
0x10cd   :  { %7980 = vst [vmem:[#allocation25_spill] sm:$0xff] %v7386_v5  ;;  %7981 = vst [vmem:[#allocation28_spill] sm:$0xff] %v7388_v54  ;;  %v5480_v53 = vpop.eup %5479 }
0x10ce   :  { %v3040_v19 = vmul.f32 %v5480_v53, %v5478_v15 }
0x10d0   :  { %v3053_v10 = vpack.c.bf16 %v3040_v19, %v7233_v45 }
0x10d1   :  { %v7391_v61 = vpop.f32.mrb[104].mxu0  ;;  %v7393_v2 = vpop.f32.mrb[104].mxu1 }
0x10d2   :  { %7982 = vst [vmem:[#allocation26_spill] sm:$0xff] %v7391_v61  ;;  %7983 = vst [vmem:[#allocation30_spill] sm:$0xff] %v7393_v2  ;;  %v7395_v59 = vpop.f32.mrb[105].mxu0  ;;  %v7397_v39 = vpop.f32.mrb[105].mxu1  ;;  %3363 = vmatmul.mubr.bf16.gmra.mrb[108].mxu0 %v3053_v10  ;;  %3436 = vmatmul.mubr.bf16.gmra.mrb[108].mxu1 %v3053_v10 }
0x10d3   :  { %7984 = vst [vmem:[#allocation27_spill] sm:$0xff] %v7395_v59  ;;  %7985 = vst [vmem:[#allocation31_spill] sm:$0xff] %v7397_v39  ;;  %v7399_v26 = vpop.f32.mrb[106].mxu0  ;;  %v7401_v30 = vpop.f32.mrb[106].mxu1  ;;  %3674 = vmatprep.mubr.bf16.mxu0 %v7903_v38  ;;  %3715 = vmatprep.mubr.bf16.mxu1 %v7903_v38 }
0x10d4   :  { %7986 = vst [vmem:[#allocation29_spill] sm:$0xff] %v7399_v26  ;;  %7987 = vst [vmem:[#allocation32_spill] sm:$0xff] %v7401_v30  ;;  %v7405_v1 = vpop.f32.mrb[107].mxu0  ;;  %v7407_v45 = vpop.f32.mrb[107].mxu1  ;;  %v7997_v30 = vld [vmem:[#allocation17_spill] sm:$0xff] }
0x10d5   :  { %7988 = vst [vmem:[#allocation33_spill] sm:$0xff] %v7405_v1  ;;  %7989 = vst [vmem:[#allocation36_spill] sm:$0xff] %v7407_v45  ;;  %v7996_v45 = vld [vmem:[#allocation16_spill] sm:$0xff]  ;;  %v7464_v26 = vrot.slane %v3118_v0, %v7997_v30 }
0x10d6   :  { %v7461_v1 = vrot.slane %v3118_v0, %v7996_v45 }
0x10d7   :  { %v3408_v45 = vadd.f32 %v7360_v52, %v7464_v26 }
0x10da   :  { %3675 = vmatmul.mubr.bf16.vlgmr.msra.gmra.mrb[112].mxu0 %v7903_v38  ;;  %3716 = vmatmul.mubr.bf16.vlgmr.msra.gmra.mrb[112].mxu1 %v7903_v38 }
0x10db   :  { %3758 = vmatpush1.bf16.msra.mxu0 %v7255_v31  ;;  %3799 = vmatpush1.bf16.msra.mxu1 %v7257_v58 }
0x10dc   :  { %3759 = vmatprep.subr.bf16.mxu0 %v7263_v49  ;;  %3800 = vmatprep.subr.bf16.mxu1 %v7265_v21 }
0x10dd   :  { %3789 = vmatprep.mubr.bf16.mxu0 %v7903_v38  ;;  %3830 = vmatprep.mubr.bf16.mxu1 %v7903_v38 }
0x10df   :  { %3760 = vmatpush1.bf16.msra.mxu0 %v7267_v23  ;;  %3801 = vmatpush1.bf16.msra.mxu1 %v7269_v24 }
0x10e0   :  { %3761 = vmatprep.subr.bf16.mxu0 %v7275_v25  ;;  %3802 = vmatprep.subr.bf16.mxu1 %v7277_v6 }
0x10e3   :  { %3762 = vmatpush1.bf16.msra.mxu0 %v7279_v7  ;;  %3803 = vmatpush1.bf16.msra.mxu1 %v7281_v9 }
0x10e4   :  { %3763 = vmatprep.subr.bf16.mxu0 %v7287_v4  ;;  %3804 = vmatprep.subr.bf16.mxu1 %v7289_v16 }
0x10e7   :  { %3764 = vmatpush1.bf16.msra.mxu0 %v7291_v20  ;;  %3805 = vmatpush1.bf16.msra.mxu1 %v7293_v11 }
0x10e8   :  { %3765 = vmatprep.subr.bf16.mxu0 %v7299_v34  ;;  %3806 = vmatprep.subr.bf16.mxu1 %v7301_v36 }
0x10eb   :  { %3766 = vmatpush1.bf16.msra.mxu0 %v7303_v29  ;;  %3807 = vmatpush1.bf16.msra.mxu1 %v7305_v28 }
0x10ec   :  { %3767 = vmatprep.subr.bf16.mxu0 %v7311_v48  ;;  %3808 = vmatprep.subr.bf16.mxu1 %v7313_v60 }
0x10ef   :  { %3768 = vmatpush1.bf16.msra.mxu0 %v7315_v43  ;;  %3809 = vmatpush1.bf16.msra.mxu1 %v7317_v47 }
0x10f0   :  { %3769 = vmatprep.subr.bf16.mxu0 %v7323_v44  ;;  %3810 = vmatprep.subr.bf16.mxu1 %v7325_v46 }
0x10f3   :  { %3770 = vmatpush1.bf16.msra.mxu0 %v7327_v50  ;;  %3811 = vmatpush1.bf16.msra.mxu1 %v7329_v51 }
0x10f4   :  { %3771 = vmatprep.subr.bf16.mxu0 %v7335_v57  ;;  %3812 = vmatprep.subr.bf16.mxu1 %v7337_v40 }
0x10f7   :  { %3772 = vmatpush1.bf16.msra.mxu0 %v7339_v8  ;;  %3813 = vmatpush1.bf16.msra.mxu1 %v7341_v37 }
0x10f8   :  { %3872 = vmatprep.subr.bf16.mxu0 %v7251_v32  ;;  %3913 = vmatprep.subr.bf16.mxu1 %v7253_v27 }
0x11a5   :  { %v7448_v41 = vpop.f32.mrb[108].mxu0  ;;  %v7450_v35 = vpop.f32.mrb[108].mxu1 }
0x11a6   :  { %7990 = vst [vmem:[#allocation34_spill] sm:$0xff] %v7448_v41  ;;  %7991 = vst [vmem:[#allocation38_spill] sm:$0xff] %v7450_v35  ;;  %v7452_v15 = vpop.f32.mrb[109].mxu0  ;;  %v7454_v53 = vpop.f32.mrb[109].mxu1  ;;  %v8000_v41 = vld [vmem:[#allocation18_spill] sm:$0xff] }
0x11a7   :  { %7992 = vst [vmem:[#allocation35_spill] sm:$0xff] %v7452_v15  ;;  %7993 = vst [vmem:[#allocation39_spill] sm:$0xff] %v7454_v53  ;;  %v7456_v19 = vpop.f32.mrb[110].mxu0  ;;  %v7458_v10 = vpop.f32.mrb[110].mxu1  ;;  %v7471_v35 = vrot.slane %v3118_v0, %v8000_v41  ;;  %v8001_v15 = vld [vmem:[#allocation19_spill] sm:$0xff] }
0x11a8   :  { %7994 = vst [vmem:[#allocation37_spill] sm:$0xff] %v7456_v19  ;;  %7995 = vst [vmem:[#allocation40_spill] sm:$0xff] %v7458_v10  ;;  %v7466_v39 = vpop.f32.mrb[111].mxu0  ;;  %v7468_v59 = vpop.f32.mrb[111].mxu1  ;;  %v7474_v2 = vrot.slane %v3118_v0, %v8001_v15  ;;  %v3335_v19 = vadd.f32 %v7358_v62, %v7461_v1 }
0x11a9   :  { %7998 = vst [vmem:[#allocation41_spill] sm:$0xff] %v7466_v39  ;;  %7999 = vst [vmem:[#allocation42_spill] sm:$0xff] %v7468_v59  ;;  %v3337_v30 = vadd.f32 %v7362_v42, %v7471_v35 }
0x11aa   :  { %v3410_v39 = vadd.f32 %v7364_v22, %v7474_v2 }
0x11ad   :  { %v3676_v10 = vpop.f32.mrb[112].mxu0  ;;  %v3717_v59 = vpop.f32.mrb[112].mxu1 }
0x11ae   :  { %v3724_v53 = vadd.f32 %v3676_v10, %v3335_v19  ;;  %v3726_v41 = vadd.f32 %v3717_v59, %v3408_v45  ;;  %v3678_v61 = vpop.f32.mrb[113].mxu0  ;;  %v3719_v54 = vpop.f32.mrb[113].mxu1 }
0x11af   :  { %v3725_v0 = vadd.f32 %v3678_v61, %v3337_v30  ;;  %v3727_v15 = vadd.f32 %v3719_v54, %v3410_v39  ;;  %v3680_v5 = vpop.f32.mrb[114].mxu0  ;;  %v3721_v63 = vpop.f32.mrb[114].mxu1  ;;  %v3412_v30 = vadd.f32 %v7368_v18, %v7464_v26 }
0x11b0   :  { %v4903_v62 = vmul.f32 -1.442695, %v3724_v53  ;;  %v3681_v33 = vpop.f32.mrb[115].mxu0  ;;  %v3722_v55 = vpop.f32.mrb[115].mxu1 }
0x11b1   :  { %v4904_v52 = vmul.f32 -1.442695, %v3725_v0  ;;  %v4905_v42 = vmul.f32 -1.442695, %v3727_v15  ;;  %v3414_v0 = vadd.f32 %v7372_v3, %v7474_v2 }
0x11b2   :  { %5481 = vpow2.f32 %v4903_v62 }
0x11b3   :  { %5483 = vpow2.f32 %v4904_v52 }
0x11b4   :  { %5485 = vpow2.f32 %v4905_v42 }
0x11b5   :  { %5487 = vtanh.f32 %v3726_v41  ;;  %v3341_v41 = vadd.f32 %v7370_v17, %v7471_v35 }
0x11bc   :  { %v5482_v14 = vpop.eup %5481 }
0x11bd   :  { %v5484_v56 = vpop.eup %5483  ;;  %v3731_v22 = vadd.f32 1.0, %v5482_v14 }
0x11be   :  { %v3737_v19 = vadd.f32 1.0, %v5484_v56  ;;  %v5486_v59 = vpop.eup %5485  ;;  %v3339_v56 = vadd.f32 %v7366_v13, %v7461_v1 }
0x11bf   :  { %5489 = vrcp.f32 %v3731_v22  ;;  %v5488_v61 = vpop.eup %5487  ;;  %v3744_v39 = vadd.f32 1.0, %v5486_v59 }
0x11c0   :  { %5491 = vrcp.f32 %v3737_v19 }
0x11c1   :  { %5493 = vrcp.f32 %v3744_v39 }
0x11c9   :  { %v5490_v54 = vpop.eup %5489 }
0x11ca   :  { %v5492_v5 = vpop.eup %5491  ;;  %v3748_v63 = vmul.f32 %v5490_v54, %v5488_v61 }
0x11cb   :  { %v3747_v33 = vmul.f32 0.0, %v5492_v5  ;;  %v5494_v53 = vpop.eup %5493 }
0x11cd   :  { %v7484_v55 = vadd.f32 %v3748_v63, %v3747_v33 }
0x11cf   :  { %5495 = vtanh.f32 %v7484_v55 }
0x11d9   :  { %v5496_v10 = vpop.eup %5495 }
0x11da   :  { %v3751_v14 = vmul.f32 %v5496_v10, %v5494_v53 }
0x11dc   :  { %v3756_v45 = vpack.c.bf16 %v3751_v14, %v3751_v14 }
0x11de   :  { %3790 = vmatmul.mubr.bf16.vlgmr.msra.gmra.mrb[116].mxu0 %v3756_v45  ;;  %3831 = vmatmul.mubr.bf16.vlgmr.msra.gmra.mrb[116].mxu1 %v3756_v45 }
0x11df   :  { %3873 = vmatpush1.bf16.msra.mxu0 %v7255_v31  ;;  %3914 = vmatpush1.bf16.msra.mxu1 %v7257_v58 }
0x11e0   :  { %3874 = vmatprep.subr.bf16.mxu0 %v7263_v49  ;;  %3915 = vmatprep.subr.bf16.mxu1 %v7265_v21 }
0x11e1   :  { %3904 = vmatprep.mubr.bf16.mxu0 %v7903_v38  ;;  %3945 = vmatprep.mubr.bf16.mxu1 %v7903_v38 }
0x11e3   :  { %3875 = vmatpush1.bf16.msra.mxu0 %v7267_v23  ;;  %3916 = vmatpush1.bf16.msra.mxu1 %v7269_v24 }
0x11e4   :  { %3876 = vmatprep.subr.bf16.mxu0 %v7275_v25  ;;  %3917 = vmatprep.subr.bf16.mxu1 %v7277_v6 }
0x11e7   :  { %3877 = vmatpush1.bf16.msra.mxu0 %v7279_v7  ;;  %3918 = vmatpush1.bf16.msra.mxu1 %v7281_v9 }
0x11e8   :  { %3878 = vmatprep.subr.bf16.mxu0 %v7287_v4  ;;  %3919 = vmatprep.subr.bf16.mxu1 %v7289_v16 }
0x11eb   :  { %3879 = vmatpush1.bf16.msra.mxu0 %v7291_v20  ;;  %3920 = vmatpush1.bf16.msra.mxu1 %v7293_v11 }
0x11ec   :  { %3880 = vmatprep.subr.bf16.mxu0 %v7299_v34  ;;  %3921 = vmatprep.subr.bf16.mxu1 %v7301_v36 }
0x11ef   :  { %3881 = vmatpush1.bf16.msra.mxu0 %v7303_v29  ;;  %3922 = vmatpush1.bf16.msra.mxu1 %v7305_v28 }
0x11f0   :  { %3882 = vmatprep.subr.bf16.mxu0 %v7311_v48  ;;  %3923 = vmatprep.subr.bf16.mxu1 %v7313_v60 }
0x11f3   :  { %3883 = vmatpush1.bf16.msra.mxu0 %v7315_v43  ;;  %3924 = vmatpush1.bf16.msra.mxu1 %v7317_v47 }
0x11f4   :  { %3884 = vmatprep.subr.bf16.mxu0 %v7323_v44  ;;  %3925 = vmatprep.subr.bf16.mxu1 %v7325_v46 }
0x11f7   :  { %3885 = vmatpush1.bf16.msra.mxu0 %v7327_v50  ;;  %3926 = vmatpush1.bf16.msra.mxu1 %v7329_v51 }
0x11f8   :  { %3886 = vmatprep.subr.bf16.mxu0 %v7335_v57  ;;  %3927 = vmatprep.subr.bf16.mxu1 %v7337_v40 }
0x11fb   :  { %3887 = vmatpush1.bf16.msra.mxu0 %v7339_v8  ;;  %3928 = vmatpush1.bf16.msra.mxu1 %v7341_v37 }
0x11fc   :  { %3987 = vmatprep.subr.bf16.mxu0 %v7251_v32  ;;  %4028 = vmatprep.subr.bf16.mxu1 %v7253_v27 }
0x12b1   :  { %v3791_v15 = vpop.f32.mrb[116].mxu0  ;;  %v3832_v62 = vpop.f32.mrb[116].mxu1 }
0x12b2   :  { %v3839_v52 = vadd.f32 %v3791_v15, %v3339_v56  ;;  %v3841_v42 = vadd.f32 %v3832_v62, %v3412_v30  ;;  %v3793_v22 = vpop.f32.mrb[117].mxu0  ;;  %v3834_v19 = vpop.f32.mrb[117].mxu1 }
0x12b3   :  { %v3840_v59 = vadd.f32 %v3793_v22, %v3341_v41  ;;  %v3842_v61 = vadd.f32 %v3834_v19, %v3414_v0  ;;  %v3795_v54 = vpop.f32.mrb[118].mxu0  ;;  %v3836_v5 = vpop.f32.mrb[118].mxu1 }
0x12b4   :  { %v4906_v13 = vmul.f32 -1.442695, %v3839_v52  ;;  %v3796_v63 = vpop.f32.mrb[119].mxu0  ;;  %v3837_v39 = vpop.f32.mrb[119].mxu1  ;;  %v8003_v54 = vld [vmem:[#allocation20_spill] sm:$0xff] }
0x12b5   :  { %v4907_v18 = vmul.f32 -1.442695, %v3840_v59  ;;  %v4908_v17 = vmul.f32 -1.442695, %v3842_v61  ;;  %v8002_v59 = vld [vmem:[#allocation22_spill] sm:$0xff]  ;;  %v3347_v5 = vadd.f32 %v8003_v54, %v7471_v35 }
0x12b6   :  { %5497 = vpow2.f32 %v4906_v13  ;;  %v3418_v61 = vadd.f32 %v8002_v59, %v7464_v26  ;;  %v8004_v13 = vld [vmem:[#allocation23_spill] sm:$0xff] }
0x12b7   :  { %5499 = vpow2.f32 %v4907_v18  ;;  %v3420_v63 = vadd.f32 %v8004_v13, %v7474_v2 }
0x12b8   :  { %5501 = vpow2.f32 %v4908_v17 }
0x12b9   :  { %5503 = vtanh.f32 %v3841_v42 }
0x12c0   :  { %v5498_v33 = vpop.eup %5497 }
0x12c1   :  { %v5500_v53 = vpop.eup %5499  ;;  %v3846_v3 = vadd.f32 1.0, %v5498_v33 }
0x12c2   :  { %v3852_v10 = vadd.f32 1.0, %v5500_v53  ;;  %v5502_v14 = vpop.eup %5501 }
0x12c3   :  { %5505 = vrcp.f32 %v3846_v3  ;;  %v5504_v45 = vpop.eup %5503  ;;  %v3859_v0 = vadd.f32 1.0, %v5502_v14 }
0x12c4   :  { %5507 = vrcp.f32 %v3852_v10 }
0x12c5   :  { %5509 = vrcp.f32 %v3859_v0 }
0x12cd   :  { %v5506_v56 = vpop.eup %5505 }
0x12ce   :  { %v5508_v30 = vpop.eup %5507  ;;  %v3863_v41 = vmul.f32 %v5506_v56, %v5504_v45 }
0x12cf   :  { %v3862_v15 = vmul.f32 %v5508_v30, %v7484_v55  ;;  %v5510_v52 = vpop.eup %5509  ;;  %v3345_v55 = vadd.f32 %v7374_v12, %v7461_v1 }
0x12d1   :  { %v7530_v62 = vadd.f32 %v3863_v41, %v3862_v15 }
0x12d3   :  { %5511 = vtanh.f32 %v7530_v62 }
0x12dd   :  { %v5512_v22 = vpop.eup %5511 }
0x12de   :  { %v3866_v19 = vmul.f32 %v5512_v22, %v5510_v52 }
0x12e0   :  { %v3871_v42 = vpack.c.bf16 %v3866_v19, %v3866_v19 }
0x12e2   :  { %3905 = vmatmul.mubr.bf16.vlgmr.msra.gmra.mrb[120].mxu0 %v3871_v42  ;;  %3946 = vmatmul.mubr.bf16.vlgmr.msra.gmra.mrb[120].mxu1 %v3871_v42 }
0x12e3   :  { %3988 = vmatpush1.bf16.msra.mxu0 %v7255_v31  ;;  %4029 = vmatpush1.bf16.msra.mxu1 %v7257_v58 }
0x12e4   :  { %3989 = vmatprep.subr.bf16.mxu0 %v7263_v49  ;;  %4030 = vmatprep.subr.bf16.mxu1 %v7265_v21 }
0x12e5   :  { %4019 = vmatprep.mubr.bf16.mxu0 %v7903_v38  ;;  %4060 = vmatprep.mubr.bf16.mxu1 %v7903_v38 }
0x12e7   :  { %3990 = vmatpush1.bf16.msra.mxu0 %v7267_v23  ;;  %4031 = vmatpush1.bf16.msra.mxu1 %v7269_v24 }
0x12e8   :  { %3991 = vmatprep.subr.bf16.mxu0 %v7275_v25  ;;  %4032 = vmatprep.subr.bf16.mxu1 %v7277_v6 }
0x12eb   :  { %3992 = vmatpush1.bf16.msra.mxu0 %v7279_v7  ;;  %4033 = vmatpush1.bf16.msra.mxu1 %v7281_v9 }
0x12ec   :  { %3993 = vmatprep.subr.bf16.mxu0 %v7287_v4  ;;  %4034 = vmatprep.subr.bf16.mxu1 %v7289_v16 }
0x12ef   :  { %3994 = vmatpush1.bf16.msra.mxu0 %v7291_v20  ;;  %4035 = vmatpush1.bf16.msra.mxu1 %v7293_v11 }
0x12f0   :  { %3995 = vmatprep.subr.bf16.mxu0 %v7299_v34  ;;  %4036 = vmatprep.subr.bf16.mxu1 %v7301_v36 }
0x12f3   :  { %3996 = vmatpush1.bf16.msra.mxu0 %v7303_v29  ;;  %4037 = vmatpush1.bf16.msra.mxu1 %v7305_v28 }
0x12f4   :  { %3997 = vmatprep.subr.bf16.mxu0 %v7311_v48  ;;  %4038 = vmatprep.subr.bf16.mxu1 %v7313_v60 }
0x12f7   :  { %3998 = vmatpush1.bf16.msra.mxu0 %v7315_v43  ;;  %4039 = vmatpush1.bf16.msra.mxu1 %v7317_v47 }
0x12f8   :  { %3999 = vmatprep.subr.bf16.mxu0 %v7323_v44  ;;  %4040 = vmatprep.subr.bf16.mxu1 %v7325_v46 }
0x12fb   :  { %4000 = vmatpush1.bf16.msra.mxu0 %v7327_v50  ;;  %4041 = vmatpush1.bf16.msra.mxu1 %v7329_v51 }
0x12fc   :  { %4001 = vmatprep.subr.bf16.mxu0 %v7335_v57  ;;  %4042 = vmatprep.subr.bf16.mxu1 %v7337_v40 }
0x12ff   :  { %4002 = vmatpush1.bf16.msra.mxu0 %v7339_v8  ;;  %4043 = vmatpush1.bf16.msra.mxu1 %v7341_v37 }
0x1300   :  { %4102 = vmatprep.subr.bf16.mxu0 %v7251_v32  ;;  %4143 = vmatprep.subr.bf16.mxu1 %v7253_v27 }
0x13b5   :  { %v3906_v39 = vpop.f32.mrb[120].mxu0  ;;  %v3947_v18 = vpop.f32.mrb[120].mxu1 }
0x13b6   :  { %v3954_v17 = vadd.f32 %v3906_v39, %v3345_v55  ;;  %v3956_v33 = vadd.f32 %v3947_v18, %v3418_v61  ;;  %v3908_v53 = vpop.f32.mrb[121].mxu0  ;;  %v3949_v3 = vpop.f32.mrb[121].mxu1 }
0x13b7   :  { %v3955_v10 = vadd.f32 %v3908_v53, %v3347_v5  ;;  %v3957_v14 = vadd.f32 %v3949_v3, %v3420_v63  ;;  %v3910_v45 = vpop.f32.mrb[122].mxu0  ;;  %v3951_v56 = vpop.f32.mrb[122].mxu1 }
0x13b8   :  { %v4909_v12 = vmul.f32 -1.442695, %v3954_v17  ;;  %v3911_v30 = vpop.f32.mrb[123].mxu0  ;;  %v3952_v41 = vpop.f32.mrb[123].mxu1  ;;  %v8007_v45 = vld [vmem:[#allocation25_spill] sm:$0xff] }
0x13b9   :  { %v4910_v0 = vmul.f32 -1.442695, %v3955_v10  ;;  %v4911_v15 = vmul.f32 -1.442695, %v3957_v14  ;;  %v8006_v10 = vld [vmem:[#allocation24_spill] sm:$0xff]  ;;  %v3351_v56 = vadd.f32 %v8007_v45, %v7471_v35 }
0x13ba   :  { %5513 = vpow2.f32 %v4909_v12  ;;  %v3422_v14 = vadd.f32 %v8006_v10, %v7464_v26  ;;  %v8008_v12 = vld [vmem:[#allocation28_spill] sm:$0xff] }
0x13bb   :  { %5515 = vpow2.f32 %v4910_v0  ;;  %v3424_v30 = vadd.f32 %v8008_v12, %v7474_v2 }
0x13bc   :  { %5517 = vpow2.f32 %v4911_v15 }
0x13bd   :  { %5519 = vtanh.f32 %v3956_v33 }
0x13c4   :  { %v5514_v52 = vpop.eup %5513 }
0x13c5   :  { %v5516_v22 = vpop.eup %5515  ;;  %v3961_v19 = vadd.f32 1.0, %v5514_v52 }
0x13c6   :  { %v3967_v42 = vadd.f32 1.0, %v5516_v22  ;;  %v5518_v55 = vpop.eup %5517 }
0x13c7   :  { %5521 = vrcp.f32 %v3961_v19  ;;  %v5520_v59 = vpop.eup %5519  ;;  %v3974_v13 = vadd.f32 1.0, %v5518_v55 }
0x13c8   :  { %5523 = vrcp.f32 %v3967_v42 }
0x13c9   :  { %5525 = vrcp.f32 %v3974_v13 }
0x13d1   :  { %v5522_v61 = vpop.eup %5521 }
0x13d2   :  { %v5524_v54 = vpop.eup %5523  ;;  %v3978_v5 = vmul.f32 %v5522_v61, %v5520_v59 }
0x13d3   :  { %v3977_v63 = vmul.f32 %v5524_v54, %v7530_v62  ;;  %v5526_v18 = vpop.eup %5525  ;;  %v8005_v62 = vld [vmem:[#allocation21_spill] sm:$0xff] }
0x13d4   :  { %v3349_v3 = vadd.f32 %v8005_v62, %v7461_v1 }
0x13d5   :  { %v7576_v39 = vadd.f32 %v3978_v5, %v3977_v63 }
0x13d7   :  { %5527 = vtanh.f32 %v7576_v39 }
0x13e1   :  { %v5528_v17 = vpop.eup %5527 }
0x13e2   :  { %v3981_v53 = vmul.f32 %v5528_v17, %v5526_v18 }
0x13e4   :  { %v3986_v33 = vpack.c.bf16 %v3981_v53, %v3981_v53 }
0x13e6   :  { %4020 = vmatmul.mubr.bf16.vlgmr.msra.gmra.mrb[124].mxu0 %v3986_v33  ;;  %4061 = vmatmul.mubr.bf16.vlgmr.msra.gmra.mrb[124].mxu1 %v3986_v33 }
0x13e7   :  { %4103 = vmatpush1.bf16.msra.mxu0 %v7255_v31  ;;  %4144 = vmatpush1.bf16.msra.mxu1 %v7257_v58 }
0x13e8   :  { %4104 = vmatprep.subr.bf16.mxu0 %v7263_v49  ;;  %4145 = vmatprep.subr.bf16.mxu1 %v7265_v21 }
0x13e9   :  { %4134 = vmatprep.mubr.bf16.mxu0 %v7903_v38  ;;  %4175 = vmatprep.mubr.bf16.mxu1 %v7903_v38 }
0x13eb   :  { %4105 = vmatpush1.bf16.msra.mxu0 %v7267_v23  ;;  %4146 = vmatpush1.bf16.msra.mxu1 %v7269_v24 }
0x13ec   :  { %4106 = vmatprep.subr.bf16.mxu0 %v7275_v25  ;;  %4147 = vmatprep.subr.bf16.mxu1 %v7277_v6 }
0x13ef   :  { %4107 = vmatpush1.bf16.msra.mxu0 %v7279_v7  ;;  %4148 = vmatpush1.bf16.msra.mxu1 %v7281_v9 }
0x13f0   :  { %4108 = vmatprep.subr.bf16.mxu0 %v7287_v4  ;;  %4149 = vmatprep.subr.bf16.mxu1 %v7289_v16 }
0x13f3   :  { %4109 = vmatpush1.bf16.msra.mxu0 %v7291_v20  ;;  %4150 = vmatpush1.bf16.msra.mxu1 %v7293_v11 }
0x13f4   :  { %4110 = vmatprep.subr.bf16.mxu0 %v7299_v34  ;;  %4151 = vmatprep.subr.bf16.mxu1 %v7301_v36 }
0x13f7   :  { %4111 = vmatpush1.bf16.msra.mxu0 %v7303_v29  ;;  %4152 = vmatpush1.bf16.msra.mxu1 %v7305_v28 }
0x13f8   :  { %4112 = vmatprep.subr.bf16.mxu0 %v7311_v48  ;;  %4153 = vmatprep.subr.bf16.mxu1 %v7313_v60 }
0x13fb   :  { %4113 = vmatpush1.bf16.msra.mxu0 %v7315_v43  ;;  %4154 = vmatpush1.bf16.msra.mxu1 %v7317_v47 }
0x13fc   :  { %4114 = vmatprep.subr.bf16.mxu0 %v7323_v44  ;;  %4155 = vmatprep.subr.bf16.mxu1 %v7325_v46 }
0x13ff   :  { %4115 = vmatpush1.bf16.msra.mxu0 %v7327_v50  ;;  %4156 = vmatpush1.bf16.msra.mxu1 %v7329_v51 }
0x1400   :  { %4116 = vmatprep.subr.bf16.mxu0 %v7335_v57  ;;  %4157 = vmatprep.subr.bf16.mxu1 %v7337_v40 }
0x1403   :  { %4117 = vmatpush1.bf16.msra.mxu0 %v7339_v8  ;;  %4158 = vmatpush1.bf16.msra.mxu1 %v7341_v37 }
0x1404   :  { %4217 = vmatprep.subr.bf16.mxu0 %v7251_v32  ;;  %4258 = vmatprep.subr.bf16.mxu1 %v7253_v27 }
0x14b9   :  { %v4021_v41 = vpop.f32.mrb[124].mxu0  ;;  %v4062_v0 = vpop.f32.mrb[124].mxu1 }
0x14ba   :  { %v4069_v15 = vadd.f32 %v4021_v41, %v3349_v3  ;;  %v4071_v52 = vadd.f32 %v4062_v0, %v3422_v14  ;;  %v4023_v22 = vpop.f32.mrb[125].mxu0  ;;  %v4064_v19 = vpop.f32.mrb[125].mxu1 }
0x14bb   :  { %v4070_v42 = vadd.f32 %v4023_v22, %v3351_v56  ;;  %v4072_v55 = vadd.f32 %v4064_v19, %v3424_v30  ;;  %v4025_v59 = vpop.f32.mrb[126].mxu0  ;;  %v4066_v61 = vpop.f32.mrb[126].mxu1 }
0x14bc   :  { %v4912_v54 = vmul.f32 -1.442695, %v4069_v15  ;;  %v4026_v5 = vpop.f32.mrb[127].mxu0  ;;  %v4067_v13 = vpop.f32.mrb[127].mxu1 }
0x14bd   :  { %v4913_v63 = vmul.f32 -1.442695, %v4070_v42  ;;  %v4914_v18 = vmul.f32 -1.442695, %v4072_v55  ;;  %v7671_v5 = vld [vmem:[#allocation12] ss:$16 sps:$4 sm:$0xff]  }
0x14be   :  { %5529 = vpow2.f32 %v4912_v54  ;;  %v7674_v13 = vld [vmem:[#allocation12 + $0x8] ss:$16 sps:$4 sm:$0xff]  }
0x14bf   :  { %5531 = vpow2.f32 %v4913_v63  ;;  %v7677_v63 = vld [vmem:[#allocation12 + $0x24] ss:$16 sps:$4 sm:$0xff]  }
0x14c0   :  { %5533 = vpow2.f32 %v4914_v18  ;;  %v7680_v18 = vld [vmem:[#allocation12 + $0x2c] ss:$16 sps:$4 sm:$0xff]  }
0x14c1   :  { %5535 = vtanh.f32 %v4071_v52 }
0x14c8   :  { %v5530_v17 = vpop.eup %5529 }
0x14c9   :  { %v5532_v53 = vpop.eup %5531  ;;  %v4076_v33 = vadd.f32 1.0, %v5530_v17  ;;  %v7685_v17 = vld [vmem:[#allocation12 + $0x20] ss:$16 sps:$4 sm:$0xff]  }
0x14ca   :  { %v4082_v62 = vadd.f32 1.0, %v5532_v53  ;;  %v5534_v3 = vpop.eup %5533  ;;  %v7688_v53 = vld [vmem:[#allocation12 + $0x28] ss:$16 sps:$4 sm:$0xff]  }
0x14cb   :  { %5537 = vrcp.f32 %v4076_v33  ;;  %v5536_v10 = vpop.eup %5535  ;;  %v4089_v12 = vadd.f32 1.0, %v5534_v3  ;;  %v7691_v33 = vld [vmem:[#allocation12 + $0x44] ss:$16 sps:$4 sm:$0xff]   ;;  %v7697_v3 = vld [vmem:[#allocation12 + $0x40] ss:$16 sps:$4 sm:$0xff]  }
0x14cc   :  { %5539 = vrcp.f32 %v4082_v62  ;;  %v7694_v62 = vld [vmem:[#allocation12 + $0x4c] ss:$16 sps:$4 sm:$0xff]  }
0x14cd   :  { %5541 = vrcp.f32 %v4089_v12  ;;  %v7712_v12 = vld [vmem:[#allocation12 + $0x68] ss:$16 sps:$4 sm:$0xff]  }
0x14d5   :  { %v5538_v14 = vpop.eup %5537 }
0x14d6   :  { %v5540_v45 = vpop.eup %5539  ;;  %v4093_v56 = vmul.f32 %v5538_v14, %v5536_v10  ;;  %v7700_v10 = vld [vmem:[#allocation12 + $0x48] ss:$16 sps:$4 sm:$0xff]   ;;  %v7703_v14 = vld [vmem:[#allocation12 + $0x64] ss:$16 sps:$4 sm:$0xff]  }
0x14d7   :  { %v4092_v30 = vmul.f32 %v5540_v45, %v7576_v39  ;;  %v5542_v0 = vpop.eup %5541  ;;  %v7706_v45 = vld [vmem:[#allocation12 + $0x6c] ss:$16 sps:$4 sm:$0xff]  }
0x14d9   :  { %v7622_v41 = vadd.f32 %v4093_v56, %v4092_v30  ;;  %v7709_v56 = vld [vmem:[#allocation12 + $0x60] ss:$16 sps:$4 sm:$0xff]   ;;  %v7715_v30 = vld [vmem:[#allocation12 + $0x84] ss:$16 sps:$4 sm:$0xff]  }
0x14db   :  { %5543 = vtanh.f32 %v7622_v41 }
0x14e5   :  { %v5544_v15 = vpop.eup %5543 }
0x14e6   :  { %v4096_v22 = vmul.f32 %v5544_v15, %v5542_v0  ;;  %v7721_v0 = vld [vmem:[#allocation12 + $0x80] ss:$16 sps:$4 sm:$0xff]   ;;  %v7724_v15 = vld [vmem:[#allocation12 + $0x88] ss:$16 sps:$4 sm:$0xff]  }
0x14e8   :  { %v4101_v52 = vpack.c.bf16 %v4096_v22, %v4096_v22  ;;  %v7727_v22 = vld [vmem:[#allocation12 + $0xa4] ss:$16 sps:$4 sm:$0xff]  }
0x14ea   :  { %4135 = vmatmul.mubr.bf16.vlgmr.msra.gmra.mrb[128].mxu0 %v4101_v52  ;;  %4176 = vmatmul.mubr.bf16.vlgmr.msra.gmra.mrb[128].mxu1 %v4101_v52  ;;  %v7730_v52 = vld [vmem:[#allocation12 + $0xac] ss:$16 sps:$4 sm:$0xff]  }
0x14eb   :  { %4218 = vmatpush1.bf16.msra.mxu0 %v7255_v31  ;;  %4259 = vmatpush1.bf16.msra.mxu1 %v7257_v58  ;;  %v8009_v31 = vld [vmem:[#allocation26_spill] sm:$0xff] }
0x14ec   :  { %4219 = vmatprep.subr.bf16.mxu0 %v7263_v49  ;;  %4260 = vmatprep.subr.bf16.mxu1 %v7265_v21  ;;  %v3355_v58 = vadd.f32 %v8009_v31, %v7461_v1  ;;  %v8010_v49 = vld [vmem:[#allocation30_spill] sm:$0xff] }
0x14ed   :  { %4249 = vmatprep.mubr.bf16.mxu0 %v7903_v38  ;;  %4290 = vmatprep.mubr.bf16.mxu1 %v7903_v38  ;;  %v3428_v21 = vadd.f32 %v8010_v49, %v7464_v26  ;;  %v7733_v31 = vld [vmem:[#allocation12 + $0xa0] ss:$16 sps:$4 sm:$0xff]   ;;  %v7739_v49 = vld [vmem:[#allocation12 + $0xc4] ss:$16 sps:$4 sm:$0xff]  }
0x14ef   :  { %4220 = vmatpush1.bf16.msra.mxu0 %v7267_v23  ;;  %4261 = vmatpush1.bf16.msra.mxu1 %v7269_v24  ;;  %v8011_v23 = vld [vmem:[#allocation27_spill] sm:$0xff] }
0x14f0   :  { %4221 = vmatprep.subr.bf16.mxu0 %v7275_v25  ;;  %4262 = vmatprep.subr.bf16.mxu1 %v7277_v6  ;;  %v3357_v24 = vadd.f32 %v8011_v23, %v7471_v35  ;;  %v8012_v25 = vld [vmem:[#allocation31_spill] sm:$0xff]  ;;  %v7745_v23 = vld [vmem:[#allocation12 + $0xc0] ss:$16 sps:$4 sm:$0xff]  }
0x14f1   :  { %v3430_v6 = vadd.f32 %v8012_v25, %v7474_v2  ;;  %v7751_v25 = vld [vmem:[#allocation12 + $0xe4] ss:$16 sps:$4 sm:$0xff]  }
0x14f3   :  { %4222 = vmatpush1.bf16.msra.mxu0 %v7279_v7  ;;  %4263 = vmatpush1.bf16.msra.mxu1 %v7281_v9 }
0x14f4   :  { %4223 = vmatprep.subr.bf16.mxu0 %v7287_v4  ;;  %4264 = vmatprep.subr.bf16.mxu1 %v7289_v16 }
0x14f7   :  { %4224 = vmatpush1.bf16.msra.mxu0 %v7291_v20  ;;  %4265 = vmatpush1.bf16.msra.mxu1 %v7293_v11 }
0x14f8   :  { %4225 = vmatprep.subr.bf16.mxu0 %v7299_v34  ;;  %4266 = vmatprep.subr.bf16.mxu1 %v7301_v36 }
0x14fb   :  { %4226 = vmatpush1.bf16.msra.mxu0 %v7303_v29  ;;  %4267 = vmatpush1.bf16.msra.mxu1 %v7305_v28 }
0x14fc   :  { %4227 = vmatprep.subr.bf16.mxu0 %v7311_v48  ;;  %4268 = vmatprep.subr.bf16.mxu1 %v7313_v60 }
0x14ff   :  { %4228 = vmatpush1.bf16.msra.mxu0 %v7315_v43  ;;  %4269 = vmatpush1.bf16.msra.mxu1 %v7317_v47 }
0x1500   :  { %4229 = vmatprep.subr.bf16.mxu0 %v7323_v44  ;;  %4270 = vmatprep.subr.bf16.mxu1 %v7325_v46 }
0x1503   :  { %4230 = vmatpush1.bf16.msra.mxu0 %v7327_v50  ;;  %4271 = vmatpush1.bf16.msra.mxu1 %v7329_v51 }
0x1504   :  { %4231 = vmatprep.subr.bf16.mxu0 %v7335_v57  ;;  %4272 = vmatprep.subr.bf16.mxu1 %v7337_v40 }
0x1507   :  { %4232 = vmatpush1.bf16.msra.mxu0 %v7339_v8  ;;  %4273 = vmatpush1.bf16.msra.mxu1 %v7341_v37 }
0x1508   :  { %4332 = vmatprep.subr.bf16.mxu0 %v7251_v32  ;;  %4373 = vmatprep.subr.bf16.mxu1 %v7253_v27 }
0x15bd   :  { %v4136_v7 = vpop.f32.mrb[128].mxu0  ;;  %v4177_v9 = vpop.f32.mrb[128].mxu1 }
0x15be   :  { %v4184_v4 = vadd.f32 %v4136_v7, %v3355_v58  ;;  %v4186_v16 = vadd.f32 %v4177_v9, %v3428_v21  ;;  %v4138_v20 = vpop.f32.mrb[129].mxu0  ;;  %v4179_v32 = vpop.f32.mrb[129].mxu1  ;;  %v7736_v58 = vld [vmem:[#allocation12 + $0xa8] ss:$16 sps:$4 sm:$0xff]   ;;  %v7742_v21 = vld [vmem:[#allocation12 + $0xcc] ss:$16 sps:$4 sm:$0xff]  }
0x15bf   :  { %v4185_v11 = vadd.f32 %v4138_v20, %v3357_v24  ;;  %v4187_v27 = vadd.f32 %v4179_v32, %v3430_v6  ;;  %v4140_v34 = vpop.f32.mrb[130].mxu0  ;;  %v4181_v36 = vpop.f32.mrb[130].mxu1  ;;  %v7748_v24 = vld [vmem:[#allocation12 + $0xc8] ss:$16 sps:$4 sm:$0xff]   ;;  %v7754_v6 = vld [vmem:[#allocation12 + $0xec] ss:$16 sps:$4 sm:$0xff]  }
0x15c0   :  { %v4915_v29 = vmul.f32 -1.442695, %v4184_v4  ;;  %v4141_v28 = vpop.f32.mrb[131].mxu0  ;;  %v4182_v48 = vpop.f32.mrb[131].mxu1  ;;  %v7757_v7 = vld [vmem:[#allocation12 + $0xe0] ss:$16 sps:$4 sm:$0xff]  }
0x15c1   :  { %v4916_v60 = vmul.f32 -1.442695, %v4185_v11  ;;  %v4917_v43 = vmul.f32 -1.442695, %v4187_v27  ;;  %v7760_v9 = vld [vmem:[#allocation12 + $0xe8] ss:$16 sps:$4 sm:$0xff]  }
0x15c2   :  { %5545 = vpow2.f32 %v4915_v29  ;;  %v5703_v4 = vld [vmem:[#allocation12 + $0x4] ss:$16 sps:$4 sm:$0xff]   ;;  %v8013_v20 = vld [vmem:[#allocation29_spill] sm:$0xff] }
0x15c3   :  { %5547 = vpow2.f32 %v4916_v60  ;;  %v3359_v32 = vadd.f32 %v8013_v20, %v7461_v1  ;;  %v8014_v11 = vld [vmem:[#allocation32_spill] sm:$0xff]  ;;  %v8015_v34 = vld [vmem:[#allocation33_spill] sm:$0xff] }
0x15c4   :  { %5549 = vpow2.f32 %v4917_v43  ;;  %v3432_v27 = vadd.f32 %v8014_v11, %v7464_v26  ;;  %v3361_v36 = vadd.f32 %v8015_v34, %v7471_v35  ;;  %v8016_v29 = vld [vmem:[#allocation36_spill] sm:$0xff] }
0x15c5   :  { %5551 = vtanh.f32 %v4186_v16  ;;  %v5704_v16 = vld [vmem:[#allocation12 + $0xc] ss:$16 sps:$4 sm:$0xff]   ;;  %v3434_v28 = vadd.f32 %v8016_v29, %v7474_v2 }
0x15cc   :  { %v5546_v47 = vpop.eup %5545 }
0x15cd   :  { %v5548_v44 = vpop.eup %5547  ;;  %v4191_v46 = vadd.f32 1.0, %v5546_v47 }
0x15ce   :  { %v4197_v50 = vadd.f32 1.0, %v5548_v44  ;;  %v5550_v51 = vpop.eup %5549 }
0x15cf   :  { %5553 = vrcp.f32 %v4191_v46  ;;  %v5552_v57 = vpop.eup %5551  ;;  %v4204_v39 = vadd.f32 1.0, %v5550_v51 }
0x15d0   :  { %5555 = vrcp.f32 %v4197_v50 }
0x15d1   :  { %5557 = vrcp.f32 %v4204_v39 }
0x15d9   :  { %v5554_v40 = vpop.eup %5553 }
0x15da   :  { %v5556_v8 = vpop.eup %5555  ;;  %v4208_v37 = vmul.f32 %v5554_v40, %v5552_v57 }
0x15db   :  { %v4207_v19 = vmul.f32 %v5556_v8, %v7622_v41  ;;  %v5558_v55 = vpop.eup %5557  ;;  %v7718_v41 = vld [vmem:[#allocation12 + $0x8c] ss:$16 sps:$4 sm:$0xff]  }
0x15dd   :  { %v7668_v42 = vadd.f32 %v4208_v37, %v4207_v19 }
0x15df   :  { %5559 = vtanh.f32 %v7668_v42 }
0x15e9   :  { %v5560_v59 = vpop.eup %5559 }
0x15ea   :  { %v4211_v61 = vmul.f32 %v5560_v59, %v5558_v55 }
0x15ec   :  { %v4216_v54 = vpack.c.bf16 %v4211_v61, %v4211_v61 }
0x15ee   :  { %4250 = vmatmul.mubr.bf16.vlgmr.msra.gmra.mrb[132].mxu0 %v4216_v54  ;;  %4291 = vmatmul.mubr.bf16.vlgmr.msra.gmra.mrb[132].mxu1 %v4216_v54 }
0x15ef   :  { %4333 = vmatpush1.bf16.msra.mxu0 %v7671_v5  ;;  %4374 = vmatpush1.bf16.msra.mxu1 %v7674_v13 }
0x15f0   :  { %4334 = vmatprep.subr.bf16.mxu0 %v7677_v63  ;;  %4375 = vmatprep.subr.bf16.mxu1 %v7680_v18 }
0x15f1   :  { %4364 = vmatprep.mubr.bf16.mxu0 %v7903_v38  ;;  %4405 = vmatprep.mubr.bf16.mxu1 %v7903_v38 }
0x15f3   :  { %4335 = vmatpush1.bf16.msra.mxu0 %v7685_v17  ;;  %4376 = vmatpush1.bf16.msra.mxu1 %v7688_v53 }
0x15f4   :  { %4336 = vmatprep.subr.bf16.mxu0 %v7691_v33  ;;  %4377 = vmatprep.subr.bf16.mxu1 %v7694_v62 }
0x15f7   :  { %4337 = vmatpush1.bf16.msra.mxu0 %v7697_v3  ;;  %4378 = vmatpush1.bf16.msra.mxu1 %v7700_v10 }
0x15f8   :  { %4338 = vmatprep.subr.bf16.mxu0 %v7703_v14  ;;  %4379 = vmatprep.subr.bf16.mxu1 %v7706_v45 }
0x15fb   :  { %4339 = vmatpush1.bf16.msra.mxu0 %v7709_v56  ;;  %4380 = vmatpush1.bf16.msra.mxu1 %v7712_v12 }
0x15fc   :  { %4340 = vmatprep.subr.bf16.mxu0 %v7715_v30  ;;  %4381 = vmatprep.subr.bf16.mxu1 %v7718_v41 }
0x15ff   :  { %4341 = vmatpush1.bf16.msra.mxu0 %v7721_v0  ;;  %4382 = vmatpush1.bf16.msra.mxu1 %v7724_v15 }
0x1600   :  { %4342 = vmatprep.subr.bf16.mxu0 %v7727_v22  ;;  %4383 = vmatprep.subr.bf16.mxu1 %v7730_v52 }
0x1603   :  { %4343 = vmatpush1.bf16.msra.mxu0 %v7733_v31  ;;  %4384 = vmatpush1.bf16.msra.mxu1 %v7736_v58 }
0x1604   :  { %4344 = vmatprep.subr.bf16.mxu0 %v7739_v49  ;;  %4385 = vmatprep.subr.bf16.mxu1 %v7742_v21 }
0x1607   :  { %4345 = vmatpush1.bf16.msra.mxu0 %v7745_v23  ;;  %4386 = vmatpush1.bf16.msra.mxu1 %v7748_v24 }
0x1608   :  { %4346 = vmatprep.subr.bf16.mxu0 %v7751_v25  ;;  %4387 = vmatprep.subr.bf16.mxu1 %v7754_v6 }
0x160b   :  { %4347 = vmatpush1.bf16.msra.mxu0 %v7757_v7  ;;  %4388 = vmatpush1.bf16.msra.mxu1 %v7760_v9 }
0x160c   :  { %4447 = vmatprep.subr.bf16.mxu0 %v5703_v4  ;;  %4488 = vmatprep.subr.bf16.mxu1 %v5704_v16 }
0x16c1   :  { %v4251_v48 = vpop.f32.mrb[132].mxu0  ;;  %v4292_v60 = vpop.f32.mrb[132].mxu1 }
0x16c2   :  { %v4299_v43 = vadd.f32 %v4251_v48, %v3359_v32  ;;  %v4301_v47 = vadd.f32 %v4292_v60, %v3432_v27  ;;  %v4253_v44 = vpop.f32.mrb[133].mxu0  ;;  %v4294_v46 = vpop.f32.mrb[133].mxu1 }
0x16c3   :  { %v4300_v50 = vadd.f32 %v4253_v44, %v3361_v36  ;;  %v4302_v51 = vadd.f32 %v4294_v46, %v3434_v28  ;;  %v4255_v57 = vpop.f32.mrb[134].mxu0  ;;  %v4296_v40 = vpop.f32.mrb[134].mxu1 }
0x16c4   :  { %v4918_v8 = vmul.f32 -1.442695, %v4299_v43  ;;  %v4256_v37 = vpop.f32.mrb[135].mxu0  ;;  %v4297_v39 = vpop.f32.mrb[135].mxu1 }
0x16c5   :  { %v4919_v19 = vmul.f32 -1.442695, %v4300_v50  ;;  %v4920_v55 = vmul.f32 -1.442695, %v4302_v51  ;;  %v5830_v37 = vmov 0.0   ;;  %v5218_v39 = vld [vmem:[%s7865_s10 + $0x8] sm:$0xff]  }
0x16c6   :  { %5561 = vpow2.f32 %v4918_v8  ;;  %v5217_v8 = vld [vmem:[%s7865_s10] sm:$0xff]  }
0x16c7   :  { %5563 = vpow2.f32 %v4919_v19  ;;  %v5219_v19 = vld [vmem:[%s7865_s10 + $0x10] sm:$0xff]  }
0x16c8   :  { %5565 = vpow2.f32 %v4920_v55  ;;  %v5220_v55 = vld [vmem:[%s7865_s10 + $0x18] sm:$0xff]  }
0x16c9   :  { %5567 = vtanh.f32 %v4301_v47 }
0x16d0   :  { %v5562_v59 = vpop.eup %5561 }
0x16d1   :  { %v5564_v61 = vpop.eup %5563  ;;  %v4306_v54 = vadd.f32 1.0, %v5562_v59  ;;  %v5221_v59 = vld [vmem:[%s7865_s10 + $0x20] sm:$0xff]  }
0x16d2   :  { %v4312_v4 = vadd.f32 1.0, %v5564_v61  ;;  %v5566_v16 = vpop.eup %5565  ;;  %v5222_v61 = vld [vmem:[%s7865_s10 + $0x28] sm:$0xff]  }
0x16d3   :  { %5569 = vrcp.f32 %v4306_v54  ;;  %v5568_v20 = vpop.eup %5567  ;;  %v4319_v34 = vadd.f32 1.0, %v5566_v16  ;;  %v5223_v54 = vld [vmem:[%s7865_s10 + $0x30] sm:$0xff]  }
0x16d4   :  { %5571 = vrcp.f32 %v4312_v4  ;;  %v5224_v4 = vld [vmem:[%s7865_s10 + $0x38] sm:$0xff]   ;;  %v8021_v16 = vld [vmem:[#allocation37_spill] sm:$0xff] }
0x16d5   :  { %5573 = vrcp.f32 %v4319_v34 }
0x16dd   :  { %v5570_v32 = vpop.eup %5569 }
0x16de   :  { %v5572_v11 = vpop.eup %5571  ;;  %v4323_v27 = vmul.f32 %v5570_v32, %v5568_v20  ;;  %v3369_v20 = vadd.f32 %v8021_v16, %v7461_v1  ;;  %v8022_v32 = vld [vmem:[#allocation40_spill] sm:$0xff] }
0x16df   :  { %v4322_v36 = vmul.f32 %v5572_v11, %v7668_v42  ;;  %v5574_v28 = vpop.eup %5573  ;;  %v3442_v11 = vadd.f32 %v8022_v32, %v7464_v26 }
0x16e1   :  { %v7772_v29 = vadd.f32 %v4323_v27, %v4322_v36  ;;  %v8023_v27 = vld [vmem:[#allocation41_spill] sm:$0xff]  ;;  %v8024_v36 = vld [vmem:[#allocation42_spill] sm:$0xff] }
0x16e2   :  { %v3371_v34 = vadd.f32 %v8023_v27, %v7471_v35 }
0x16e3   :  { %5575 = vtanh.f32 %v7772_v29 }
0x16ed   :  { %v5576_v48 = vpop.eup %5575 }
0x16ee   :  { %v4326_v60 = vmul.f32 %v5576_v48, %v5574_v28 }
0x16f0   :  { %v4331_v43 = vpack.c.bf16 %v4326_v60, %v4326_v60 }
0x16f2   :  { %4365 = vmatmul.mubr.bf16.vlgmr.msra.gmra.mrb[136].mxu0 %v4331_v43  ;;  %4406 = vmatmul.mubr.bf16.vlgmr.msra.gmra.mrb[136].mxu1 %v4331_v43 }
0x16f3   :  { %4448 = vmatpush1.bf16.msra.mxu0 %v7671_v5  ;;  %4489 = vmatpush1.bf16.msra.mxu1 %v7674_v13  ;;  %v8018_v5 = vld [vmem:[#allocation38_spill] sm:$0xff] }
0x16f4   :  { %4449 = vmatprep.subr.bf16.mxu0 %v7677_v63  ;;  %4490 = vmatprep.subr.bf16.mxu1 %v7680_v18  ;;  %v3438_v13 = vadd.f32 %v8018_v5, %v7464_v26  ;;  %v8019_v63 = vld [vmem:[#allocation35_spill] sm:$0xff] }
0x16f5   :  { %4479 = vmatprep.mubr.bf16.mxu0 %v7903_v38  ;;  %4520 = vmatprep.mubr.bf16.mxu1 %v7903_v38  ;;  %v8017_v38 = vld [vmem:[#allocation34_spill] sm:$0xff]  ;;  %v3367_v18 = vadd.f32 %v8019_v63, %v7471_v35 }
0x16f6   :  { %v3365_v42 = vadd.f32 %v8017_v38, %v7461_v1 }
0x16f7   :  { %4450 = vmatpush1.bf16.msra.mxu0 %v7685_v17  ;;  %4491 = vmatpush1.bf16.msra.mxu1 %v7688_v53  ;;  %v8020_v17 = vld [vmem:[#allocation39_spill] sm:$0xff] }
0x16f8   :  { %4451 = vmatprep.subr.bf16.mxu0 %v7691_v33  ;;  %4492 = vmatprep.subr.bf16.mxu1 %v7694_v62  ;;  %v3440_v53 = vadd.f32 %v8020_v17, %v7474_v2 }
0x16fb   :  { %4452 = vmatpush1.bf16.msra.mxu0 %v7697_v3  ;;  %4493 = vmatpush1.bf16.msra.mxu1 %v7700_v10 }
0x16fc   :  { %4453 = vmatprep.subr.bf16.mxu0 %v7703_v14  ;;  %4494 = vmatprep.subr.bf16.mxu1 %v7706_v45 }
0x16ff   :  { %4454 = vmatpush1.bf16.msra.mxu0 %v7709_v56  ;;  %4495 = vmatpush1.bf16.msra.mxu1 %v7712_v12 }
0x1700   :  { %4455 = vmatprep.subr.bf16.mxu0 %v7715_v30  ;;  %4496 = vmatprep.subr.bf16.mxu1 %v7718_v41 }
0x1703   :  { %4456 = vmatpush1.bf16.msra.mxu0 %v7721_v0  ;;  %4497 = vmatpush1.bf16.msra.mxu1 %v7724_v15 }
0x1704   :  { %4457 = vmatprep.subr.bf16.mxu0 %v7727_v22  ;;  %4498 = vmatprep.subr.bf16.mxu1 %v7730_v52 }
0x1707   :  { %4458 = vmatpush1.bf16.msra.mxu0 %v7733_v31  ;;  %4499 = vmatpush1.bf16.msra.mxu1 %v7736_v58 }
0x1708   :  { %4459 = vmatprep.subr.bf16.mxu0 %v7739_v49  ;;  %4500 = vmatprep.subr.bf16.mxu1 %v7742_v21 }
0x170b   :  { %4460 = vmatpush1.bf16.msra.mxu0 %v7745_v23  ;;  %4501 = vmatpush1.bf16.msra.mxu1 %v7748_v24 }
0x170c   :  { %4461 = vmatprep.subr.bf16.mxu0 %v7751_v25  ;;  %4502 = vmatprep.subr.bf16.mxu1 %v7754_v6 }
0x170f   :  { %4462 = vmatpush1.bf16.msra.mxu0 %v7757_v7  ;;  %4503 = vmatpush1.bf16.msra.mxu1 %v7760_v9 }
0x1710   :  { %4945 = vmatprep.subr.bf16.mxu0 %v5830_v37 }
0x17c5   :  { %v4366_v33 = vpop.f32.mrb[136].mxu0  ;;  %v4407_v62 = vpop.f32.mrb[136].mxu1 }
0x17c6   :  { %v4414_v3 = vadd.f32 %v4366_v33, %v3365_v42  ;;  %v4416_v10 = vadd.f32 %v4407_v62, %v3438_v13  ;;  %v4368_v14 = vpop.f32.mrb[137].mxu0  ;;  %v4409_v45 = vpop.f32.mrb[137].mxu1 }
0x17c7   :  { %v4415_v56 = vadd.f32 %v4368_v14, %v3367_v18  ;;  %v4417_v12 = vadd.f32 %v4409_v45, %v3440_v53  ;;  %v4370_v30 = vpop.f32.mrb[138].mxu0  ;;  %v4411_v41 = vpop.f32.mrb[138].mxu1 }
0x17c8   :  { %v4921_v0 = vmul.f32 -1.442695, %v4414_v3  ;;  %v4371_v15 = vpop.f32.mrb[139].mxu0  ;;  %v4412_v22 = vpop.f32.mrb[139].mxu1 }
0x17c9   :  { %v4922_v52 = vmul.f32 -1.442695, %v4415_v56  ;;  %v4923_v31 = vmul.f32 -1.442695, %v4417_v12 }
0x17ca   :  { %5577 = vpow2.f32 %v4921_v0 }
0x17cb   :  { %5579 = vpow2.f32 %v4922_v52 }
0x17cc   :  { %5581 = vpow2.f32 %v4923_v31 }
0x17cd   :  { %5583 = vtanh.f32 %v4416_v10 }
0x17d4   :  { %v5578_v58 = vpop.eup %5577 }
0x17d5   :  { %v5580_v49 = vpop.eup %5579  ;;  %v4421_v21 = vadd.f32 1.0, %v5578_v58  ;;  %v4927_v58 = vld [vmem:[#allocation4] ss:$0 sm:$0xff] }
0x17d6   :  { %v4427_v23 = vadd.f32 1.0, %v5580_v49  ;;  %v5582_v24 = vpop.eup %5581 }
0x17d7   :  { %5585 = vrcp.f32 %v4421_v21  ;;  %v5584_v25 = vpop.eup %5583  ;;  %v4434_v47 = vadd.f32 1.0, %v5582_v24 }
0x17d8   :  { %5587 = vrcp.f32 %v4427_v23 }
0x17d9   :  { %5589 = vrcp.f32 %v4434_v47 }
0x17e1   :  { %v5586_v6 = vpop.eup %5585 }
0x17e2   :  { %v5588_v7 = vpop.eup %5587  ;;  %v4438_v9 = vmul.f32 %v5586_v6, %v5584_v25 }
0x17e3   :  { %v4437_v44 = vmul.f32 %v5588_v7, %v7772_v29  ;;  %v5590_v50 = vpop.eup %5589  ;;  %v3444_v29 = vadd.f32 %v8024_v36, %v7474_v2 }
0x17e5   :  { %v7816_v46 = vadd.f32 %v4438_v9, %v4437_v44 }
0x17e7   :  { %5591 = vtanh.f32 %v7816_v46 }
0x17f1   :  { %v5592_v51 = vpop.eup %5591 }
0x17f2   :  { %v4441_v57 = vmul.f32 %v5592_v51, %v5590_v50 }
0x17f4   :  { %v4446_v40 = vpack.c.bf16 %v4441_v57, %v4441_v57 }
0x17f6   :  { %4480 = vmatmul.mubr.bf16.vlgmr.msra.gmra.mrb[140].mxu0 %v4446_v40  ;;  %4521 = vmatmul.mubr.bf16.vlgmr.msra.gmra.mrb[140].mxu1 %v4446_v40 }
0x17f7   :  { %4946 = vmatpush3.bf16.msra.mxu0 %v5217_v8  ;;  %4961 = vmatprep.mubr.msk.bf16.mxu0 %vm5831_vm2, %v5830_v37 }
0x17f8   :  { %4947 = vmatprep.subr.bf16.mxu0 %v5830_v37 }
0x17fb   :  { %4948 = vmatpush3.bf16.msra.mxu0 %v5218_v39 }
0x17fc   :  { %4949 = vmatprep.subr.bf16.mxu0 %v5830_v37 }
0x17ff   :  { %4950 = vmatpush3.bf16.msra.mxu0 %v5219_v19 }
0x1800   :  { %4951 = vmatprep.subr.bf16.mxu0 %v5830_v37 }
0x1803   :  { %4952 = vmatpush3.bf16.msra.mxu0 %v5220_v55 }
0x1804   :  { %4953 = vmatprep.subr.bf16.mxu0 %v5830_v37 }
0x1807   :  { %4954 = vmatpush3.bf16.msra.mxu0 %v5221_v59 }
0x1808   :  { %4955 = vmatprep.subr.bf16.mxu0 %v5830_v37 }
0x180b   :  { %4956 = vmatpush3.bf16.msra.mxu0 %v5222_v61 }
0x180c   :  { %4957 = vmatprep.subr.bf16.mxu0 %v5830_v37 }
0x180f   :  { %4958 = vmatpush3.bf16.msra.mxu0 %v5223_v54 }
0x1810   :  { %4959 = vmatprep.subr.bf16.mxu0 %v5830_v37 }
0x1813   :  { %4960 = vmatpush3.bf16.msra.mxu0 %v5224_v4 }
0x18c9   :  { %v4481_v28 = vpop.f32.mrb[140].mxu0  ;;  %v4522_v48 = vpop.f32.mrb[140].mxu1 }
0x18ca   :  { %v4529_v60 = vadd.f32 %v4481_v28, %v3369_v20  ;;  %v4531_v43 = vadd.f32 %v4522_v48, %v3442_v11  ;;  %v4483_v38 = vpop.f32.mrb[141].mxu0  ;;  %v4524_v42 = vpop.f32.mrb[141].mxu1 }
0x18cb   :  { %v4530_v5 = vadd.f32 %v4483_v38, %v3371_v34  ;;  %v4532_v13 = vadd.f32 %v4524_v42, %v3444_v29  ;;  %v4485_v63 = vpop.f32.mrb[142].mxu0  ;;  %v4526_v18 = vpop.f32.mrb[142].mxu1 }
0x18cc   :  { %v4924_v1 = vmul.f32 -1.442695, %v4529_v60  ;;  %v4486_v17 = vpop.f32.mrb[143].mxu0  ;;  %v4527_v53 = vpop.f32.mrb[143].mxu1 }
0x18cd   :  { %v4925_v26 = vmul.f32 -1.442695, %v4530_v5  ;;  %v4926_v35 = vmul.f32 -1.442695, %v4532_v13 }
0x18ce   :  { %5593 = vpow2.f32 %v4924_v1 }
0x18cf   :  { %5595 = vpow2.f32 %v4925_v26 }
0x18d0   :  { %5597 = vpow2.f32 %v4926_v35 }
0x18d1   :  { %5599 = vtanh.f32 %v4531_v43 }
0x18d8   :  { %v5594_v33 = vpop.eup %5593 }
0x18d9   :  { %v5596_v62 = vpop.eup %5595  ;;  %v4536_v2 = vadd.f32 1.0, %v5594_v33 }
0x18da   :  { %v4542_v3 = vadd.f32 1.0, %v5596_v62  ;;  %v5598_v10 = vpop.eup %5597 }
0x18db   :  { %5601 = vrcp.f32 %v4536_v2  ;;  %v5600_v14 = vpop.eup %5599  ;;  %v4549_v30 = vadd.f32 1.0, %v5598_v10 }
0x18dc   :  { %5603 = vrcp.f32 %v4542_v3 }
0x18dd   :  { %5605 = vrcp.f32 %v4549_v30 }
0x18e5   :  { %v5602_v45 = vpop.eup %5601 }
0x18e6   :  { %v5604_v56 = vpop.eup %5603  ;;  %v4553_v12 = vmul.f32 %v5602_v45, %v5600_v14 }
0x18e7   :  { %v4552_v41 = vmul.f32 %v5604_v56, %v7816_v46  ;;  %v5606_v15 = vpop.eup %5605 }
0x18e9   :  { %v4554_v0 = vadd.f32 %v4553_v12, %v4552_v41 }
0x18eb   :  { %5607 = vtanh.f32 %v4554_v0 }
0x18f5   :  { %v5608_v22 = vpop.eup %5607 }
0x18f6   :  { %v4556_v52 = vmul.f32 %v5608_v22, %v5606_v15 }
0x18f8   :  { %v4557_v31 = vpack.c.bf16 %v4556_v52, %v4556_v52 }
0x18fa   :  { %4962 = vmatmul.mubr.bf16.vlgmr.msra.gmra.mrb[144].mxu0 %v4557_v31 }
0x19cd   :  { %v4663_v49 = vpop.f32.mrb[144].mxu0 }
0x19ce   :  { %v4664_v21 = vadd.f32 %v4927_v58, %v4663_v49  ;;  %v4963_v23 = vpop.f32.mrb[145].mxu0 }
0x19cf   :  { %v4666_v24 = vpop.f32.mrb[146].mxu0 }
0x19d0   :  { %4670 = vst.msk [vmem:[%s7867_s12] sm:$0xff] %vm4669_vm3, %v4664_v21  ;;  %v4964_v25 = vpop.f32.mrb[147].mxu0 }
0x19d1   :  { %4675 = vsyncpa [#allocation6], 1 }
0x19d2   :  { %4676 = vsyncpa [#allocation8], 1 }
0x19d3   :  { %4677 = vsyncpa [#allocation11], 1 }

</bundles_post_ra>
